<compile_context>
chip_gen: v5e
topology: v5e:2x2
jax: 0.10.0
libtpu: 0.0.40
codegen_flags: <defaults>
</compile_context>

<pallas_src>
import functools
import math

import jax
import jax.numpy as jnp
from jax.experimental import pallas as pl
from jax.experimental.pallas import tpu as pltpu


# ---------------------------------------------------------------------------
# Model configuration (scaled-down, shapes consistent with the module)
# ---------------------------------------------------------------------------
D_MODEL = 32
NHEAD = 4
HEAD_DIM = D_MODEL // NHEAD
FFN = 64
NLAYERS = 2
CODEBOOK = 16
N_CLASSES = 10
LATENT = 4                       # latent_image_size
SEQ = LATENT * LATENT + 1        # hw + 1 (class token)
VOCAB = CODEBOOK + 1 + N_CLASSES + 1
CB_MASK_TOKEN_ID = CODEBOOK
CLS_MASK_TOKEN_ID = CODEBOOK + 1 + N_CLASSES

_ATTN_SCALE = 1.0 / math.sqrt(HEAD_DIM)


# ---------------------------------------------------------------------------
# In-kernel building blocks (operate on jnp values / Refs, all inside one call)
# ---------------------------------------------------------------------------
def _gelu_tanh(y):
    # tanh-approximate GELU (VPU + EUP)
    c = 0.7978845608028654  # sqrt(2/pi)
    return 0.5 * y * (1.0 + jnp.tanh(c * (y + 0.044715 * y * y * y)))


def _layernorm(x, g_ref, b_ref, eps):
    mean = jnp.mean(x, axis=-1, keepdims=True)
    var = jnp.mean(jnp.square(x - mean), axis=-1, keepdims=True)
    return (x - mean) * jax.lax.rsqrt(var + eps) * g_ref[...] + b_ref[...]


def _linear(x, w_ref, b_ref, gelu=False):
    y = jnp.dot(x, w_ref[...], preferred_element_type=jnp.float32) + b_ref[...]
    return _gelu_tanh(y) if gelu else y


def _attention_block(x, lp):
    # pre-LN multi-head self-attention with residual; x: (S, D) f32
    h = _layernorm(x, lp["norm1_g"], lp["norm1_b"], 1e-5)
    qkv = (jnp.dot(h, lp["in_proj_w"][...], preferred_element_type=jnp.float32)
           + lp["in_proj_b"][...])                                   # (S, 3D)
    w_o = lp["out_proj_w"][...]                                      # (D, D)

    acc = jnp.zeros_like(x)                                          # (S, D)
    for hh in range(NHEAD):
        c = hh * HEAD_DIM
        q = qkv[:, c:c + HEAD_DIM] * _ATTN_SCALE                     # (S, Dh)
        k = qkv[:, D_MODEL + c:D_MODEL + c + HEAD_DIM]               # (S, Dh)
        v = qkv[:, 2 * D_MODEL + c:2 * D_MODEL + c + HEAD_DIM]       # (S, Dh)
        s = jax.lax.dot_general(q, k, (((1,), (1,)), ((), ())),
                                preferred_element_type=jnp.float32)  # (S, S)
        s = s - jnp.max(s, axis=-1, keepdims=True)
        p = jnp.exp(s)
        p = p * pl.reciprocal(jnp.sum(p, axis=-1, keepdims=True), approx=True)
        o = jnp.dot(p, v, preferred_element_type=jnp.float32)        # (S, Dh)
        # fold the head directly into the output projection:
        # concat(o_h) @ W_o == sum_h o_h @ W_o[h*Dh:(h+1)*Dh, :]
        acc = acc + jnp.dot(o, w_o[c:c + HEAD_DIM, :],
                            preferred_element_type=jnp.float32)
    return x + acc + lp["out_proj_b"][...]


def _ffn_block(x, lp):
    h = _layernorm(x, lp["norm2_g"], lp["norm2_b"], 1e-5)
    h = _linear(h, lp["lin1_w"], lp["lin1_b"], gelu=True)
    h = _linear(h, lp["lin2_w"], lp["lin2_b"])
    return x + h


def _forward_body(p, x_ref, o_ref):
    x = x_ref[0].astype(jnp.float32)                                 # (S, D)

    # TE_in: LN -> (Dropout) -> Linear -> GELU -> LN -> (Dropout) -> Linear -> GELU
    ti = p["te_in"]
    x = _layernorm(x, ti["ln1_g"], ti["ln1_b"], 1e-12)
    x = _linear(x, ti["lin1_w"], ti["lin1_b"], gelu=True)
    x = _layernorm(x, ti["ln2_g"], ti["ln2_b"], 1e-12)
    x = _linear(x, ti["lin2_w"], ti["lin2_b"], gelu=True)

    # Transformer encoder stack (norm_first=True, batch_first=True)
    for lp in p["layers"]:
        x = _attention_block(x, lp)
        x = _ffn_block(x, lp)

    # TE_out: LN -> (Dropout) -> Linear -> GELU -> LN
    to = p["te_out"]
    x = _layernorm(x, to["ln1_g"], to["ln1_b"], 1e-12)
    x = _linear(x, to["lin_w"], to["lin_b"], gelu=True)
    x = _layernorm(x, to["ln2_g"], to["ln2_b"], 1e-12)

    # logits: x @ emb.T + bias (trans-B contraction, bias broadcast per position)
    logit = jax.lax.dot_general(x, p["emb"][...], (((1,), (1,)), ((), ())),
                                preferred_element_type=jnp.float32)  # (S, V)
    logit = logit + p["out_bias"][...]
    o_ref[0] = logit.astype(o_ref.dtype)


# ---------------------------------------------------------------------------
# Fused pallas_call wrapper
# ---------------------------------------------------------------------------
def _const_index_map(ndim):
    return lambda b: (0,) * ndim


def transformer_forward_pallas(params, x):
    """x: (B, S, D) embedded+positional input -> (B, S, VOCAB) logits."""
    B, S, D = x.shape
    kparams = {k: params[k] for k in ("emb", "te_in", "layers", "te_out", "out_bias")}
    leaves, treedef = jax.tree_util.tree_flatten(kparams)

    def kernel(*refs):
        x_ref = refs[0]
        o_ref = refs[-1]
        p = jax.tree_util.tree_unflatten(treedef, list(refs[1:-1]))
        _forward_body(p, x_ref, o_ref)

    in_specs = [pl.BlockSpec((1, S, D), lambda b: (b, 0, 0))]
    # Every weight is a full-array block with a constant index map -> stays
    # resident in VMEM across the (parallel) batch grid.
    in_specs += [pl.BlockSpec(leaf.shape, _const_index_map(leaf.ndim))
                 for leaf in leaves]
    out_specs = pl.BlockSpec((1, S, VOCAB), lambda b: (b, 0, 0))

    return pl.pallas_call(
        kernel,
        out_shape=jax.ShapeDtypeStruct((B, S, VOCAB), jnp.float32),
        grid=(B,),
        in_specs=in_specs,
        out_specs=out_specs,
        compiler_params=pltpu.CompilerParams(dimension_semantics=("parallel",)),
    )(x, *leaves)


# ---------------------------------------------------------------------------
# Parameters (deterministic synthetic init)
# ---------------------------------------------------------------------------
def init_params(key):
    keys = iter(jax.random.split(key, 128))

    def nrm(shape, std=0.02):
        return (std * jax.random.normal(next(keys), shape)).astype(jnp.float32)

    def ones(shape):
        return jnp.ones(shape, jnp.float32)

    def zeros(shape):
        return jnp.zeros(shape, jnp.float32)

    p = {}
    p["emb"] = nrm((VOCAB, D_MODEL))
    p["pos"] = nrm((1, SEQ, D_MODEL))

    p["te_in"] = {
        "ln1_g": ones((1, D_MODEL)), "ln1_b": zeros((1, D_MODEL)),
        "lin1_w": nrm((D_MODEL, D_MODEL)), "lin1_b": nrm((1, D_MODEL)),
        "ln2_g": ones((1, D_MODEL)), "ln2_b": zeros((1, D_MODEL)),
        "lin2_w": nrm((D_MODEL, D_MODEL)), "lin2_b": nrm((1, D_MODEL)),
    }

    layers = []
    for _ in range(NLAYERS):
        layers.append({
            "in_proj_w": nrm((D_MODEL, 3 * D_MODEL)),
            "in_proj_b": nrm((1, 3 * D_MODEL)),
            "out_proj_w": nrm((D_MODEL, D_MODEL)),
            "out_proj_b": nrm((1, D_MODEL)),
            "lin1_w": nrm((D_MODEL, FFN)), "lin1_b": nrm((1, FFN)),
            "lin2_w": nrm((FFN, D_MODEL)), "lin2_b": nrm((1, D_MODEL)),
            "norm1_g": ones((1, D_MODEL)), "norm1_b": zeros((1, D_MODEL)),
            "norm2_g": ones((1, D_MODEL)), "norm2_b": zeros((1, D_MODEL)),
        })
    p["layers"] = layers

    p["te_out"] = {
        "ln1_g": ones((1, D_MODEL)), "ln1_b": zeros((1, D_MODEL)),
        "lin_w": nrm((D_MODEL, D_MODEL)), "lin_b": nrm((1, D_MODEL)),
        "ln2_g": ones((1, D_MODEL)), "ln2_b": zeros((1, D_MODEL)),
    }

    p["out_bias"] = zeros((SEQ, VOCAB))
    return p


# ---------------------------------------------------------------------------
# Forward pass (mirrors Transformer.forward)
# ---------------------------------------------------------------------------
@jax.jit
def _forward_core(params, image_token, image_token_mask, label_token, label_mask):
    org_inp_seq = jnp.concatenate([image_token, label_token[:, None]], axis=-1)
    masked_image = jnp.where(image_token_mask, CB_MASK_TOKEN_ID, image_token)
    masked_label = jnp.where(label_mask, CLS_MASK_TOKEN_ID, label_token)
    masked_inp_seq = jnp.concatenate([masked_image, masked_label[:, None]], axis=-1)

    # token + positional embedding (data-dependent gather stays at XLA level)
    x = params["emb"][masked_inp_seq] + params["pos"]                 # (B, S, D)

    logit = transformer_forward_pallas(params, x)                     # (B, S, V)
    return logit, org_inp_seq, masked_inp_seq


def forward(params, image_token, image_token_mask=None, label=None, label_mask=None):
    b, hw = image_token.shape
    if image_token_mask is None:
        image_token_mask = jnp.zeros((b, hw), dtype=bool)
    image_token_mask = image_token_mask.astype(bool)

    if label is None:
        label_token = jnp.full((b,), CLS_MASK_TOKEN_ID, dtype=image_token.dtype)
    else:
        label_token = (label + CODEBOOK + 1).astype(image_token.dtype)

    if label_mask is None:
        label_mask = jnp.zeros((b,), dtype=bool)
    label_mask = label_mask.astype(bool)

    logit, org_inp_seq, masked_inp_seq = _forward_core(
        params, image_token, image_token_mask, label_token, label_mask)

    return {
        "logit": logit,
        "org_inp_seq": org_inp_seq,
        "masked_inp_seq": masked_inp_seq,
        "image_token_mask": image_token_mask,
        "label_mask": label_mask,
    }


# ---------------------------------------------------------------------------
if __name__ == "__main__":
    key = jax.random.PRNGKey(0)
    pkey, tkey, mkey, lkey = jax.random.split(key, 4)

    params = init_params(pkey)

    batch = 2
    image_token = jax.random.randint(tkey, (batch, LATENT * LATENT), 0, CODEBOOK,
                                     dtype=jnp.int32)
    image_token_mask = jax.random.bernoulli(mkey, 0.3, (batch, LATENT * LATENT))
    label = jax.random.randint(lkey, (batch,), 0, N_CLASSES, dtype=jnp.int32)
    label_mask = jnp.array([True, False])

    out = forward(params, image_token, image_token_mask, label, label_mask)
    jax.block_until_ready(out["logit"])

    assert out["logit"].shape == (batch, SEQ, VOCAB)
    assert out["org_inp_seq"].shape == (batch, SEQ)
    assert out["masked_inp_seq"].shape == (batch, SEQ)
    assert bool(jnp.all(jnp.isfinite(out["logit"])))
    print("KERNEL_OK")
</pallas_src>

<mosaic_0001>
module attributes {stable_mosaic.version = 11 : i64} {
  func.func @kernel(%arg0: i32, %arg1: memref<1x17x32xf32, #tpu.memory_space<vmem>>, %arg2: memref<28x32xf32, #tpu.memory_space<vmem>>, %arg3: memref<1x96xf32, #tpu.memory_space<vmem>>, %arg4: memref<32x96xf32, #tpu.memory_space<vmem>>, %arg5: memref<1x64xf32, #tpu.memory_space<vmem>>, %arg6: memref<32x64xf32, #tpu.memory_space<vmem>>, %arg7: memref<1x32xf32, #tpu.memory_space<vmem>>, %arg8: memref<64x32xf32, #tpu.memory_space<vmem>>, %arg9: memref<1x32xf32, #tpu.memory_space<vmem>>, %arg10: memref<1x32xf32, #tpu.memory_space<vmem>>, %arg11: memref<1x32xf32, #tpu.memory_space<vmem>>, %arg12: memref<1x32xf32, #tpu.memory_space<vmem>>, %arg13: memref<1x32xf32, #tpu.memory_space<vmem>>, %arg14: memref<32x32xf32, #tpu.memory_space<vmem>>, %arg15: memref<1x96xf32, #tpu.memory_space<vmem>>, %arg16: memref<32x96xf32, #tpu.memory_space<vmem>>, %arg17: memref<1x64xf32, #tpu.memory_space<vmem>>, %arg18: memref<32x64xf32, #tpu.memory_space<vmem>>, %arg19: memref<1x32xf32, #tpu.memory_space<vmem>>, %arg20: memref<64x32xf32, #tpu.memory_space<vmem>>, %arg21: memref<1x32xf32, #tpu.memory_space<vmem>>, %arg22: memref<1x32xf32, #tpu.memory_space<vmem>>, %arg23: memref<1x32xf32, #tpu.memory_space<vmem>>, %arg24: memref<1x32xf32, #tpu.memory_space<vmem>>, %arg25: memref<1x32xf32, #tpu.memory_space<vmem>>, %arg26: memref<32x32xf32, #tpu.memory_space<vmem>>, %arg27: memref<17x28xf32, #tpu.memory_space<vmem>>, %arg28: memref<1x32xf32, #tpu.memory_space<vmem>>, %arg29: memref<32x32xf32, #tpu.memory_space<vmem>>, %arg30: memref<1x32xf32, #tpu.memory_space<vmem>>, %arg31: memref<32x32xf32, #tpu.memory_space<vmem>>, %arg32: memref<1x32xf32, #tpu.memory_space<vmem>>, %arg33: memref<1x32xf32, #tpu.memory_space<vmem>>, %arg34: memref<1x32xf32, #tpu.memory_space<vmem>>, %arg35: memref<1x32xf32, #tpu.memory_space<vmem>>, %arg36: memref<1x32xf32, #tpu.memory_space<vmem>>, %arg37: memref<32x32xf32, #tpu.memory_space<vmem>>, %arg38: memref<1x32xf32, #tpu.memory_space<vmem>>, %arg39: memref<1x32xf32, #tpu.memory_space<vmem>>, %arg40: memref<1x32xf32, #tpu.memory_space<vmem>>, %arg41: memref<1x32xf32, #tpu.memory_space<vmem>>, %arg42: memref<1x17x28xf32, #tpu.memory_space<vmem>>) attributes {dimension_semantics = [#tpu.dimension_semantics<parallel>], iteration_bounds = array<i64: 2>, scalar_prefetch = 0 : i64, scratch_operands = 0 : i64, tpu.core_type = #tpu.core_type<tc>, window_params = [{transform_indices = @transform_0, window_bounds = array<i64: 1, 17, 32>}, {pipeline_mode = #tpu.pipeline_mode<synchronous>, transform_indices = @transform_1, window_bounds = array<i64: 28, 32>}, {pipeline_mode = #tpu.pipeline_mode<synchronous>, transform_indices = @transform_2, window_bounds = array<i64: 1, 96>}, {pipeline_mode = #tpu.pipeline_mode<synchronous>, transform_indices = @transform_3, window_bounds = array<i64: 32, 96>}, {pipeline_mode = #tpu.pipeline_mode<synchronous>, transform_indices = @transform_4, window_bounds = array<i64: 1, 64>}, {pipeline_mode = #tpu.pipeline_mode<synchronous>, transform_indices = @transform_5, window_bounds = array<i64: 32, 64>}, {pipeline_mode = #tpu.pipeline_mode<synchronous>, transform_indices = @transform_6, window_bounds = array<i64: 1, 32>}, {pipeline_mode = #tpu.pipeline_mode<synchronous>, transform_indices = @transform_7, window_bounds = array<i64: 64, 32>}, {pipeline_mode = #tpu.pipeline_mode<synchronous>, transform_indices = @transform_8, window_bounds = array<i64: 1, 32>}, {pipeline_mode = #tpu.pipeline_mode<synchronous>, transform_indices = @transform_9, window_bounds = array<i64: 1, 32>}, {pipeline_mode = #tpu.pipeline_mode<synchronous>, transform_indices = @transform_10, window_bounds = array<i64: 1, 32>}, {pipeline_mode = #tpu.pipeline_mode<synchronous>, transform_indices = @transform_11, window_bounds = array<i64: 1, 32>}, {pipeline_mode = #tpu.pipeline_mode<synchronous>, transform_indices = @transform_12, window_bounds = array<i64: 1, 32>}, {pipeline_mode = #tpu.pipeline_mode<synchronous>, transform_indices = @transform_13, window_bounds = array<i64: 32, 32>}, {pipeline_mode = #tpu.pipeline_mode<synchronous>, transform_indices = @transform_14, window_bounds = array<i64: 1, 96>}, {pipeline_mode = #tpu.pipeline_mode<synchronous>, transform_indices = @transform_15, window_bounds = array<i64: 32, 96>}, {pipeline_mode = #tpu.pipeline_mode<synchronous>, transform_indices = @transform_16, window_bounds = array<i64: 1, 64>}, {pipeline_mode = #tpu.pipeline_mode<synchronous>, transform_indices = @transform_17, window_bounds = array<i64: 32, 64>}, {pipeline_mode = #tpu.pipeline_mode<synchronous>, transform_indices = @transform_18, window_bounds = array<i64: 1, 32>}, {pipeline_mode = #tpu.pipeline_mode<synchronous>, transform_indices = @transform_19, window_bounds = array<i64: 64, 32>}, {pipeline_mode = #tpu.pipeline_mode<synchronous>, transform_indices = @transform_20, window_bounds = array<i64: 1, 32>}, {pipeline_mode = #tpu.pipeline_mode<synchronous>, transform_indices = @transform_21, window_bounds = array<i64: 1, 32>}, {pipeline_mode = #tpu.pipeline_mode<synchronous>, transform_indices = @transform_22, window_bounds = array<i64: 1, 32>}, {pipeline_mode = #tpu.pipeline_mode<synchronous>, transform_indices = @transform_23, window_bounds = array<i64: 1, 32>}, {pipeline_mode = #tpu.pipeline_mode<synchronous>, transform_indices = @transform_24, window_bounds = array<i64: 1, 32>}, {pipeline_mode = #tpu.pipeline_mode<synchronous>, transform_indices = @transform_25, window_bounds = array<i64: 32, 32>}, {pipeline_mode = #tpu.pipeline_mode<synchronous>, transform_indices = @transform_26, window_bounds = array<i64: 17, 28>}, {pipeline_mode = #tpu.pipeline_mode<synchronous>, transform_indices = @transform_27, window_bounds = array<i64: 1, 32>}, {pipeline_mode = #tpu.pipeline_mode<synchronous>, transform_indices = @transform_28, window_bounds = array<i64: 32, 32>}, {pipeline_mode = #tpu.pipeline_mode<synchronous>, transform_indices = @transform_29, window_bounds = array<i64: 1, 32>}, {pipeline_mode = #tpu.pipeline_mode<synchronous>, transform_indices = @transform_30, window_bounds = array<i64: 32, 32>}, {pipeline_mode = #tpu.pipeline_mode<synchronous>, transform_indices = @transform_31, window_bounds = array<i64: 1, 32>}, {pipeline_mode = #tpu.pipeline_mode<synchronous>, transform_indices = @transform_32, window_bounds = array<i64: 1, 32>}, {pipeline_mode = #tpu.pipeline_mode<synchronous>, transform_indices = @transform_33, window_bounds = array<i64: 1, 32>}, {pipeline_mode = #tpu.pipeline_mode<synchronous>, transform_indices = @transform_34, window_bounds = array<i64: 1, 32>}, {pipeline_mode = #tpu.pipeline_mode<synchronous>, transform_indices = @transform_35, window_bounds = array<i64: 1, 32>}, {pipeline_mode = #tpu.pipeline_mode<synchronous>, transform_indices = @transform_36, window_bounds = array<i64: 32, 32>}, {pipeline_mode = #tpu.pipeline_mode<synchronous>, transform_indices = @transform_37, window_bounds = array<i64: 1, 32>}, {pipeline_mode = #tpu.pipeline_mode<synchronous>, transform_indices = @transform_38, window_bounds = array<i64: 1, 32>}, {pipeline_mode = #tpu.pipeline_mode<synchronous>, transform_indices = @transform_39, window_bounds = array<i64: 1, 32>}, {pipeline_mode = #tpu.pipeline_mode<synchronous>, transform_indices = @transform_40, window_bounds = array<i64: 1, 32>}, {transform_indices = @transform_41, window_bounds = array<i64: 1, 17, 28>}]} {
    %c0 = arith.constant 0 : index
    %c0_0 = arith.constant 0 : index
    %c0_1 = arith.constant 0 : index
    %0 = vector.load %arg1[%c0, %c0_0, %c0_1] : memref<1x17x32xf32, #tpu.memory_space<vmem>>, vector<1x17x32xf32>
    %1 = vector.shape_cast %0 : vector<1x17x32xf32> to vector<17x32xf32>
    %cst = arith.constant dense<0.000000e+00> : vector<17xf32>
    %2 = vector.multi_reduction <add>, %1, %cst [1] : vector<17x32xf32> to vector<17xf32>
    %3 = vector.shape_cast %2 : vector<17xf32> to vector<17x1xf32>
    %cst_2 = arith.constant 3.200000e+01 : f32
    %4 = vector.broadcast %cst_2 : f32 to vector<17x1xf32>
    %5 = arith.divf %3, %4 : vector<17x1xf32>
    %6 = vector.broadcast %5 : vector<17x1xf32> to vector<17x32xf32>
    %7 = arith.subf %1, %6 : vector<17x32xf32>
    %8 = arith.mulf %7, %7 : vector<17x32xf32>
    %cst_3 = arith.constant dense<0.000000e+00> : vector<17xf32>
    %9 = vector.multi_reduction <add>, %8, %cst_3 [1] : vector<17x32xf32> to vector<17xf32>
    %10 = vector.shape_cast %9 : vector<17xf32> to vector<17x1xf32>
    %cst_4 = arith.constant 3.200000e+01 : f32
    %11 = vector.broadcast %cst_4 : f32 to vector<17x1xf32>
    %12 = arith.divf %10, %11 : vector<17x1xf32>
    %13 = vector.broadcast %5 : vector<17x1xf32> to vector<17x32xf32>
    %14 = arith.subf %1, %13 : vector<17x32xf32>
    %cst_5 = arith.constant 9.99999996E-13 : f32
    %15 = vector.broadcast %cst_5 : f32 to vector<17x1xf32>
    %16 = arith.addf %12, %15 : vector<17x1xf32>
    %17 = math.rsqrt %16 : vector<17x1xf32>
    %18 = vector.broadcast %17 : vector<17x1xf32> to vector<17x32xf32>
    %19 = arith.mulf %14, %18 : vector<17x32xf32>
    %c0_6 = arith.constant 0 : index
    %c0_7 = arith.constant 0 : index
    %20 = vector.load %arg33[%c0_6, %c0_7] : memref<1x32xf32, #tpu.memory_space<vmem>>, vector<1x32xf32>
    %21 = vector.broadcast %20 : vector<1x32xf32> to vector<17x32xf32>
    %22 = arith.mulf %19, %21 : vector<17x32xf32>
    %c0_8 = arith.constant 0 : index
    %c0_9 = arith.constant 0 : index
    %23 = vector.load %arg32[%c0_8, %c0_9] : memref<1x32xf32, #tpu.memory_space<vmem>>, vector<1x32xf32>
    %24 = vector.broadcast %23 : vector<1x32xf32> to vector<17x32xf32>
    %25 = arith.addf %22, %24 : vector<17x32xf32>
    %c0_10 = arith.constant 0 : index
    %c0_11 = arith.constant 0 : index
    %26 = vector.load %arg29[%c0_10, %c0_11] : memref<32x32xf32, #tpu.memory_space<vmem>>, vector<32x32xf32>
    %cst_12 = arith.constant dense<0.000000e+00> : vector<17x32xf32>
    %27 = tpu.matmul %25, %26, %cst_12 {dimension_numbers = #tpu.dot_dimension_numbers<[1], [0], [0], [1], [0, 0, 1, 1], [], []>} : vector<17x32xf32>, vector<32x32xf32>, vector<17x32xf32> -> vector<17x32xf32>
    %c0_13 = arith.constant 0 : index
    %c0_14 = arith.constant 0 : index
    %28 = vector.load %arg28[%c0_13, %c0_14] : memref<1x32xf32, #tpu.memory_space<vmem>>, vector<1x32xf32>
    %29 = vector.broadcast %28 : vector<1x32xf32> to vector<17x32xf32>
    %30 = arith.addf %27, %29 : vector<17x32xf32>
    %cst_15 = arith.constant 5.000000e-01 : f32
    %31 = vector.broadcast %cst_15 : f32 to vector<17x32xf32>
    %32 = arith.mulf %31, %30 : vector<17x32xf32>
    %cst_16 = arith.constant 4.471500e-02 : f32
    %33 = vector.broadcast %cst_16 : f32 to vector<17x32xf32>
    %34 = arith.mulf %33, %30 : vector<17x32xf32>
    %35 = arith.mulf %34, %30 : vector<17x32xf32>
    %36 = arith.mulf %35, %30 : vector<17x32xf32>
    %37 = arith.addf %30, %36 : vector<17x32xf32>
    %cst_17 = arith.constant 0.797884583 : f32
    %38 = vector.broadcast %cst_17 : f32 to vector<17x32xf32>
    %39 = arith.mulf %38, %37 : vector<17x32xf32>
    %40 = math.tanh %39 : vector<17x32xf32>
    %cst_18 = arith.constant 1.000000e+00 : f32
    %41 = vector.broadcast %cst_18 : f32 to vector<17x32xf32>
    %42 = arith.addf %41, %40 : vector<17x32xf32>
    %43 = arith.mulf %32, %42 : vector<17x32xf32>
    %cst_19 = arith.constant dense<0.000000e+00> : vector<17xf32>
    %44 = vector.multi_reduction <add>, %43, %cst_19 [1] : vector<17x32xf32> to vector<17xf32>
    %45 = vector.shape_cast %44 : vector<17xf32> to vector<17x1xf32>
    %cst_20 = arith.constant 3.200000e+01 : f32
    %46 = vector.broadcast %cst_20 : f32 to vector<17x1xf32>
    %47 = arith.divf %45, %46 : vector<17x1xf32>
    %48 = vector.broadcast %47 : vector<17x1xf32> to vector<17x32xf32>
    %49 = arith.subf %43, %48 : vector<17x32xf32>
    %50 = arith.mulf %49, %49 : vector<17x32xf32>
    %cst_21 = arith.constant dense<0.000000e+00> : vector<17xf32>
    %51 = vector.multi_reduction <add>, %50, %cst_21 [1] : vector<17x32xf32> to vector<17xf32>
    %52 = vector.shape_cast %51 : vector<17xf32> to vector<17x1xf32>
    %cst_22 = arith.constant 3.200000e+01 : f32
    %53 = vector.broadcast %cst_22 : f32 to vector<17x1xf32>
    %54 = arith.divf %52, %53 : vector<17x1xf32>
    %55 = vector.broadcast %47 : vector<17x1xf32> to vector<17x32xf32>
    %56 = arith.subf %43, %55 : vector<17x32xf32>
    %cst_23 = arith.constant 9.99999996E-13 : f32
    %57 = vector.broadcast %cst_23 : f32 to vector<17x1xf32>
    %58 = arith.addf %54, %57 : vector<17x1xf32>
    %59 = math.rsqrt %58 : vector<17x1xf32>
    %60 = vector.broadcast %59 : vector<17x1xf32> to vector<17x32xf32>
    %61 = arith.mulf %56, %60 : vector<17x32xf32>
    %c0_24 = arith.constant 0 : index
    %c0_25 = arith.constant 0 : index
    %62 = vector.load %arg35[%c0_24, %c0_25] : memref<1x32xf32, #tpu.memory_space<vmem>>, vector<1x32xf32>
    %63 = vector.broadcast %62 : vector<1x32xf32> to vector<17x32xf32>
    %64 = arith.mulf %61, %63 : vector<17x32xf32>
    %c0_26 = arith.constant 0 : index
    %c0_27 = arith.constant 0 : index
    %65 = vector.load %arg34[%c0_26, %c0_27] : memref<1x32xf32, #tpu.memory_space<vmem>>, vector<1x32xf32>
    %66 = vector.broadcast %65 : vector<1x32xf32> to vector<17x32xf32>
    %67 = arith.addf %64, %66 : vector<17x32xf32>
    %c0_28 = arith.constant 0 : index
    %c0_29 = arith.constant 0 : index
    %68 = vector.load %arg31[%c0_28, %c0_29] : memref<32x32xf32, #tpu.memory_space<vmem>>, vector<32x32xf32>
    %cst_30 = arith.constant dense<0.000000e+00> : vector<17x32xf32>
    %69 = tpu.matmul %67, %68, %cst_30 {dimension_numbers = #tpu.dot_dimension_numbers<[1], [0], [0], [1], [0, 0, 1, 1], [], []>} : vector<17x32xf32>, vector<32x32xf32>, vector<17x32xf32> -> vector<17x32xf32>
    %c0_31 = arith.constant 0 : index
    %c0_32 = arith.constant 0 : index
    %70 = vector.load %arg30[%c0_31, %c0_32] : memref<1x32xf32, #tpu.memory_space<vmem>>, vector<1x32xf32>
    %71 = vector.broadcast %70 : vector<1x32xf32> to vector<17x32xf32>
    %72 = arith.addf %69, %71 : vector<17x32xf32>
    %cst_33 = arith.constant 5.000000e-01 : f32
    %73 = vector.broadcast %cst_33 : f32 to vector<17x32xf32>
    %74 = arith.mulf %73, %72 : vector<17x32xf32>
    %cst_34 = arith.constant 4.471500e-02 : f32
    %75 = vector.broadcast %cst_34 : f32 to vector<17x32xf32>
    %76 = arith.mulf %75, %72 : vector<17x32xf32>
    %77 = arith.mulf %76, %72 : vector<17x32xf32>
    %78 = arith.mulf %77, %72 : vector<17x32xf32>
    %79 = arith.addf %72, %78 : vector<17x32xf32>
    %cst_35 = arith.constant 0.797884583 : f32
    %80 = vector.broadcast %cst_35 : f32 to vector<17x32xf32>
    %81 = arith.mulf %80, %79 : vector<17x32xf32>
    %82 = math.tanh %81 : vector<17x32xf32>
    %cst_36 = arith.constant 1.000000e+00 : f32
    %83 = vector.broadcast %cst_36 : f32 to vector<17x32xf32>
    %84 = arith.addf %83, %82 : vector<17x32xf32>
    %85 = arith.mulf %74, %84 : vector<17x32xf32>
    %cst_37 = arith.constant dense<0.000000e+00> : vector<17xf32>
    %86 = vector.multi_reduction <add>, %85, %cst_37 [1] : vector<17x32xf32> to vector<17xf32>
    %87 = vector.shape_cast %86 : vector<17xf32> to vector<17x1xf32>
    %cst_38 = arith.constant 3.200000e+01 : f32
    %88 = vector.broadcast %cst_38 : f32 to vector<17x1xf32>
    %89 = arith.divf %87, %88 : vector<17x1xf32>
    %90 = vector.broadcast %89 : vector<17x1xf32> to vector<17x32xf32>
    %91 = arith.subf %85, %90 : vector<17x32xf32>
    %92 = arith.mulf %91, %91 : vector<17x32xf32>
    %cst_39 = arith.constant dense<0.000000e+00> : vector<17xf32>
    %93 = vector.multi_reduction <add>, %92, %cst_39 [1] : vector<17x32xf32> to vector<17xf32>
    %94 = vector.shape_cast %93 : vector<17xf32> to vector<17x1xf32>
    %cst_40 = arith.constant 3.200000e+01 : f32
    %95 = vector.broadcast %cst_40 : f32 to vector<17x1xf32>
    %96 = arith.divf %94, %95 : vector<17x1xf32>
    %97 = vector.broadcast %89 : vector<17x1xf32> to vector<17x32xf32>
    %98 = arith.subf %85, %97 : vector<17x32xf32>
    %cst_41 = arith.constant 9.99999974E-6 : f32
    %99 = vector.broadcast %cst_41 : f32 to vector<17x1xf32>
    %100 = arith.addf %96, %99 : vector<17x1xf32>
    %101 = math.rsqrt %100 : vector<17x1xf32>
    %102 = vector.broadcast %101 : vector<17x1xf32> to vector<17x32xf32>
    %103 = arith.mulf %98, %102 : vector<17x32xf32>
    %c0_42 = arith.constant 0 : index
    %c0_43 = arith.constant 0 : index
    %104 = vector.load %arg10[%c0_42, %c0_43] : memref<1x32xf32, #tpu.memory_space<vmem>>, vector<1x32xf32>
    %105 = vector.broadcast %104 : vector<1x32xf32> to vector<17x32xf32>
    %106 = arith.mulf %103, %105 : vector<17x32xf32>
    %c0_44 = arith.constant 0 : index
    %c0_45 = arith.constant 0 : index
    %107 = vector.load %arg9[%c0_44, %c0_45] : memref<1x32xf32, #tpu.memory_space<vmem>>, vector<1x32xf32>
    %108 = vector.broadcast %107 : vector<1x32xf32> to vector<17x32xf32>
    %109 = arith.addf %106, %108 : vector<17x32xf32>
    %c0_46 = arith.constant 0 : index
    %c0_47 = arith.constant 0 : index
    %110 = vector.load %arg4[%c0_46, %c0_47] : memref<32x96xf32, #tpu.memory_space<vmem>>, vector<32x96xf32>
    %cst_48 = arith.constant dense<0.000000e+00> : vector<17x96xf32>
    %111 = tpu.matmul %109, %110, %cst_48 {dimension_numbers = #tpu.dot_dimension_numbers<[1], [0], [0], [1], [0, 0, 1, 1], [], []>} : vector<17x32xf32>, vector<32x96xf32>, vector<17x96xf32> -> vector<17x96xf32>
    %c0_49 = arith.constant 0 : index
    %c0_50 = arith.constant 0 : index
    %112 = vector.load %arg3[%c0_49, %c0_50] : memref<1x96xf32, #tpu.memory_space<vmem>>, vector<1x96xf32>
    %113 = vector.broadcast %112 : vector<1x96xf32> to vector<17x96xf32>
    %114 = arith.addf %111, %113 : vector<17x96xf32>
    %c0_51 = arith.constant 0 : index
    %c0_52 = arith.constant 0 : index
    %115 = vector.load %arg14[%c0_51, %c0_52] : memref<32x32xf32, #tpu.memory_space<vmem>>, vector<32x32xf32>
    %cst_53 = arith.constant 0.000000e+00 : f32
    %116 = vector.broadcast %cst_53 : f32 to vector<17x32xf32>
    %117 = vector.extract_strided_slice %114 {offsets = [0, 0], sizes = [17, 8], strides = [1, 1]} : vector<17x96xf32> to vector<17x8xf32>
    %cst_54 = arith.constant 0.353553385 : f32
    %118 = vector.broadcast %cst_54 : f32 to vector<17x8xf32>
    %119 = arith.mulf %117, %118 : vector<17x8xf32>
    %120 = vector.extract_strided_slice %114 {offsets = [0, 32], sizes = [17, 8], strides = [1, 1]} : vector<17x96xf32> to vector<17x8xf32>
    %121 = vector.extract_strided_slice %114 {offsets = [0, 64], sizes = [17, 8], strides = [1, 1]} : vector<17x96xf32> to vector<17x8xf32>
    %cst_55 = arith.constant dense<0.000000e+00> : vector<17x17xf32>
    %122 = tpu.matmul %119, %120, %cst_55 {dimension_numbers = #tpu.dot_dimension_numbers<[1], [1], [0], [0], [0, 0, 1, 0], [], []>} : vector<17x8xf32>, vector<17x8xf32>, vector<17x17xf32> -> vector<17x17xf32>
    %cst_56 = arith.constant dense<0xFF800000> : vector<17xf32>
    %123 = vector.multi_reduction <maximumf>, %122, %cst_56 [1] : vector<17x17xf32> to vector<17xf32>
    %124 = vector.shape_cast %123 : vector<17xf32> to vector<17x1xf32>
    %125 = vector.broadcast %124 : vector<17x1xf32> to vector<17x17xf32>
    %126 = arith.subf %122, %125 : vector<17x17xf32>
    %127 = math.exp %126 : vector<17x17xf32>
    %cst_57 = arith.constant dense<0.000000e+00> : vector<17xf32>
    %128 = vector.multi_reduction <add>, %127, %cst_57 [1] : vector<17x17xf32> to vector<17xf32>
    %129 = vector.shape_cast %128 : vector<17xf32> to vector<17x1xf32>
    %130 = tpu.reciprocal %129 {approx = true} : vector<17x1xf32> -> vector<17x1xf32>
    %131 = vector.broadcast %130 : vector<17x1xf32> to vector<17x17xf32>
    %132 = arith.mulf %127, %131 : vector<17x17xf32>
    %cst_58 = arith.constant dense<0.000000e+00> : vector<17x8xf32>
    %133 = tpu.matmul %132, %121, %cst_58 {dimension_numbers = #tpu.dot_dimension_numbers<[1], [0], [0], [1], [0, 0, 1, 1], [], []>} : vector<17x17xf32>, vector<17x8xf32>, vector<17x8xf32> -> vector<17x8xf32>
    %134 = vector.extract_strided_slice %115 {offsets = [0, 0], sizes = [8, 32], strides = [1, 1]} : vector<32x32xf32> to vector<8x32xf32>
    %cst_59 = arith.constant dense<0.000000e+00> : vector<17x32xf32>
    %135 = tpu.matmul %133, %134, %cst_59 {dimension_numbers = #tpu.dot_dimension_numbers<[1], [0], [0], [1], [0, 0, 1, 1], [], []>} : vector<17x8xf32>, vector<8x32xf32>, vector<17x32xf32> -> vector<17x32xf32>
    %136 = arith.addf %116, %135 : vector<17x32xf32>
    %137 = vector.extract_strided_slice %114 {offsets = [0, 8], sizes = [17, 8], strides = [1, 1]} : vector<17x96xf32> to vector<17x8xf32>
    %cst_60 = arith.constant 0.353553385 : f32
    %138 = vector.broadcast %cst_60 : f32 to vector<17x8xf32>
    %139 = arith.mulf %137, %138 : vector<17x8xf32>
    %140 = vector.extract_strided_slice %114 {offsets = [0, 40], sizes = [17, 8], strides = [1, 1]} : vector<17x96xf32> to vector<17x8xf32>
    %141 = vector.extract_strided_slice %114 {offsets = [0, 72], sizes = [17, 8], strides = [1, 1]} : vector<17x96xf32> to vector<17x8xf32>
    %cst_61 = arith.constant dense<0.000000e+00> : vector<17x17xf32>
    %142 = tpu.matmul %139, %140, %cst_61 {dimension_numbers = #tpu.dot_dimension_numbers<[1], [1], [0], [0], [0, 0, 1, 0], [], []>} : vector<17x8xf32>, vector<17x8xf32>, vector<17x17xf32> -> vector<17x17xf32>
    %cst_62 = arith.constant dense<0xFF800000> : vector<17xf32>
    %143 = vector.multi_reduction <maximumf>, %142, %cst_62 [1] : vector<17x17xf32> to vector<17xf32>
    %144 = vector.shape_cast %143 : vector<17xf32> to vector<17x1xf32>
    %145 = vector.broadcast %144 : vector<17x1xf32> to vector<17x17xf32>
    %146 = arith.subf %142, %145 : vector<17x17xf32>
    %147 = math.exp %146 : vector<17x17xf32>
    %cst_63 = arith.constant dense<0.000000e+00> : vector<17xf32>
    %148 = vector.multi_reduction <add>, %147, %cst_63 [1] : vector<17x17xf32> to vector<17xf32>
    %149 = vector.shape_cast %148 : vector<17xf32> to vector<17x1xf32>
    %150 = tpu.reciprocal %149 {approx = true} : vector<17x1xf32> -> vector<17x1xf32>
    %151 = vector.broadcast %150 : vector<17x1xf32> to vector<17x17xf32>
    %152 = arith.mulf %147, %151 : vector<17x17xf32>
    %cst_64 = arith.constant dense<0.000000e+00> : vector<17x8xf32>
    %153 = tpu.matmul %152, %141, %cst_64 {dimension_numbers = #tpu.dot_dimension_numbers<[1], [0], [0], [1], [0, 0, 1, 1], [], []>} : vector<17x17xf32>, vector<17x8xf32>, vector<17x8xf32> -> vector<17x8xf32>
    %154 = vector.extract_strided_slice %115 {offsets = [8, 0], sizes = [8, 32], strides = [1, 1]} : vector<32x32xf32> to vector<8x32xf32>
    %cst_65 = arith.constant dense<0.000000e+00> : vector<17x32xf32>
    %155 = tpu.matmul %153, %154, %cst_65 {dimension_numbers = #tpu.dot_dimension_numbers<[1], [0], [0], [1], [0, 0, 1, 1], [], []>} : vector<17x8xf32>, vector<8x32xf32>, vector<17x32xf32> -> vector<17x32xf32>
    %156 = arith.addf %136, %155 : vector<17x32xf32>
    %157 = vector.extract_strided_slice %114 {offsets = [0, 16], sizes = [17, 8], strides = [1, 1]} : vector<17x96xf32> to vector<17x8xf32>
    %cst_66 = arith.constant 0.353553385 : f32
    %158 = vector.broadcast %cst_66 : f32 to vector<17x8xf32>
    %159 = arith.mulf %157, %158 : vector<17x8xf32>
    %160 = vector.extract_strided_slice %114 {offsets = [0, 48], sizes = [17, 8], strides = [1, 1]} : vector<17x96xf32> to vector<17x8xf32>
    %161 = vector.extract_strided_slice %114 {offsets = [0, 80], sizes = [17, 8], strides = [1, 1]} : vector<17x96xf32> to vector<17x8xf32>
    %cst_67 = arith.constant dense<0.000000e+00> : vector<17x17xf32>
    %162 = tpu.matmul %159, %160, %cst_67 {dimension_numbers = #tpu.dot_dimension_numbers<[1], [1], [0], [0], [0, 0, 1, 0], [], []>} : vector<17x8xf32>, vector<17x8xf32>, vector<17x17xf32> -> vector<17x17xf32>
    %cst_68 = arith.constant dense<0xFF800000> : vector<17xf32>
    %163 = vector.multi_reduction <maximumf>, %162, %cst_68 [1] : vector<17x17xf32> to vector<17xf32>
    %164 = vector.shape_cast %163 : vector<17xf32> to vector<17x1xf32>
    %165 = vector.broadcast %164 : vector<17x1xf32> to vector<17x17xf32>
    %166 = arith.subf %162, %165 : vector<17x17xf32>
    %167 = math.exp %166 : vector<17x17xf32>
    %cst_69 = arith.constant dense<0.000000e+00> : vector<17xf32>
    %168 = vector.multi_reduction <add>, %167, %cst_69 [1] : vector<17x17xf32> to vector<17xf32>
    %169 = vector.shape_cast %168 : vector<17xf32> to vector<17x1xf32>
    %170 = tpu.reciprocal %169 {approx = true} : vector<17x1xf32> -> vector<17x1xf32>
    %171 = vector.broadcast %170 : vector<17x1xf32> to vector<17x17xf32>
    %172 = arith.mulf %167, %171 : vector<17x17xf32>
    %cst_70 = arith.constant dense<0.000000e+00> : vector<17x8xf32>
    %173 = tpu.matmul %172, %161, %cst_70 {dimension_numbers = #tpu.dot_dimension_numbers<[1], [0], [0], [1], [0, 0, 1, 1], [], []>} : vector<17x17xf32>, vector<17x8xf32>, vector<17x8xf32> -> vector<17x8xf32>
    %174 = vector.extract_strided_slice %115 {offsets = [16, 0], sizes = [8, 32], strides = [1, 1]} : vector<32x32xf32> to vector<8x32xf32>
    %cst_71 = arith.constant dense<0.000000e+00> : vector<17x32xf32>
    %175 = tpu.matmul %173, %174, %cst_71 {dimension_numbers = #tpu.dot_dimension_numbers<[1], [0], [0], [1], [0, 0, 1, 1], [], []>} : vector<17x8xf32>, vector<8x32xf32>, vector<17x32xf32> -> vector<17x32xf32>
    %176 = arith.addf %156, %175 : vector<17x32xf32>
    %177 = vector.extract_strided_slice %114 {offsets = [0, 24], sizes = [17, 8], strides = [1, 1]} : vector<17x96xf32> to vector<17x8xf32>
    %cst_72 = arith.constant 0.353553385 : f32
    %178 = vector.broadcast %cst_72 : f32 to vector<17x8xf32>
    %179 = arith.mulf %177, %178 : vector<17x8xf32>
    %180 = vector.extract_strided_slice %114 {offsets = [0, 56], sizes = [17, 8], strides = [1, 1]} : vector<17x96xf32> to vector<17x8xf32>
    %181 = vector.extract_strided_slice %114 {offsets = [0, 88], sizes = [17, 8], strides = [1, 1]} : vector<17x96xf32> to vector<17x8xf32>
    %cst_73 = arith.constant dense<0.000000e+00> : vector<17x17xf32>
    %182 = tpu.matmul %179, %180, %cst_73 {dimension_numbers = #tpu.dot_dimension_numbers<[1], [1], [0], [0], [0, 0, 1, 0], [], []>} : vector<17x8xf32>, vector<17x8xf32>, vector<17x17xf32> -> vector<17x17xf32>
    %cst_74 = arith.constant dense<0xFF800000> : vector<17xf32>
    %183 = vector.multi_reduction <maximumf>, %182, %cst_74 [1] : vector<17x17xf32> to vector<17xf32>
    %184 = vector.shape_cast %183 : vector<17xf32> to vector<17x1xf32>
    %185 = vector.broadcast %184 : vector<17x1xf32> to vector<17x17xf32>
    %186 = arith.subf %182, %185 : vector<17x17xf32>
    %187 = math.exp %186 : vector<17x17xf32>
    %cst_75 = arith.constant dense<0.000000e+00> : vector<17xf32>
    %188 = vector.multi_reduction <add>, %187, %cst_75 [1] : vector<17x17xf32> to vector<17xf32>
    %189 = vector.shape_cast %188 : vector<17xf32> to vector<17x1xf32>
    %190 = tpu.reciprocal %189 {approx = true} : vector<17x1xf32> -> vector<17x1xf32>
    %191 = vector.broadcast %190 : vector<17x1xf32> to vector<17x17xf32>
    %192 = arith.mulf %187, %191 : vector<17x17xf32>
    %cst_76 = arith.constant dense<0.000000e+00> : vector<17x8xf32>
    %193 = tpu.matmul %192, %181, %cst_76 {dimension_numbers = #tpu.dot_dimension_numbers<[1], [0], [0], [1], [0, 0, 1, 1], [], []>} : vector<17x17xf32>, vector<17x8xf32>, vector<17x8xf32> -> vector<17x8xf32>
    %194 = vector.extract_strided_slice %115 {offsets = [24, 0], sizes = [8, 32], strides = [1, 1]} : vector<32x32xf32> to vector<8x32xf32>
    %cst_77 = arith.constant dense<0.000000e+00> : vector<17x32xf32>
    %195 = tpu.matmul %193, %194, %cst_77 {dimension_numbers = #tpu.dot_dimension_numbers<[1], [0], [0], [1], [0, 0, 1, 1], [], []>} : vector<17x8xf32>, vector<8x32xf32>, vector<17x32xf32> -> vector<17x32xf32>
    %196 = arith.addf %176, %195 : vector<17x32xf32>
    %197 = arith.addf %85, %196 : vector<17x32xf32>
    %c0_78 = arith.constant 0 : index
    %c0_79 = arith.constant 0 : index
    %198 = vector.load %arg13[%c0_78, %c0_79] : memref<1x32xf32, #tpu.memory_space<vmem>>, vector<1x32xf32>
    %199 = vector.broadcast %198 : vector<1x32xf32> to vector<17x32xf32>
    %200 = arith.addf %197, %199 : vector<17x32xf32>
    %cst_80 = arith.constant dense<0.000000e+00> : vector<17xf32>
    %201 = vector.multi_reduction <add>, %200, %cst_80 [1] : vector<17x32xf32> to vector<17xf32>
    %202 = vector.shape_cast %201 : vector<17xf32> to vector<17x1xf32>
    %cst_81 = arith.constant 3.200000e+01 : f32
    %203 = vector.broadcast %cst_81 : f32 to vector<17x1xf32>
    %204 = arith.divf %202, %203 : vector<17x1xf32>
    %205 = vector.broadcast %204 : vector<17x1xf32> to vector<17x32xf32>
    %206 = arith.subf %200, %205 : vector<17x32xf32>
    %207 = arith.mulf %206, %206 : vector<17x32xf32>
    %cst_82 = arith.constant dense<0.000000e+00> : vector<17xf32>
    %208 = vector.multi_reduction <add>, %207, %cst_82 [1] : vector<17x32xf32> to vector<17xf32>
    %209 = vector.shape_cast %208 : vector<17xf32> to vector<17x1xf32>
    %cst_83 = arith.constant 3.200000e+01 : f32
    %210 = vector.broadcast %cst_83 : f32 to vector<17x1xf32>
    %211 = arith.divf %209, %210 : vector<17x1xf32>
    %212 = vector.broadcast %204 : vector<17x1xf32> to vector<17x32xf32>
    %213 = arith.subf %200, %212 : vector<17x32xf32>
    %cst_84 = arith.constant 9.99999974E-6 : f32
    %214 = vector.broadcast %cst_84 : f32 to vector<17x1xf32>
    %215 = arith.addf %211, %214 : vector<17x1xf32>
    %216 = math.rsqrt %215 : vector<17x1xf32>
    %217 = vector.broadcast %216 : vector<17x1xf32> to vector<17x32xf32>
    %218 = arith.mulf %213, %217 : vector<17x32xf32>
    %c0_85 = arith.constant 0 : index
    %c0_86 = arith.constant 0 : index
    %219 = vector.load %arg12[%c0_85, %c0_86] : memref<1x32xf32, #tpu.memory_space<vmem>>, vector<1x32xf32>
    %220 = vector.broadcast %219 : vector<1x32xf32> to vector<17x32xf32>
    %221 = arith.mulf %218, %220 : vector<17x32xf32>
    %c0_87 = arith.constant 0 : index
    %c0_88 = arith.constant 0 : index
    %222 = vector.load %arg11[%c0_87, %c0_88] : memref<1x32xf32, #tpu.memory_space<vmem>>, vector<1x32xf32>
    %223 = vector.broadcast %222 : vector<1x32xf32> to vector<17x32xf32>
    %224 = arith.addf %221, %223 : vector<17x32xf32>
    %c0_89 = arith.constant 0 : index
    %c0_90 = arith.constant 0 : index
    %225 = vector.load %arg6[%c0_89, %c0_90] : memref<32x64xf32, #tpu.memory_space<vmem>>, vector<32x64xf32>
    %cst_91 = arith.constant dense<0.000000e+00> : vector<17x64xf32>
    %226 = tpu.matmul %224, %225, %cst_91 {dimension_numbers = #tpu.dot_dimension_numbers<[1], [0], [0], [1], [0, 0, 1, 1], [], []>} : vector<17x32xf32>, vector<32x64xf32>, vector<17x64xf32> -> vector<17x64xf32>
    %c0_92 = arith.constant 0 : index
    %c0_93 = arith.constant 0 : index
    %227 = vector.load %arg5[%c0_92, %c0_93] : memref<1x64xf32, #tpu.memory_space<vmem>>, vector<1x64xf32>
    %228 = vector.broadcast %227 : vector<1x64xf32> to vector<17x64xf32>
    %229 = arith.addf %226, %228 : vector<17x64xf32>
    %cst_94 = arith.constant 5.000000e-01 : f32
    %230 = vector.broadcast %cst_94 : f32 to vector<17x64xf32>
    %231 = arith.mulf %230, %229 : vector<17x64xf32>
    %cst_95 = arith.constant 4.471500e-02 : f32
    %232 = vector.broadcast %cst_95 : f32 to vector<17x64xf32>
    %233 = arith.mulf %232, %229 : vector<17x64xf32>
    %234 = arith.mulf %233, %229 : vector<17x64xf32>
    %235 = arith.mulf %234, %229 : vector<17x64xf32>
    %236 = arith.addf %229, %235 : vector<17x64xf32>
    %cst_96 = arith.constant 0.797884583 : f32
    %237 = vector.broadcast %cst_96 : f32 to vector<17x64xf32>
    %238 = arith.mulf %237, %236 : vector<17x64xf32>
    %239 = math.tanh %238 : vector<17x64xf32>
    %cst_97 = arith.constant 1.000000e+00 : f32
    %240 = vector.broadcast %cst_97 : f32 to vector<17x64xf32>
    %241 = arith.addf %240, %239 : vector<17x64xf32>
    %242 = arith.mulf %231, %241 : vector<17x64xf32>
    %c0_98 = arith.constant 0 : index
    %c0_99 = arith.constant 0 : index
    %243 = vector.load %arg8[%c0_98, %c0_99] : memref<64x32xf32, #tpu.memory_space<vmem>>, vector<64x32xf32>
    %cst_100 = arith.constant dense<0.000000e+00> : vector<17x32xf32>
    %244 = tpu.matmul %242, %243, %cst_100 {dimension_numbers = #tpu.dot_dimension_numbers<[1], [0], [0], [1], [0, 0, 1, 1], [], []>} : vector<17x64xf32>, vector<64x32xf32>, vector<17x32xf32> -> vector<17x32xf32>
    %c0_101 = arith.constant 0 : index
    %c0_102 = arith.constant 0 : index
    %245 = vector.load %arg7[%c0_101, %c0_102] : memref<1x32xf32, #tpu.memory_space<vmem>>, vector<1x32xf32>
    %246 = vector.broadcast %245 : vector<1x32xf32> to vector<17x32xf32>
    %247 = arith.addf %244, %246 : vector<17x32xf32>
    %248 = arith.addf %200, %247 : vector<17x32xf32>
    %cst_103 = arith.constant dense<0.000000e+00> : vector<17xf32>
    %249 = vector.multi_reduction <add>, %248, %cst_103 [1] : vector<17x32xf32> to vector<17xf32>
    %250 = vector.shape_cast %249 : vector<17xf32> to vector<17x1xf32>
    %cst_104 = arith.constant 3.200000e+01 : f32
    %251 = vector.broadcast %cst_104 : f32 to vector<17x1xf32>
    %252 = arith.divf %250, %251 : vector<17x1xf32>
    %253 = vector.broadcast %252 : vector<17x1xf32> to vector<17x32xf32>
    %254 = arith.subf %248, %253 : vector<17x32xf32>
    %255 = arith.mulf %254, %254 : vector<17x32xf32>
    %cst_105 = arith.constant dense<0.000000e+00> : vector<17xf32>
    %256 = vector.multi_reduction <add>, %255, %cst_105 [1] : vector<17x32xf32> to vector<17xf32>
    %257 = vector.shape_cast %256 : vector<17xf32> to vector<17x1xf32>
    %cst_106 = arith.constant 3.200000e+01 : f32
    %258 = vector.broadcast %cst_106 : f32 to vector<17x1xf32>
    %259 = arith.divf %257, %258 : vector<17x1xf32>
    %260 = vector.broadcast %252 : vector<17x1xf32> to vector<17x32xf32>
    %261 = arith.subf %248, %260 : vector<17x32xf32>
    %cst_107 = arith.constant 9.99999974E-6 : f32
    %262 = vector.broadcast %cst_107 : f32 to vector<17x1xf32>
    %263 = arith.addf %259, %262 : vector<17x1xf32>
    %264 = math.rsqrt %263 : vector<17x1xf32>
    %265 = vector.broadcast %264 : vector<17x1xf32> to vector<17x32xf32>
    %266 = arith.mulf %261, %265 : vector<17x32xf32>
    %c0_108 = arith.constant 0 : index
    %c0_109 = arith.constant 0 : index
    %267 = vector.load %arg22[%c0_108, %c0_109] : memref<1x32xf32, #tpu.memory_space<vmem>>, vector<1x32xf32>
    %268 = vector.broadcast %267 : vector<1x32xf32> to vector<17x32xf32>
    %269 = arith.mulf %266, %268 : vector<17x32xf32>
    %c0_110 = arith.constant 0 : index
    %c0_111 = arith.constant 0 : index
    %270 = vector.load %arg21[%c0_110, %c0_111] : memref<1x32xf32, #tpu.memory_space<vmem>>, vector<1x32xf32>
    %271 = vector.broadcast %270 : vector<1x32xf32> to vector<17x32xf32>
    %272 = arith.addf %269, %271 : vector<17x32xf32>
    %c0_112 = arith.constant 0 : index
    %c0_113 = arith.constant 0 : index
    %273 = vector.load %arg16[%c0_112, %c0_113] : memref<32x96xf32, #tpu.memory_space<vmem>>, vector<32x96xf32>
    %cst_114 = arith.constant dense<0.000000e+00> : vector<17x96xf32>
    %274 = tpu.matmul %272, %273, %cst_114 {dimension_numbers = #tpu.dot_dimension_numbers<[1], [0], [0], [1], [0, 0, 1, 1], [], []>} : vector<17x32xf32>, vector<32x96xf32>, vector<17x96xf32> -> vector<17x96xf32>
    %c0_115 = arith.constant 0 : index
    %c0_116 = arith.constant 0 : index
    %275 = vector.load %arg15[%c0_115, %c0_116] : memref<1x96xf32, #tpu.memory_space<vmem>>, vector<1x96xf32>
    %276 = vector.broadcast %275 : vector<1x96xf32> to vector<17x96xf32>
    %277 = arith.addf %274, %276 : vector<17x96xf32>
    %c0_117 = arith.constant 0 : index
    %c0_118 = arith.constant 0 : index
    %278 = vector.load %arg26[%c0_117, %c0_118] : memref<32x32xf32, #tpu.memory_space<vmem>>, vector<32x32xf32>
    %cst_119 = arith.constant 0.000000e+00 : f32
    %279 = vector.broadcast %cst_119 : f32 to vector<17x32xf32>
    %280 = vector.extract_strided_slice %277 {offsets = [0, 0], sizes = [17, 8], strides = [1, 1]} : vector<17x96xf32> to vector<17x8xf32>
    %cst_120 = arith.constant 0.353553385 : f32
    %281 = vector.broadcast %cst_120 : f32 to vector<17x8xf32>
    %282 = arith.mulf %280, %281 : vector<17x8xf32>
    %283 = vector.extract_strided_slice %277 {offsets = [0, 32], sizes = [17, 8], strides = [1, 1]} : vector<17x96xf32> to vector<17x8xf32>
    %284 = vector.extract_strided_slice %277 {offsets = [0, 64], sizes = [17, 8], strides = [1, 1]} : vector<17x96xf32> to vector<17x8xf32>
    %cst_121 = arith.constant dense<0.000000e+00> : vector<17x17xf32>
    %285 = tpu.matmul %282, %283, %cst_121 {dimension_numbers = #tpu.dot_dimension_numbers<[1], [1], [0], [0], [0, 0, 1, 0], [], []>} : vector<17x8xf32>, vector<17x8xf32>, vector<17x17xf32> -> vector<17x17xf32>
    %cst_122 = arith.constant dense<0xFF800000> : vector<17xf32>
    %286 = vector.multi_reduction <maximumf>, %285, %cst_122 [1] : vector<17x17xf32> to vector<17xf32>
    %287 = vector.shape_cast %286 : vector<17xf32> to vector<17x1xf32>
    %288 = vector.broadcast %287 : vector<17x1xf32> to vector<17x17xf32>
    %289 = arith.subf %285, %288 : vector<17x17xf32>
    %290 = math.exp %289 : vector<17x17xf32>
    %cst_123 = arith.constant dense<0.000000e+00> : vector<17xf32>
    %291 = vector.multi_reduction <add>, %290, %cst_123 [1] : vector<17x17xf32> to vector<17xf32>
    %292 = vector.shape_cast %291 : vector<17xf32> to vector<17x1xf32>
    %293 = tpu.reciprocal %292 {approx = true} : vector<17x1xf32> -> vector<17x1xf32>
    %294 = vector.broadcast %293 : vector<17x1xf32> to vector<17x17xf32>
    %295 = arith.mulf %290, %294 : vector<17x17xf32>
    %cst_124 = arith.constant dense<0.000000e+00> : vector<17x8xf32>
    %296 = tpu.matmul %295, %284, %cst_124 {dimension_numbers = #tpu.dot_dimension_numbers<[1], [0], [0], [1], [0, 0, 1, 1], [], []>} : vector<17x17xf32>, vector<17x8xf32>, vector<17x8xf32> -> vector<17x8xf32>
    %297 = vector.extract_strided_slice %278 {offsets = [0, 0], sizes = [8, 32], strides = [1, 1]} : vector<32x32xf32> to vector<8x32xf32>
    %cst_125 = arith.constant dense<0.000000e+00> : vector<17x32xf32>
    %298 = tpu.matmul %296, %297, %cst_125 {dimension_numbers = #tpu.dot_dimension_numbers<[1], [0], [0], [1], [0, 0, 1, 1], [], []>} : vector<17x8xf32>, vector<8x32xf32>, vector<17x32xf32> -> vector<17x32xf32>
    %299 = arith.addf %279, %298 : vector<17x32xf32>
    %300 = vector.extract_strided_slice %277 {offsets = [0, 8], sizes = [17, 8], strides = [1, 1]} : vector<17x96xf32> to vector<17x8xf32>
    %cst_126 = arith.constant 0.353553385 : f32
    %301 = vector.broadcast %cst_126 : f32 to vector<17x8xf32>
    %302 = arith.mulf %300, %301 : vector<17x8xf32>
    %303 = vector.extract_strided_slice %277 {offsets = [0, 40], sizes = [17, 8], strides = [1, 1]} : vector<17x96xf32> to vector<17x8xf32>
    %304 = vector.extract_strided_slice %277 {offsets = [0, 72], sizes = [17, 8], strides = [1, 1]} : vector<17x96xf32> to vector<17x8xf32>
    %cst_127 = arith.constant dense<0.000000e+00> : vector<17x17xf32>
    %305 = tpu.matmul %302, %303, %cst_127 {dimension_numbers = #tpu.dot_dimension_numbers<[1], [1], [0], [0], [0, 0, 1, 0], [], []>} : vector<17x8xf32>, vector<17x8xf32>, vector<17x17xf32> -> vector<17x17xf32>
    %cst_128 = arith.constant dense<0xFF800000> : vector<17xf32>
    %306 = vector.multi_reduction <maximumf>, %305, %cst_128 [1] : vector<17x17xf32> to vector<17xf32>
    %307 = vector.shape_cast %306 : vector<17xf32> to vector<17x1xf32>
    %308 = vector.broadcast %307 : vector<17x1xf32> to vector<17x17xf32>
    %309 = arith.subf %305, %308 : vector<17x17xf32>
    %310 = math.exp %309 : vector<17x17xf32>
    %cst_129 = arith.constant dense<0.000000e+00> : vector<17xf32>
    %311 = vector.multi_reduction <add>, %310, %cst_129 [1] : vector<17x17xf32> to vector<17xf32>
    %312 = vector.shape_cast %311 : vector<17xf32> to vector<17x1xf32>
    %313 = tpu.reciprocal %312 {approx = true} : vector<17x1xf32> -> vector<17x1xf32>
    %314 = vector.broadcast %313 : vector<17x1xf32> to vector<17x17xf32>
    %315 = arith.mulf %310, %314 : vector<17x17xf32>
    %cst_130 = arith.constant dense<0.000000e+00> : vector<17x8xf32>
    %316 = tpu.matmul %315, %304, %cst_130 {dimension_numbers = #tpu.dot_dimension_numbers<[1], [0], [0], [1], [0, 0, 1, 1], [], []>} : vector<17x17xf32>, vector<17x8xf32>, vector<17x8xf32> -> vector<17x8xf32>
    %317 = vector.extract_strided_slice %278 {offsets = [8, 0], sizes = [8, 32], strides = [1, 1]} : vector<32x32xf32> to vector<8x32xf32>
    %cst_131 = arith.constant dense<0.000000e+00> : vector<17x32xf32>
    %318 = tpu.matmul %316, %317, %cst_131 {dimension_numbers = #tpu.dot_dimension_numbers<[1], [0], [0], [1], [0, 0, 1, 1], [], []>} : vector<17x8xf32>, vector<8x32xf32>, vector<17x32xf32> -> vector<17x32xf32>
    %319 = arith.addf %299, %318 : vector<17x32xf32>
    %320 = vector.extract_strided_slice %277 {offsets = [0, 16], sizes = [17, 8], strides = [1, 1]} : vector<17x96xf32> to vector<17x8xf32>
    %cst_132 = arith.constant 0.353553385 : f32
    %321 = vector.broadcast %cst_132 : f32 to vector<17x8xf32>
    %322 = arith.mulf %320, %321 : vector<17x8xf32>
    %323 = vector.extract_strided_slice %277 {offsets = [0, 48], sizes = [17, 8], strides = [1, 1]} : vector<17x96xf32> to vector<17x8xf32>
    %324 = vector.extract_strided_slice %277 {offsets = [0, 80], sizes = [17, 8], strides = [1, 1]} : vector<17x96xf32> to vector<17x8xf32>
    %cst_133 = arith.constant dense<0.000000e+00> : vector<17x17xf32>
    %325 = tpu.matmul %322, %323, %cst_133 {dimension_numbers = #tpu.dot_dimension_numbers<[1], [1], [0], [0], [0, 0, 1, 0], [], []>} : vector<17x8xf32>, vector<17x8xf32>, vector<17x17xf32> -> vector<17x17xf32>
    %cst_134 = arith.constant dense<0xFF800000> : vector<17xf32>
    %326 = vector.multi_reduction <maximumf>, %325, %cst_134 [1] : vector<17x17xf32> to vector<17xf32>
    %327 = vector.shape_cast %326 : vector<17xf32> to vector<17x1xf32>
    %328 = vector.broadcast %327 : vector<17x1xf32> to vector<17x17xf32>
    %329 = arith.subf %325, %328 : vector<17x17xf32>
    %330 = math.exp %329 : vector<17x17xf32>
    %cst_135 = arith.constant dense<0.000000e+00> : vector<17xf32>
    %331 = vector.multi_reduction <add>, %330, %cst_135 [1] : vector<17x17xf32> to vector<17xf32>
    %332 = vector.shape_cast %331 : vector<17xf32> to vector<17x1xf32>
    %333 = tpu.reciprocal %332 {approx = true} : vector<17x1xf32> -> vector<17x1xf32>
    %334 = vector.broadcast %333 : vector<17x1xf32> to vector<17x17xf32>
    %335 = arith.mulf %330, %334 : vector<17x17xf32>
    %cst_136 = arith.constant dense<0.000000e+00> : vector<17x8xf32>
    %336 = tpu.matmul %335, %324, %cst_136 {dimension_numbers = #tpu.dot_dimension_numbers<[1], [0], [0], [1], [0, 0, 1, 1], [], []>} : vector<17x17xf32>, vector<17x8xf32>, vector<17x8xf32> -> vector<17x8xf32>
    %337 = vector.extract_strided_slice %278 {offsets = [16, 0], sizes = [8, 32], strides = [1, 1]} : vector<32x32xf32> to vector<8x32xf32>
    %cst_137 = arith.constant dense<0.000000e+00> : vector<17x32xf32>
    %338 = tpu.matmul %336, %337, %cst_137 {dimension_numbers = #tpu.dot_dimension_numbers<[1], [0], [0], [1], [0, 0, 1, 1], [], []>} : vector<17x8xf32>, vector<8x32xf32>, vector<17x32xf32> -> vector<17x32xf32>
    %339 = arith.addf %319, %338 : vector<17x32xf32>
    %340 = vector.extract_strided_slice %277 {offsets = [0, 24], sizes = [17, 8], strides = [1, 1]} : vector<17x96xf32> to vector<17x8xf32>
    %cst_138 = arith.constant 0.353553385 : f32
    %341 = vector.broadcast %cst_138 : f32 to vector<17x8xf32>
    %342 = arith.mulf %340, %341 : vector<17x8xf32>
    %343 = vector.extract_strided_slice %277 {offsets = [0, 56], sizes = [17, 8], strides = [1, 1]} : vector<17x96xf32> to vector<17x8xf32>
    %344 = vector.extract_strided_slice %277 {offsets = [0, 88], sizes = [17, 8], strides = [1, 1]} : vector<17x96xf32> to vector<17x8xf32>
    %cst_139 = arith.constant dense<0.000000e+00> : vector<17x17xf32>
    %345 = tpu.matmul %342, %343, %cst_139 {dimension_numbers = #tpu.dot_dimension_numbers<[1], [1], [0], [0], [0, 0, 1, 0], [], []>} : vector<17x8xf32>, vector<17x8xf32>, vector<17x17xf32> -> vector<17x17xf32>
    %cst_140 = arith.constant dense<0xFF800000> : vector<17xf32>
    %346 = vector.multi_reduction <maximumf>, %345, %cst_140 [1] : vector<17x17xf32> to vector<17xf32>
    %347 = vector.shape_cast %346 : vector<17xf32> to vector<17x1xf32>
    %348 = vector.broadcast %347 : vector<17x1xf32> to vector<17x17xf32>
    %349 = arith.subf %345, %348 : vector<17x17xf32>
    %350 = math.exp %349 : vector<17x17xf32>
    %cst_141 = arith.constant dense<0.000000e+00> : vector<17xf32>
    %351 = vector.multi_reduction <add>, %350, %cst_141 [1] : vector<17x17xf32> to vector<17xf32>
    %352 = vector.shape_cast %351 : vector<17xf32> to vector<17x1xf32>
    %353 = tpu.reciprocal %352 {approx = true} : vector<17x1xf32> -> vector<17x1xf32>
    %354 = vector.broadcast %353 : vector<17x1xf32> to vector<17x17xf32>
    %355 = arith.mulf %350, %354 : vector<17x17xf32>
    %cst_142 = arith.constant dense<0.000000e+00> : vector<17x8xf32>
    %356 = tpu.matmul %355, %344, %cst_142 {dimension_numbers = #tpu.dot_dimension_numbers<[1], [0], [0], [1], [0, 0, 1, 1], [], []>} : vector<17x17xf32>, vector<17x8xf32>, vector<17x8xf32> -> vector<17x8xf32>
    %357 = vector.extract_strided_slice %278 {offsets = [24, 0], sizes = [8, 32], strides = [1, 1]} : vector<32x32xf32> to vector<8x32xf32>
    %cst_143 = arith.constant dense<0.000000e+00> : vector<17x32xf32>
    %358 = tpu.matmul %356, %357, %cst_143 {dimension_numbers = #tpu.dot_dimension_numbers<[1], [0], [0], [1], [0, 0, 1, 1], [], []>} : vector<17x8xf32>, vector<8x32xf32>, vector<17x32xf32> -> vector<17x32xf32>
    %359 = arith.addf %339, %358 : vector<17x32xf32>
    %360 = arith.addf %248, %359 : vector<17x32xf32>
    %c0_144 = arith.constant 0 : index
    %c0_145 = arith.constant 0 : index
    %361 = vector.load %arg25[%c0_144, %c0_145] : memref<1x32xf32, #tpu.memory_space<vmem>>, vector<1x32xf32>
    %362 = vector.broadcast %361 : vector<1x32xf32> to vector<17x32xf32>
    %363 = arith.addf %360, %362 : vector<17x32xf32>
    %cst_146 = arith.constant dense<0.000000e+00> : vector<17xf32>
    %364 = vector.multi_reduction <add>, %363, %cst_146 [1] : vector<17x32xf32> to vector<17xf32>
    %365 = vector.shape_cast %364 : vector<17xf32> to vector<17x1xf32>
    %cst_147 = arith.constant 3.200000e+01 : f32
    %366 = vector.broadcast %cst_147 : f32 to vector<17x1xf32>
    %367 = arith.divf %365, %366 : vector<17x1xf32>
    %368 = vector.broadcast %367 : vector<17x1xf32> to vector<17x32xf32>
    %369 = arith.subf %363, %368 : vector<17x32xf32>
    %370 = arith.mulf %369, %369 : vector<17x32xf32>
    %cst_148 = arith.constant dense<0.000000e+00> : vector<17xf32>
    %371 = vector.multi_reduction <add>, %370, %cst_148 [1] : vector<17x32xf32> to vector<17xf32>
    %372 = vector.shape_cast %371 : vector<17xf32> to vector<17x1xf32>
    %cst_149 = arith.constant 3.200000e+01 : f32
    %373 = vector.broadcast %cst_149 : f32 to vector<17x1xf32>
    %374 = arith.divf %372, %373 : vector<17x1xf32>
    %375 = vector.broadcast %367 : vector<17x1xf32> to vector<17x32xf32>
    %376 = arith.subf %363, %375 : vector<17x32xf32>
    %cst_150 = arith.constant 9.99999974E-6 : f32
    %377 = vector.broadcast %cst_150 : f32 to vector<17x1xf32>
    %378 = arith.addf %374, %377 : vector<17x1xf32>
    %379 = math.rsqrt %378 : vector<17x1xf32>
    %380 = vector.broadcast %379 : vector<17x1xf32> to vector<17x32xf32>
    %381 = arith.mulf %376, %380 : vector<17x32xf32>
    %c0_151 = arith.constant 0 : index
    %c0_152 = arith.constant 0 : index
    %382 = vector.load %arg24[%c0_151, %c0_152] : memref<1x32xf32, #tpu.memory_space<vmem>>, vector<1x32xf32>
    %383 = vector.broadcast %382 : vector<1x32xf32> to vector<17x32xf32>
    %384 = arith.mulf %381, %383 : vector<17x32xf32>
    %c0_153 = arith.constant 0 : index
    %c0_154 = arith.constant 0 : index
    %385 = vector.load %arg23[%c0_153, %c0_154] : memref<1x32xf32, #tpu.memory_space<vmem>>, vector<1x32xf32>
    %386 = vector.broadcast %385 : vector<1x32xf32> to vector<17x32xf32>
    %387 = arith.addf %384, %386 : vector<17x32xf32>
    %c0_155 = arith.constant 0 : index
    %c0_156 = arith.constant 0 : index
    %388 = vector.load %arg18[%c0_155, %c0_156] : memref<32x64xf32, #tpu.memory_space<vmem>>, vector<32x64xf32>
    %cst_157 = arith.constant dense<0.000000e+00> : vector<17x64xf32>
    %389 = tpu.matmul %387, %388, %cst_157 {dimension_numbers = #tpu.dot_dimension_numbers<[1], [0], [0], [1], [0, 0, 1, 1], [], []>} : vector<17x32xf32>, vector<32x64xf32>, vector<17x64xf32> -> vector<17x64xf32>
    %c0_158 = arith.constant 0 : index
    %c0_159 = arith.constant 0 : index
    %390 = vector.load %arg17[%c0_158, %c0_159] : memref<1x64xf32, #tpu.memory_space<vmem>>, vector<1x64xf32>
    %391 = vector.broadcast %390 : vector<1x64xf32> to vector<17x64xf32>
    %392 = arith.addf %389, %391 : vector<17x64xf32>
    %cst_160 = arith.constant 5.000000e-01 : f32
    %393 = vector.broadcast %cst_160 : f32 to vector<17x64xf32>
    %394 = arith.mulf %393, %392 : vector<17x64xf32>
    %cst_161 = arith.constant 4.471500e-02 : f32
    %395 = vector.broadcast %cst_161 : f32 to vector<17x64xf32>
    %396 = arith.mulf %395, %392 : vector<17x64xf32>
    %397 = arith.mulf %396, %392 : vector<17x64xf32>
    %398 = arith.mulf %397, %392 : vector<17x64xf32>
    %399 = arith.addf %392, %398 : vector<17x64xf32>
    %cst_162 = arith.constant 0.797884583 : f32
    %400 = vector.broadcast %cst_162 : f32 to vector<17x64xf32>
    %401 = arith.mulf %400, %399 : vector<17x64xf32>
    %402 = math.tanh %401 : vector<17x64xf32>
    %cst_163 = arith.constant 1.000000e+00 : f32
    %403 = vector.broadcast %cst_163 : f32 to vector<17x64xf32>
    %404 = arith.addf %403, %402 : vector<17x64xf32>
    %405 = arith.mulf %394, %404 : vector<17x64xf32>
    %c0_164 = arith.constant 0 : index
    %c0_165 = arith.constant 0 : index
    %406 = vector.load %arg20[%c0_164, %c0_165] : memref<64x32xf32, #tpu.memory_space<vmem>>, vector<64x32xf32>
    %cst_166 = arith.constant dense<0.000000e+00> : vector<17x32xf32>
    %407 = tpu.matmul %405, %406, %cst_166 {dimension_numbers = #tpu.dot_dimension_numbers<[1], [0], [0], [1], [0, 0, 1, 1], [], []>} : vector<17x64xf32>, vector<64x32xf32>, vector<17x32xf32> -> vector<17x32xf32>
    %c0_167 = arith.constant 0 : index
    %c0_168 = arith.constant 0 : index
    %408 = vector.load %arg19[%c0_167, %c0_168] : memref<1x32xf32, #tpu.memory_space<vmem>>, vector<1x32xf32>
    %409 = vector.broadcast %408 : vector<1x32xf32> to vector<17x32xf32>
    %410 = arith.addf %407, %409 : vector<17x32xf32>
    %411 = arith.addf %363, %410 : vector<17x32xf32>
    %cst_169 = arith.constant dense<0.000000e+00> : vector<17xf32>
    %412 = vector.multi_reduction <add>, %411, %cst_169 [1] : vector<17x32xf32> to vector<17xf32>
    %413 = vector.shape_cast %412 : vector<17xf32> to vector<17x1xf32>
    %cst_170 = arith.constant 3.200000e+01 : f32
    %414 = vector.broadcast %cst_170 : f32 to vector<17x1xf32>
    %415 = arith.divf %413, %414 : vector<17x1xf32>
    %416 = vector.broadcast %415 : vector<17x1xf32> to vector<17x32xf32>
    %417 = arith.subf %411, %416 : vector<17x32xf32>
    %418 = arith.mulf %417, %417 : vector<17x32xf32>
    %cst_171 = arith.constant dense<0.000000e+00> : vector<17xf32>
    %419 = vector.multi_reduction <add>, %418, %cst_171 [1] : vector<17x32xf32> to vector<17xf32>
    %420 = vector.shape_cast %419 : vector<17xf32> to vector<17x1xf32>
    %cst_172 = arith.constant 3.200000e+01 : f32
    %421 = vector.broadcast %cst_172 : f32 to vector<17x1xf32>
    %422 = arith.divf %420, %421 : vector<17x1xf32>
    %423 = vector.broadcast %415 : vector<17x1xf32> to vector<17x32xf32>
    %424 = arith.subf %411, %423 : vector<17x32xf32>
    %cst_173 = arith.constant 9.99999996E-13 : f32
    %425 = vector.broadcast %cst_173 : f32 to vector<17x1xf32>
    %426 = arith.addf %422, %425 : vector<17x1xf32>
    %427 = math.rsqrt %426 : vector<17x1xf32>
    %428 = vector.broadcast %427 : vector<17x1xf32> to vector<17x32xf32>
    %429 = arith.mulf %424, %428 : vector<17x32xf32>
    %c0_174 = arith.constant 0 : index
    %c0_175 = arith.constant 0 : index
    %430 = vector.load %arg39[%c0_174, %c0_175] : memref<1x32xf32, #tpu.memory_space<vmem>>, vector<1x32xf32>
    %431 = vector.broadcast %430 : vector<1x32xf32> to vector<17x32xf32>
    %432 = arith.mulf %429, %431 : vector<17x32xf32>
    %c0_176 = arith.constant 0 : index
    %c0_177 = arith.constant 0 : index
    %433 = vector.load %arg38[%c0_176, %c0_177] : memref<1x32xf32, #tpu.memory_space<vmem>>, vector<1x32xf32>
    %434 = vector.broadcast %433 : vector<1x32xf32> to vector<17x32xf32>
    %435 = arith.addf %432, %434 : vector<17x32xf32>
    %c0_178 = arith.constant 0 : index
    %c0_179 = arith.constant 0 : index
    %436 = vector.load %arg37[%c0_178, %c0_179] : memref<32x32xf32, #tpu.memory_space<vmem>>, vector<32x32xf32>
    %cst_180 = arith.constant dense<0.000000e+00> : vector<17x32xf32>
    %437 = tpu.matmul %435, %436, %cst_180 {dimension_numbers = #tpu.dot_dimension_numbers<[1], [0], [0], [1], [0, 0, 1, 1], [], []>} : vector<17x32xf32>, vector<32x32xf32>, vector<17x32xf32> -> vector<17x32xf32>
    %c0_181 = arith.constant 0 : index
    %c0_182 = arith.constant 0 : index
    %438 = vector.load %arg36[%c0_181, %c0_182] : memref<1x32xf32, #tpu.memory_space<vmem>>, vector<1x32xf32>
    %439 = vector.broadcast %438 : vector<1x32xf32> to vector<17x32xf32>
    %440 = arith.addf %437, %439 : vector<17x32xf32>
    %cst_183 = arith.constant 5.000000e-01 : f32
    %441 = vector.broadcast %cst_183 : f32 to vector<17x32xf32>
    %442 = arith.mulf %441, %440 : vector<17x32xf32>
    %cst_184 = arith.constant 4.471500e-02 : f32
    %443 = vector.broadcast %cst_184 : f32 to vector<17x32xf32>
    %444 = arith.mulf %443, %440 : vector<17x32xf32>
    %445 = arith.mulf %444, %440 : vector<17x32xf32>
    %446 = arith.mulf %445, %440 : vector<17x32xf32>
    %447 = arith.addf %440, %446 : vector<17x32xf32>
    %cst_185 = arith.constant 0.797884583 : f32
    %448 = vector.broadcast %cst_185 : f32 to vector<17x32xf32>
    %449 = arith.mulf %448, %447 : vector<17x32xf32>
    %450 = math.tanh %449 : vector<17x32xf32>
    %cst_186 = arith.constant 1.000000e+00 : f32
    %451 = vector.broadcast %cst_186 : f32 to vector<17x32xf32>
    %452 = arith.addf %451, %450 : vector<17x32xf32>
    %453 = arith.mulf %442, %452 : vector<17x32xf32>
    %cst_187 = arith.constant dense<0.000000e+00> : vector<17xf32>
    %454 = vector.multi_reduction <add>, %453, %cst_187 [1] : vector<17x32xf32> to vector<17xf32>
    %455 = vector.shape_cast %454 : vector<17xf32> to vector<17x1xf32>
    %cst_188 = arith.constant 3.200000e+01 : f32
    %456 = vector.broadcast %cst_188 : f32 to vector<17x1xf32>
    %457 = arith.divf %455, %456 : vector<17x1xf32>
    %458 = vector.broadcast %457 : vector<17x1xf32> to vector<17x32xf32>
    %459 = arith.subf %453, %458 : vector<17x32xf32>
    %460 = arith.mulf %459, %459 : vector<17x32xf32>
    %cst_189 = arith.constant dense<0.000000e+00> : vector<17xf32>
    %461 = vector.multi_reduction <add>, %460, %cst_189 [1] : vector<17x32xf32> to vector<17xf32>
    %462 = vector.shape_cast %461 : vector<17xf32> to vector<17x1xf32>
    %cst_190 = arith.constant 3.200000e+01 : f32
    %463 = vector.broadcast %cst_190 : f32 to vector<17x1xf32>
    %464 = arith.divf %462, %463 : vector<17x1xf32>
    %465 = vector.broadcast %457 : vector<17x1xf32> to vector<17x32xf32>
    %466 = arith.subf %453, %465 : vector<17x32xf32>
    %cst_191 = arith.constant 9.99999996E-13 : f32
    %467 = vector.broadcast %cst_191 : f32 to vector<17x1xf32>
    %468 = arith.addf %464, %467 : vector<17x1xf32>
    %469 = math.rsqrt %468 : vector<17x1xf32>
    %470 = vector.broadcast %469 : vector<17x1xf32> to vector<17x32xf32>
    %471 = arith.mulf %466, %470 : vector<17x32xf32>
    %c0_192 = arith.constant 0 : index
    %c0_193 = arith.constant 0 : index
    %472 = vector.load %arg41[%c0_192, %c0_193] : memref<1x32xf32, #tpu.memory_space<vmem>>, vector<1x32xf32>
    %473 = vector.broadcast %472 : vector<1x32xf32> to vector<17x32xf32>
    %474 = arith.mulf %471, %473 : vector<17x32xf32>
    %c0_194 = arith.constant 0 : index
    %c0_195 = arith.constant 0 : index
    %475 = vector.load %arg40[%c0_194, %c0_195] : memref<1x32xf32, #tpu.memory_space<vmem>>, vector<1x32xf32>
    %476 = vector.broadcast %475 : vector<1x32xf32> to vector<17x32xf32>
    %477 = arith.addf %474, %476 : vector<17x32xf32>
    %c0_196 = arith.constant 0 : index
    %c0_197 = arith.constant 0 : index
    %478 = vector.load %arg2[%c0_196, %c0_197] : memref<28x32xf32, #tpu.memory_space<vmem>>, vector<28x32xf32>
    %cst_198 = arith.constant dense<0.000000e+00> : vector<17x28xf32>
    %479 = tpu.matmul %477, %478, %cst_198 {dimension_numbers = #tpu.dot_dimension_numbers<[1], [1], [0], [0], [0, 0, 1, 0], [], []>} : vector<17x32xf32>, vector<28x32xf32>, vector<17x28xf32> -> vector<17x28xf32>
    %c0_199 = arith.constant 0 : index
    %c0_200 = arith.constant 0 : index
    %480 = vector.load %arg27[%c0_199, %c0_200] : memref<17x28xf32, #tpu.memory_space<vmem>>, vector<17x28xf32>
    %481 = arith.addf %479, %480 : vector<17x28xf32>
    %c0_201 = arith.constant 0 : index
    %c0_202 = arith.constant 0 : index
    %c0_203 = arith.constant 0 : index
    %482 = vector.load %arg42[%c0_201, %c0_202, %c0_203] : memref<1x17x28xf32, #tpu.memory_space<vmem>>, vector<1x17x28xf32>
    %483 = vector.shape_cast %482 : vector<1x17x28xf32> to vector<17x28xf32>
    %484 = vector.shape_cast %481 : vector<17x28xf32> to vector<1x17x28xf32>
    tpu.vector_store %arg42[%c0_201, %c0_202, %c0_203], %484 {strides = array<i32>} : memref<1x17x28xf32, #tpu.memory_space<vmem>>, vector<1x17x28xf32>,
    return
  }
  func.func @transform_0(%arg0: i32) -> (i32, i32, i32) {
    %c0_i32 = arith.constant 0 : i32
    %c0_i32_0 = arith.constant 0 : i32
    %c0_i32_1 = arith.constant 0 : i32
    return %arg0, %c0_i32, %c0_i32_0 : i32, i32, i32
  }
  func.func @transform_1(%arg0: i32) -> (i32, i32) {
    %c0_i32 = arith.constant 0 : i32
    %c0_i32_0 = arith.constant 0 : i32
    %c0_i32_1 = arith.constant 0 : i32
    return %c0_i32, %c0_i32_0 : i32, i32
  }
  func.func @transform_2(%arg0: i32) -> (i32, i32) {
    %c0_i32 = arith.constant 0 : i32
    %c0_i32_0 = arith.constant 0 : i32
    %c0_i32_1 = arith.constant 0 : i32
    return %c0_i32, %c0_i32_0 : i32, i32
  }
  func.func @transform_3(%arg0: i32) -> (i32, i32) {
    %c0_i32 = arith.constant 0 : i32
    %c0_i32_0 = arith.constant 0 : i32
    %c0_i32_1 = arith.constant 0 : i32
    return %c0_i32, %c0_i32_0 : i32, i32
  }
  func.func @transform_4(%arg0: i32) -> (i32, i32) {
    %c0_i32 = arith.constant 0 : i32
    %c0_i32_0 = arith.constant 0 : i32
    %c0_i32_1 = arith.constant 0 : i32
    return %c0_i32, %c0_i32_0 : i32, i32
  }
  func.func @transform_5(%arg0: i32) -> (i32, i32) {
    %c0_i32 = arith.constant 0 : i32
    %c0_i32_0 = arith.constant 0 : i32
    %c0_i32_1 = arith.constant 0 : i32
    return %c0_i32, %c0_i32_0 : i32, i32
  }
  func.func @transform_6(%arg0: i32) -> (i32, i32) {
    %c0_i32 = arith.constant 0 : i32
    %c0_i32_0 = arith.constant 0 : i32
    %c0_i32_1 = arith.constant 0 : i32
    return %c0_i32, %c0_i32_0 : i32, i32
  }
  func.func @transform_7(%arg0: i32) -> (i32, i32) {
    %c0_i32 = arith.constant 0 : i32
    %c0_i32_0 = arith.constant 0 : i32
    %c0_i32_1 = arith.constant 0 : i32
    return %c0_i32, %c0_i32_0 : i32, i32
  }
  func.func @transform_8(%arg0: i32) -> (i32, i32) {
    %c0_i32 = arith.constant 0 : i32
    %c0_i32_0 = arith.constant 0 : i32
    %c0_i32_1 = arith.constant 0 : i32
    return %c0_i32, %c0_i32_0 : i32, i32
  }
  func.func @transform_9(%arg0: i32) -> (i32, i32) {
    %c0_i32 = arith.constant 0 : i32
    %c0_i32_0 = arith.constant 0 : i32
    %c0_i32_1 = arith.constant 0 : i32
    return %c0_i32, %c0_i32_0 : i32, i32
  }
  func.func @transform_10(%arg0: i32) -> (i32, i32) {
    %c0_i32 = arith.constant 0 : i32
    %c0_i32_0 = arith.constant 0 : i32
    %c0_i32_1 = arith.constant 0 : i32
    return %c0_i32, %c0_i32_0 : i32, i32
  }
  func.func @transform_11(%arg0: i32) -> (i32, i32) {
    %c0_i32 = arith.constant 0 : i32
    %c0_i32_0 = arith.constant 0 : i32
    %c0_i32_1 = arith.constant 0 : i32
    return %c0_i32, %c0_i32_0 : i32, i32
  }
  func.func @transform_12(%arg0: i32) -> (i32, i32) {
    %c0_i32 = arith.constant 0 : i32
    %c0_i32_0 = arith.constant 0 : i32
    %c0_i32_1 = arith.constant 0 : i32
    return %c0_i32, %c0_i32_0 : i32, i32
  }
  func.func @transform_13(%arg0: i32) -> (i32, i32) {
    %c0_i32 = arith.constant 0 : i32
    %c0_i32_0 = arith.constant 0 : i32
    %c0_i32_1 = arith.constant 0 : i32
    return %c0_i32, %c0_i32_0 : i32, i32
  }
  func.func @transform_14(%arg0: i32) -> (i32, i32) {
    %c0_i32 = arith.constant 0 : i32
    %c0_i32_0 = arith.constant 0 : i32
    %c0_i32_1 = arith.constant 0 : i32
    return %c0_i32, %c0_i32_0 : i32, i32
  }
  func.func @transform_15(%arg0: i32) -> (i32, i32) {
    %c0_i32 = arith.constant 0 : i32
    %c0_i32_0 = arith.constant 0 : i32
    %c0_i32_1 = arith.constant 0 : i32
    return %c0_i32, %c0_i32_0 : i32, i32
  }
  func.func @transform_16(%arg0: i32) -> (i32, i32) {
    %c0_i32 = arith.constant 0 : i32
    %c0_i32_0 = arith.constant 0 : i32
    %c0_i32_1 = arith.constant 0 : i32
    return %c0_i32, %c0_i32_0 : i32, i32
  }
  func.func @transform_17(%arg0: i32) -> (i32, i32) {
    %c0_i32 = arith.constant 0 : i32
    %c0_i32_0 = arith.constant 0 : i32
    %c0_i32_1 = arith.constant 0 : i32
    return %c0_i32, %c0_i32_0 : i32, i32
  }
  func.func @transform_18(%arg0: i32) -> (i32, i32) {
    %c0_i32 = arith.constant 0 : i32
    %c0_i32_0 = arith.constant 0 : i32
    %c0_i32_1 = arith.constant 0 : i32
    return %c0_i32, %c0_i32_0 : i32, i32
  }
  func.func @transform_19(%arg0: i32) -> (i32, i32) {
    %c0_i32 = arith.constant 0 : i32
    %c0_i32_0 = arith.constant 0 : i32
    %c0_i32_1 = arith.constant 0 : i32
    return %c0_i32, %c0_i32_0 : i32, i32
  }
  func.func @transform_20(%arg0: i32) -> (i32, i32) {
    %c0_i32 = arith.constant 0 : i32
    %c0_i32_0 = arith.constant 0 : i32
    %c0_i32_1 = arith.constant 0 : i32
    return %c0_i32, %c0_i32_0 : i32, i32
  }
  func.func @transform_21(%arg0: i32) -> (i32, i32) {
    %c0_i32 = arith.constant 0 : i32
    %c0_i32_0 = arith.constant 0 : i32
    %c0_i32_1 = arith.constant 0 : i32
    return %c0_i32, %c0_i32_0 : i32, i32
  }
  func.func @transform_22(%arg0: i32) -> (i32, i32) {
    %c0_i32 = arith.constant 0 : i32
    %c0_i32_0 = arith.constant 0 : i32
    %c0_i32_1 = arith.constant 0 : i32
    return %c0_i32, %c0_i32_0 : i32, i32
  }
  func.func @transform_23(%arg0: i32) -> (i32, i32) {
    %c0_i32 = arith.constant 0 : i32
    %c0_i32_0 = arith.constant 0 : i32
    %c0_i32_1 = arith.constant 0 : i32
    return %c0_i32, %c0_i32_0 : i32, i32
  }
  func.func @transform_24(%arg0: i32) -> (i32, i32) {
    %c0_i32 = arith.constant 0 : i32
    %c0_i32_0 = arith.constant 0 : i32
    %c0_i32_1 = arith.constant 0 : i32
    return %c0_i32, %c0_i32_0 : i32, i32
  }
  func.func @transform_25(%arg0: i32) -> (i32, i32) {
    %c0_i32 = arith.constant 0 : i32
    %c0_i32_0 = arith.constant 0 : i32
    %c0_i32_1 = arith.constant 0 : i32
    return %c0_i32, %c0_i32_0 : i32, i32
  }
  func.func @transform_26(%arg0: i32) -> (i32, i32) {
    %c0_i32 = arith.constant 0 : i32
    %c0_i32_0 = arith.constant 0 : i32
    %c0_i32_1 = arith.constant 0 : i32
    return %c0_i32, %c0_i32_0 : i32, i32
  }
  func.func @transform_27(%arg0: i32) -> (i32, i32) {
    %c0_i32 = arith.constant 0 : i32
    %c0_i32_0 = arith.constant 0 : i32
    %c0_i32_1 = arith.constant 0 : i32
    return %c0_i32, %c0_i32_0 : i32, i32
  }
  func.func @transform_28(%arg0: i32) -> (i32, i32) {
    %c0_i32 = arith.constant 0 : i32
    %c0_i32_0 = arith.constant 0 : i32
    %c0_i32_1 = arith.constant 0 : i32
    return %c0_i32, %c0_i32_0 : i32, i32
  }
  func.func @transform_29(%arg0: i32) -> (i32, i32) {
    %c0_i32 = arith.constant 0 : i32
    %c0_i32_0 = arith.constant 0 : i32
    %c0_i32_1 = arith.constant 0 : i32
    return %c0_i32, %c0_i32_0 : i32, i32
  }
  func.func @transform_30(%arg0: i32) -> (i32, i32) {
    %c0_i32 = arith.constant 0 : i32
    %c0_i32_0 = arith.constant 0 : i32
    %c0_i32_1 = arith.constant 0 : i32
    return %c0_i32, %c0_i32_0 : i32, i32
  }
  func.func @transform_31(%arg0: i32) -> (i32, i32) {
    %c0_i32 = arith.constant 0 : i32
    %c0_i32_0 = arith.constant 0 : i32
    %c0_i32_1 = arith.constant 0 : i32
    return %c0_i32, %c0_i32_0 : i32, i32
  }
  func.func @transform_32(%arg0: i32) -> (i32, i32) {
    %c0_i32 = arith.constant 0 : i32
    %c0_i32_0 = arith.constant 0 : i32
    %c0_i32_1 = arith.constant 0 : i32
    return %c0_i32, %c0_i32_0 : i32, i32
  }
  func.func @transform_33(%arg0: i32) -> (i32, i32) {
    %c0_i32 = arith.constant 0 : i32
    %c0_i32_0 = arith.constant 0 : i32
    %c0_i32_1 = arith.constant 0 : i32
    return %c0_i32, %c0_i32_0 : i32, i32
  }
  func.func @transform_34(%arg0: i32) -> (i32, i32) {
    %c0_i32 = arith.constant 0 : i32
    %c0_i32_0 = arith.constant 0 : i32
    %c0_i32_1 = arith.constant 0 : i32
    return %c0_i32, %c0_i32_0 : i32, i32
  }
  func.func @transform_35(%arg0: i32) -> (i32, i32) {
    %c0_i32 = arith.constant 0 : i32
    %c0_i32_0 = arith.constant 0 : i32
    %c0_i32_1 = arith.constant 0 : i32
    return %c0_i32, %c0_i32_0 : i32, i32
  }
  func.func @transform_36(%arg0: i32) -> (i32, i32) {
    %c0_i32 = arith.constant 0 : i32
    %c0_i32_0 = arith.constant 0 : i32
    %c0_i32_1 = arith.constant 0 : i32
    return %c0_i32, %c0_i32_0 : i32, i32
  }
  func.func @transform_37(%arg0: i32) -> (i32, i32) {
    %c0_i32 = arith.constant 0 : i32
    %c0_i32_0 = arith.constant 0 : i32
    %c0_i32_1 = arith.constant 0 : i32
    return %c0_i32, %c0_i32_0 : i32, i32
  }
  func.func @transform_38(%arg0: i32) -> (i32, i32) {
    %c0_i32 = arith.constant 0 : i32
    %c0_i32_0 = arith.constant 0 : i32
    %c0_i32_1 = arith.constant 0 : i32
    return %c0_i32, %c0_i32_0 : i32, i32
  }
  func.func @transform_39(%arg0: i32) -> (i32, i32) {
    %c0_i32 = arith.constant 0 : i32
    %c0_i32_0 = arith.constant 0 : i32
    %c0_i32_1 = arith.constant 0 : i32
    return %c0_i32, %c0_i32_0 : i32, i32
  }
  func.func @transform_40(%arg0: i32) -> (i32, i32) {
    %c0_i32 = arith.constant 0 : i32
    %c0_i32_0 = arith.constant 0 : i32
    %c0_i32_1 = arith.constant 0 : i32
    return %c0_i32, %c0_i32_0 : i32, i32
  }
  func.func @transform_41(%arg0: i32) -> (i32, i32, i32) {
    %c0_i32 = arith.constant 0 : i32
    %c0_i32_0 = arith.constant 0 : i32
    %c0_i32_1 = arith.constant 0 : i32
    return %arg0, %c0_i32, %c0_i32_0 : i32, i32, i32
  }
}

</mosaic_0001>

<bundles_post_ra>
// kernel: _forward_core.1
= control target key start
LH: loop header
LB: loop body
LE: loop exit
PB: predicated region body
PF: predicated region fallthrough
CT: control target
= control target key end

     0   :  { %s4479_s6 = smov 1   ;;  %s4480_s10 = smov 2   ;;  %s5466_s0 = inlined_call_operand.smem [shape: u32[42], index: -1, kind: input, shape index: {}] }
   0x1   :  { %s4541_s5 = sld [smem:[%s5466_s0]]   ;;  %s4481_s14 = smov 3  }
   0x2   :  { %s4546_s9 = sld [smem:[%s5466_s0 + %s4479_s6]]   ;;  %s4482_s18 = smov 4  }
   0x3   :  { %s4551_s13 = sld [smem:[%s5466_s0 + %s4480_s10]]   ;;  %s4483_s22 = smov 5  }
   0x4   :  { %s4556_s17 = sld [smem:[%s5466_s0 + %s4481_s14]]   ;;  %s4484_s26 = smov 6  }
   0x5   :  { %s4561_s21 = sld [smem:[%s5466_s0 + %s4482_s18]]   ;;  %s4485_s30 = smov 7  }
   0x6   :  { %s4566_s25 = sld [smem:[%s5466_s0 + %s4483_s22]]   ;;  %s4486_s4 = smov 8  }
   0x7   :  { %s4571_s29 = sld [smem:[%s5466_s0 + %s4484_s26]]   ;;  %s4487_s10 = smov 9  }
   0x8   :  { %5487 = sst [smem:[#allocation5_spill]] %s4546_s9  ;;  %s4488_s15 = smov 10  }
   0x9   :  { %s4576_s3 = sld [smem:[%s5466_s0 + %s4485_s30]]   ;;  %s4489_s20 = smov 11  }
   0xa   :  { %s4581_s8 = sld [smem:[%s5466_s0 + %s4486_s4]]   ;;  %s4490_s26 = smov 12  }
   0xb   :  { %5488 = sst [smem:[#allocation6_spill]] %s4561_s21  ;;  %s4491_s1 = smov 13  }
   0xc   :  { %5489 = sst [smem:[#allocation7_spill]] %s4566_s25  ;;  %s4492_s7 = smov 14  }
   0xd   :  { %5490 = sst [smem:[#allocation8_spill]] %s4571_s29  ;;  %s4494_s22 = smov 16  }
   0xe   :  { %s4586_s14 = sld [smem:[%s5466_s0 + %s4487_s10]]   ;;  %s4495_s28 = smov 17  }
   0xf   :  { %5491 = sst [smem:[#allocation9_spill]] %s4576_s3 }
  0x10   :  { %s4591_s19 = sld [smem:[%s5466_s0 + %s4488_s15]]   ;;  %s4493_s15 = smov 15  }
  0x11   :  { %s4596_s24 = sld [smem:[%s5466_s0 + %s4489_s20]]  }
  0x12   :  { %s4601_s30 = sld [smem:[%s5466_s0 + %s4490_s26]]  }
  0x13   :  { %s4606_s6 = sld [smem:[%s5466_s0 + %s4491_s1]]  }
  0x14   :  { %s4611_s12 = sld [smem:[%s5466_s0 + %s4492_s7]]   ;;  %s4496_s7 = smov 18  }
  0x15   :  { %s4616_s20 = sld [smem:[%s5466_s0 + %s4493_s15]]   ;;  %s4497_s15 = smov 19  }
  0x16   :  { %5492 = sst [smem:[#allocation10_spill]] %s4591_s19 }
  0x17   :  { %5493 = sst [smem:[#allocation11_spill]] %s4596_s24 }
  0x18   :  { %5494 = sst [smem:[#allocation12_spill]] %s4601_s30 }
  0x19   :  { %s4621_s27 = sld [smem:[%s5466_s0 + %s4494_s22]]   ;;  %s4498_s22 = smov 20  }
  0x1a   :  { %5495 = sst [smem:[#allocation13_spill]] %s4611_s12 }
  0x1b   :  { %5496 = sst [smem:[#allocation14_spill]] %s4616_s20 }
  0x1c   :  { %s4626_s4 = sld [smem:[%s5466_s0 + %s4495_s28]]   ;;  %s4499_s28 = smov 21  }
  0x1d   :  { %s4631_s9 = sld [smem:[%s5466_s0 + %s4496_s7]]   ;;  %s4500_s7 = smov 22  }
  0x1e   :  { %s4636_s12 = sld [smem:[%s5466_s0 + %s4497_s15]]   ;;  %s4501_s15 = smov 23  }
  0x1f   :  { %5497 = sst [smem:[#allocation15_spill]] %s4621_s27 }
  0x20   :  { %s4641_s27 = sld [smem:[%s5466_s0 + %s4498_s22]]   ;;  %s4502_s22 = smov 24  }
  0x22   :  { %5498 = sst [smem:[#allocation16_spill]] %s4626_s4 }
  0x23   :  { %5499 = sst [smem:[#allocation17_spill]] %s4631_s9 }
  0x24   :  { %5500 = sst [smem:[#allocation18_spill]] %s4636_s12 }
  0x25   :  { %s4646_s4 = sld [smem:[%s5466_s0 + %s4499_s28]]   ;;  %s4503_s28 = smov 25  }
  0x26   :  { %5501 = sst [smem:[#allocation19_spill]] %s4641_s27 }
  0x27   :  { %s4651_s9 = sld [smem:[%s5466_s0 + %s4500_s7]]   ;;  %s4504_s7 = smov 26  }
  0x28   :  { %s4656_s12 = sld [smem:[%s5466_s0 + %s4501_s15]]   ;;  %s4505_s15 = smov 27  }
  0x29   :  { %s4661_s27 = sld [smem:[%s5466_s0 + %s4502_s22]]   ;;  %s4506_s22 = smov 28  }
  0x2b   :  { %5502 = sst [smem:[#allocation20_spill]] %s4646_s4 }
  0x2c   :  { %s4666_s4 = sld [smem:[%s5466_s0 + %s4503_s28]]   ;;  %s4507_s28 = smov 29  }
  0x2d   :  { %5503 = sst [smem:[#allocation21_spill]] %s4651_s9 }
  0x2e   :  { %5504 = sst [smem:[#allocation22_spill]] %s4656_s12 }
  0x2f   :  { %5505 = sst [smem:[#allocation23_spill]] %s4661_s27 }
  0x30   :  { %s4671_s9 = sld [smem:[%s5466_s0 + %s4504_s7]]   ;;  %s4508_s7 = smov 30  }
  0x31   :  { %s4676_s12 = sld [smem:[%s5466_s0 + %s4505_s15]]   ;;  %s4509_s15 = smov 31  }
  0x32   :  { %5506 = sst [smem:[#allocation24_spill]] %s4666_s4 }
  0x33   :  { %s4681_s27 = sld [smem:[%s5466_s0 + %s4506_s22]]   ;;  %s4510_s22 = smov 32  }
  0x34   :  { %s4686_s4 = sld [smem:[%s5466_s0 + %s4507_s28]]   ;;  %s4511_s28 = smov 33  }
  0x35   :  { %s4696_s20 = sld [smem:[%s5466_s0 + %s4509_s15]]   ;;  %s4513_s15 = smov 35  }
  0x36   :  { %5507 = sst [smem:[#allocation25_spill]] %s4671_s9 }
  0x37   :  { %s4691_s9 = sld [smem:[%s5466_s0 + %s4508_s7]]   ;;  %s4512_s7 = smov 34  }
  0x38   :  { %s4701_s29 = sld [smem:[%s5466_s0 + %s4510_s22]]   ;;  %s4514_s22 = smov 36  }
  0x39   :  { %s4706_s21 = sld [smem:[%s5466_s0 + %s4511_s28]]   ;;  %s4515_s28 = smov 37  }
  0x3a   :  { %s4711_s3 = sld [smem:[%s5466_s0 + %s4512_s7]]   ;;  %s4516_s7 = smov 38  }
  0x3b   :  { %s4716_s19 = sld [smem:[%s5466_s0 + %s4513_s15]]   ;;  %s4517_s15 = smov 39  }
  0x3c   :  { %s4721_s24 = sld [smem:[%s5466_s0 + %s4514_s22]]   ;;  %s4518_s22 = smov 40  }
  0x3d   :  { %s4726_s25 = sld [smem:[%s5466_s0 + %s4515_s28]]   ;;  %s4519_s28 = smov 41  }
  0x3e   :  { %s4731_s30 = sld [smem:[%s5466_s0 + %s4516_s7]]  }
  0x41   :  { %5508 = sst [smem:[#allocation26_spill]] %s4716_s19 }
  0x42   :  { %5509 = sst [smem:[#allocation27_spill]] %s4721_s24 }
  0x43   :  { %5510 = sst [smem:[#allocation28_spill]] %s4726_s25 }
  0x44   :  { %s4736_s19 = sld [smem:[%s5466_s0 + %s4517_s15]]  }
  0x45   :  { %s4741_s24 = sld [smem:[%s5466_s0 + %s4518_s22]]  }
  0x46   :  { %s4746_s25 = sld [smem:[%s5466_s0 + %s4519_s28]]  }
  0x47   :  { %88 = vsyncpa [#allocation3], 0  ;;  %s4748_s7 = smov 0  }
  0x48 LB: > { %s4754_s10 = sadd.s32 4294967295, %s4477_s7   ;;  %p3966_p0 = scmp.ge.s32.totalorder %s4477_s7, 1  ;;  %s4477_s7 = sphi %s4748_s7, %s94_s7  }
  0x49   : > { %p991_p1 = scmp.lt.s32.totalorder %s4477_s7, 3  ;;  %p4130_p3 = scmp.eq.s32.totalorder %s4754_s10, 0 }
  0x4a   : > { %s4520_s15 = smov [#allocation2]  }
  0x4b   : > { %s1120_s0 = sshll.u32 %s4741_s24, 4  ;;  %p4759_p2 = pnand %p3966_p0, %p991_p1  ;;  %s1121_s0 = int_to_ptr.hbm [resolvable:$true] %s1120_s0 }
  0x4c   : > { %s1122_s16 = sshll.u32 %s4520_s15, 4  ;;  %s4437_s22 = sshra.s32 %s1121_s0, 4  ;;  %s1123_s16 = int_to_ptr.vmem [resolvable:$true] %s1122_s16  ;;  %s4438_s22 = int_to_ptr.hbm [resolvable:$true] %s4437_s22 }
  0x4d   : > { %p4126_p4 = pneg %p4759_p2  ;;  %s4439_s23 = scalar_lea.hbm %s4438_s22, 1 }
  0x4e   : > { %p4440_p6 = scmp.ne.s32.totalorder %s4438_s22, %s4439_s23  ;;  %s4444_s26 = scalar_lea.hbm %s4741_s24, 1 }
  0x4f   : > { %p4768_p5 = pnand %p4130_p3, %p4126_p4  ;;  %p4445_p10 = scmp.lt.s32.totalorder %s4438_s22, %s4741_s24 }
  0x50   : > { %p4446_p11 = scmp.lt.s32.totalorder %s4444_s26, %s4439_s23 }
  0x51   : > { %p4441_p7 = pneg %p4768_p5 }
  0x52   : > { %p4447_p12 = por %p4446_p11, %p4445_p10 }
  0x53   : > { %p4442_p8 = pnand %p4441_p7, %p4440_p6 }
  0x55   : > { %p4443_p9 = pneg %p4442_p8 }
  0x57   : > { %p4448_p13 = pnand %p4447_p12, %p4443_p9 }
  0x59   : > { %4451 = shalt.err (!%p4448_p13)
}
  0x5a   : > { %4129 = dma.hbm_to_vmem [thread:$0]  (!%p4768_p5), %s1121_s0, 16, %s1123_s16, [#allocation3]  }
  0x5b   : > { %1143 = sbr.rel (%p4759_p2) target bundleno = 6416 (0x1910), region = 184 }
  0x60   : > { %4472 = dma.done.wait (%p4130_p3), [#allocation3], 16  }
  0x61   : > { %4474 = vsyncadd (%p4130_p3), [#allocation3], 4294967280  ;;  %p1244_p0 = scmp.lt.s32.totalorder %s4754_s10, 1  ;;  %vm1257_vm0 = vcmask 261120   ;;  %vm1264_vm1 = vcmask 253952   ;;  %v4521_v6 = vmov 32.0  }
  0x62   : > { %4261 = vrcp.f32 %v4521_v6  ;;  %v1349_v28 = vld [vmem:[%s4681_s27 + $0x18] sm:$0xff]  ;;  %v1348_v29 = vld [vmem:[%s4681_s27 + $0x10] sm:$0xff]  ;;  %v1347_v30 = vld [vmem:[%s4681_s27 + $0x8] sm:$0xff]  ;;  %s4522_s2 = smov 96   ;;  %s4523_s0 = smov 64  }
  0x63   : > { %s5544_s10 = smov (!%p1244_p0, %s4754_s10), 1  ;;  %4113 = vmatpush.msra.mxu2 %v1349_v28  ;;  %1375 = vmatpush.msra.mxu0 %v1349_v28  ;;  %v1346_v31 = vld [vmem:[%s4681_s27] sm:$0xff]  ;;  %s4524_s11 = smov 88  }
  0x64   : > { %s5476_s28 = smul.u32 24, %s5544_s10  ;;  %v4234_v49 = vld [vmem:[%s4701_s29] ss:$0 sm:$0xff]  ;;  %s4525_s15 = smov 120  }
  0x65   : > { %4114 = vmatpush.msra.mxu2 %v1348_v29  ;;  %1376 = vmatpush.msra.mxu0 %v1348_v29  ;;  %v4235_v53 = vld [vmem:[%s4696_s20] ss:$0 sm:$0xff]  ;;  %s4526_s16 = smov 80   ;;  %s4527_s18 = smov 72  }
  0x66   : > { %s1248_s1 = scalar_lea.vmem %s4541_s5, %s5476_s28  ;;  %s5485_s22 = smov 112  }
  0x67   : > { %v1255_v0 = vld [vmem:[%s1248_s1 + $0x8] sm:$0xff]  ;;  %v1254_v1 = vld [vmem:[%s1248_s1] sm:$0xff]  ;;  %v1256_v2 = vld [vmem:[%s1248_s1 + $0x10] sm:$0x1]  ;;  %4115 = vmatpush.msra.mxu2 %v1347_v30  ;;  %1377 = vmatpush.msra.mxu0 %v1347_v30  ;;  %s5483_s23 = smov 104   ;;  %s5481_s26 = smov 56  }
  0x68   : > { %v1261_v3 = vsel %vm1257_vm0, %v1255_v0, 0.0  ;;  %v1265_v4 = vsel %vm1264_vm1, %v1256_v2, 0.0  ;;  %v1258_v5 = vsel %vm1257_vm0, %v1254_v1, 0.0  ;;  %v4262_v7 = vpop.eup %4261  ;;  %s5479_s1 = smov 48   ;;  %s5477_s28 = smov 40  }
  0x69   : > { %1262 = vadd.xlane.f32.xlu0 %v1261_v3  ;;  %1266 = vadd.xlane.f32.xlu1 %v1265_v4  ;;  %v1269_v8 = vmul.f32 32.0, %v4262_v7  ;;  %vm1273_vm2 = vweird.f32 %v4262_v7 }
  0x6a   : > { %4116 = vmatpush.msra.mxu2 %v1346_v31  ;;  %1378 = vmatpush.msra.mxu0 %v1346_v31 }
  0x6b   : > { %v1270_v9 = vsub.f32 1.0, %v1269_v8 }
  0x6d   : > { %v1271_v10 = vmul.f32 %v4262_v7, %v1270_v9  ;;  %v4236_v9 = vld [vmem:[%s4676_s12] ss:$0 sm:$0xff] }
  0x6f   : > { %v1272_v11 = vadd.f32 %v4262_v7, %v1271_v10 }
  0x71   : > { %1259 = vadd.xlane.f32.xlu0 %v1258_v5  ;;  %v4795_v12 = vsel %vm1273_vm2, %v4262_v7, %v1272_v11 }
  0xdc   : > { %v1263_v13 = vpop.xlane.xlu0 %1262  ;;  %v1267_v17 = vpop.xlane.xlu1 %1266 }
  0xdd   : > { %v1276_v14 = vmul.f32 %v4795_v12, %v1263_v13  ;;  %v1277_v21 = vmul.f32 %v4795_v12, %v1267_v17 }
  0xdf   : > { %v1279_v15 = vsub.f32 %v1255_v0, %v1276_v14  ;;  %v4801_v23 = vsub.f32 %v1256_v2, %v1277_v21 }
  0xe1   : > { %v1282_v16 = vmul.f32 %v1279_v15, %v1279_v15  ;;  %v1283_v26 = vmul.f32 %v4801_v23, %v4801_v23 }
  0xe3   : > { %v1287_v18 = vsel %vm1257_vm0, %v1282_v16, 0.0  ;;  %v1290_v27 = vsel %vm1264_vm1, %v1283_v26, 0.0 }
  0xe4   : > { %1288 = vadd.xlane.f32.xlu1 %v1287_v18  ;;  %v1260_v19 = vpop.xlane.xlu0 %1259 }
  0xe5   : > { %v1275_v20 = vmul.f32 %v4795_v12, %v1260_v19 }
  0xe7   : > { %v1278_v22 = vsub.f32 %v1254_v1, %v1275_v20 }
  0xe9   : > { %v1281_v24 = vmul.f32 %v1278_v22, %v1278_v22 }
  0xeb   : > { %v1284_v25 = vsel %vm1257_vm0, %v1281_v24, 0.0 }
  0xec   : > { %1285 = vadd.xlane.f32.xlu2 %v1284_v25 }
  0xf4   : > { %1291 = vadd.xlane.f32.xlu2 %v1290_v27 }
 0x157   : > { %v1289_v32 = vpop.xlane.xlu1 %1288 }
 0x158   : > { %v1294_v33 = vmul.f32 %v1289_v32, %v4795_v12 }
 0x15a   : > { %v1297_v34 = vadd.f32 1e-12, %v1294_v33 }
 0x15c   : > { %4263 = vrsqrt.f32 %v1297_v34  ;;  %vm1315_vm4 = vweird.f32 %v1297_v34 }
 0x15f   : > { %v1286_v35 = vpop.xlane.xlu2 %1285 }
 0x160   : > { %v1293_v36 = vmul.f32 %v1286_v35, %v4795_v12 }
 0x162   : > { %v4264_v37 = vpop.eup %4263  ;;  %v1296_v38 = vadd.f32 1e-12, %v1293_v36 }
 0x163   : > { %v1310_v39 = vmul.f32 %v4264_v37, %v1297_v34  ;;  %vm1316_vm3 = vweird.f32 %v4264_v37 }
 0x164   : > { %4265 = vrsqrt.f32 %v1296_v38  ;;  %vm1317_vm5 = vmor %vm1315_vm4, %vm1316_vm3  ;;  %vm1305_vm7 = vweird.f32 %v1296_v38 }
 0x165   : > { %v1311_v40 = vmul.f32 %v4264_v37, %v1310_v39 }
 0x167   : > { %v1312_v41 = vmul.f32 0.5, %v1311_v40  ;;  %v1292_v42 = vpop.xlane.xlu2 %1291 }
 0x168   : > { %v1295_v43 = vmul.f32 %v1292_v42, %v4795_v12 }
 0x169   : > { %v1313_v44 = vsub.f32 1.5, %v1312_v41 }
 0x16a   : > { %v4266_v45 = vpop.eup %4265  ;;  %v1298_v46 = vadd.f32 1e-12, %v1295_v43 }
 0x16b   : > { %v1314_v47 = vmul.f32 %v4264_v37, %v1313_v44  ;;  %v1300_v48 = vmul.f32 %v4266_v45, %v1296_v38  ;;  %vm1306_vm6 = vweird.f32 %v4266_v45 }
 0x16c   : > { %4267 = vrsqrt.f32 %v1298_v46  ;;  %vm1307_vm8 = vmor %vm1305_vm7, %vm1306_vm6  ;;  %vm1325_vm10 = vweird.f32 %v1298_v46 }
 0x16d   : > { %v1318_v50 = vsel %vm1317_vm5, %v4264_v37, %v1314_v47  ;;  %v1301_v51 = vmul.f32 %v4266_v45, %v1300_v48 }
 0x16e   : > { %v1330_v52 = vmul.f32 %v1318_v50, %v1279_v15 }
 0x16f   : > { %v1302_v54 = vmul.f32 0.5, %v1301_v51 }
 0x170   : > { %v1337_v55 = vmul.f32 %v4234_v49, %v1330_v52 }
 0x171   : > { %v1303_v56 = vsub.f32 1.5, %v1302_v54 }
 0x172   : > { %v4268_v57 = vpop.eup %4267  ;;  %v1344_v58 = vadd.f32 %v4235_v53, %v1337_v55 }
 0x173   : > { %v1304_v59 = vmul.f32 %v4266_v45, %v1303_v56  ;;  %v1320_v60 = vmul.f32 %v4268_v57, %v1298_v46  ;;  %vm1326_vm9 = vweird.f32 %v4268_v57 }
 0x174   : > { %3974 = vmatmul.msk.f32.vlgmr.msra.gmra.mxu2 %vm1257_vm0, %v1344_v58  ;;  %vm1327_vm11 = vmor %vm1325_vm10, %vm1326_vm9 }
 0x175   : > { %v1321_v61 = vmul.f32 %v4268_v57, %v1320_v60  ;;  %v1308_v62 = vsel %vm1307_vm8, %v4266_v45, %v1304_v59 }
 0x176   : > { %v1329_v63 = vmul.f32 %v1308_v62, %v1278_v22  ;;  %v1499_v62 = vld [vmem:[%s4691_s9 + $0x18] sm:$0xff] }
 0x177   : > { %v1322_v0 = vmul.f32 0.5, %v1321_v61  ;;  %1525 = vmatpush.msra.mxu1 %v1499_v62  ;;  %4117 = vmatpush.msra.mxu3 %v1499_v62 }
 0x178   : > { %v1336_v1 = vmul.f32 %v4234_v49, %v1329_v63  ;;  %v1498_v63 = vld [vmem:[%s4691_s9 + $0x10] sm:$0xff] }
 0x179   : > { %v1323_v2 = vsub.f32 1.5, %v1322_v0  ;;  %1526 = vmatpush.msra.mxu1 %v1498_v63  ;;  %4118 = vmatpush.msra.mxu3 %v1498_v63  ;;  %v1497_v0 = vld [vmem:[%s4691_s9 + $0x8] sm:$0xff] }
 0x17a   : > { %v1343_v3 = vadd.f32 %v4235_v53, %v1336_v1  ;;  %v1496_v1 = vld [vmem:[%s4691_s9] sm:$0xff] }
 0x17b   : > { %v1324_v4 = vmul.f32 %v4268_v57, %v1323_v2  ;;  %1527 = vmatpush.msra.mxu1 %v1497_v0  ;;  %4119 = vmatpush.msra.mxu3 %v1497_v0 }
 0x17c   : > { %3973 = vmatmul.msk.f32.vlgmr.msra.gmra.mxu0 %vm1257_vm0, %v1343_v3 }
 0x17d   : > { %v1328_v5 = vsel %vm1327_vm11, %v4268_v57, %v1324_v4  ;;  %1528 = vmatpush.msra.mxu1 %v1496_v1  ;;  %4120 = vmatpush.msra.mxu3 %v1496_v1 }
 0x17e   : > { %v1331_v6 = vmul.f32 %v1328_v5, %v4801_v23 }
 0x180   : > { %v1338_v7 = vmul.f32 %v4234_v49, %v1331_v6 }
 0x182   : > { %v1345_v8 = vadd.f32 %v4235_v53, %v1338_v7 }
 0x184   : > { %3975 = vmatmul.msk.f32.gmra.mxu2 %vm1257_vm0, %v1345_v8 }
 0x1f7   : > { %v1383_v10 = vpop.f32.mrf.mxu2 }
 0x1f8   : > { %v1384_v11 = vadd.f32 %v4236_v9, %v1383_v10 }
 0x1f9   : > { %v1380_v13 = vpop.f32.mrf.mxu0 }
 0x1fa   : > { %v1381_v14 = vadd.f32 %v4236_v9, %v1380_v13  ;;  %v1393_v15 = vmul.f32 0.044715, %v1384_v11  ;;  %v1390_v29 = vmul.f32 0.5, %v1384_v11 }
 0x1fc   : > { %v1396_v16 = vmul.f32 %v1393_v15, %v1384_v11  ;;  %v1392_v17 = vmul.f32 0.044715, %v1381_v14  ;;  %v1389_v34 = vmul.f32 0.5, %v1381_v14 }
 0x1fe   : > { %v1399_v18 = vmul.f32 %v1396_v16, %v1384_v11  ;;  %v1395_v19 = vmul.f32 %v1392_v17, %v1381_v14 }
 0x200   : > { %v1402_v20 = vadd.f32 %v1399_v18, %v1384_v11  ;;  %v1398_v21 = vmul.f32 %v1395_v19, %v1381_v14 }
 0x202   : > { %v1405_v22 = vmul.f32 0.7978846, %v1402_v20  ;;  %v1401_v24 = vadd.f32 %v1398_v21, %v1381_v14 }
 0x204   : > { %4269 = vtanh.f32 %v1405_v22  ;;  %v1404_v23 = vmul.f32 0.7978846, %v1401_v24 }
 0x206   : > { %4271 = vtanh.f32 %v1404_v23 }
 0x207   : > { %v1386_v25 = vpop.f32.mrf.mxu2 }
 0x208   : > { %v1387_v26 = vadd.f32 %v4236_v9, %v1386_v25 }
 0x20a   : > { %v4270_v27 = vpop.eup %4269  ;;  %v1394_v28 = vmul.f32 0.044715, %v1387_v26  ;;  %v1391_v43 = vmul.f32 0.5, %v1387_v26 }
 0x20b   : > { %v1411_v30 = vadd.f32 1.0, %v4270_v27 }
 0x20c   : > { %v4272_v31 = vpop.eup %4271  ;;  %v1397_v32 = vmul.f32 %v1394_v28, %v1387_v26 }
 0x20d   : > { %v1414_v33 = vmul.f32 %v1411_v30, %v1390_v29  ;;  %v1410_v35 = vadd.f32 1.0, %v4272_v31  ;;  %v4238_v30 = vld [vmem:[%s4706_s21] ss:$0 sm:$0xff] }
 0x20e   : > { %v1400_v36 = vmul.f32 %v1397_v32, %v1387_v26 }
 0x20f   : > { %v1419_v37 = vsel %vm1257_vm0, %v1414_v33, 0.0  ;;  %v1413_v38 = vmul.f32 %v1410_v35, %v1389_v34 }
 0x210   : > { %1420 = vadd.xlane.f32.xlu1 %v1419_v37  ;;  %v1403_v39 = vadd.f32 %v1400_v36, %v1387_v26  ;;  %v4237_v26 = vld [vmem:[%s4711_s3] ss:$0 sm:$0xff] }
 0x211   : > { %v1416_v40 = vsel %vm1257_vm0, %v1413_v38, 0.0 }
 0x212   : > { %1417 = vadd.xlane.f32.xlu0 %v1416_v40  ;;  %v1406_v41 = vmul.f32 0.7978846, %v1403_v39 }
 0x214   : > { %4273 = vtanh.f32 %v1406_v41 }
 0x21a   : > { %v4274_v42 = vpop.eup %4273 }
 0x21b   : > { %v1412_v44 = vadd.f32 1.0, %v4274_v42 }
 0x21d   : > { %v1415_v45 = vmul.f32 %v1412_v44, %v1391_v43  ;;  %v4239_v44 = vld [vmem:[%s4686_s4] ss:$0 sm:$0xff] }
 0x21f   : > { %v1422_v46 = vsel %vm1264_vm1, %v1415_v45, 0.0 }
 0x220   : > { %1423 = vadd.xlane.f32.xlu2 %v1422_v46 }
 0x283   : > { %v1421_v47 = vpop.xlane.xlu1 %1420 }
 0x284   : > { %v1426_v48 = vmul.f32 %v1421_v47, %v4795_v12 }
 0x285   : > { %v1418_v49 = vpop.xlane.xlu0 %1417 }
 0x286   : > { %v4825_v50 = vsub.f32 %v1414_v33, %v1426_v48  ;;  %v1425_v51 = vmul.f32 %v1418_v49, %v4795_v12 }
 0x288   : > { %v1428_v52 = vsub.f32 %v1413_v38, %v1425_v51  ;;  %v1432_v53 = vmul.f32 %v4825_v50, %v4825_v50 }
 0x28a   : > { %v1437_v54 = vsel %vm1257_vm0, %v1432_v53, 0.0  ;;  %v1431_v55 = vmul.f32 %v1428_v52, %v1428_v52 }
 0x28b   : > { %1438 = vadd.xlane.f32.xlu1 %v1437_v54 }
 0x28c   : > { %v1434_v56 = vsel %vm1257_vm0, %v1431_v55, 0.0 }
 0x28d   : > { %1435 = vadd.xlane.f32.xlu0 %v1434_v56 }
 0x293   : > { %v1424_v57 = vpop.xlane.xlu2 %1423 }
 0x294   : > { %v1427_v58 = vmul.f32 %v1424_v57, %v4795_v12 }
 0x296   : > { %v4833_v59 = vsub.f32 %v1415_v45, %v1427_v58 }
 0x298   : > { %v1433_v60 = vmul.f32 %v4833_v59, %v4833_v59 }
 0x29a   : > { %v1440_v61 = vsel %vm1264_vm1, %v1433_v60, 0.0 }
 0x29b   : > { %1441 = vadd.xlane.f32.xlu2 %v1440_v61 }
 0x2fe   : > { %v1439_v2 = vpop.xlane.xlu1 %1438 }
 0x2ff   : > { %v1444_v3 = vmul.f32 %v1439_v2, %v4795_v12 }
 0x300   : > { %v1436_v4 = vpop.xlane.xlu0 %1435 }
 0x301   : > { %v1447_v5 = vadd.f32 1e-12, %v1444_v3  ;;  %v1443_v6 = vmul.f32 %v1436_v4, %v4795_v12 }
 0x303   : > { %4275 = vrsqrt.f32 %v1447_v5  ;;  %v1446_v7 = vadd.f32 1e-12, %v1443_v6  ;;  %vm1465_vm2 = vweird.f32 %v1447_v5 }
 0x305   : > { %4277 = vrsqrt.f32 %v1446_v7  ;;  %vm1455_vm14 = vweird.f32 %v1446_v7 }
 0x309   : > { %v4276_v8 = vpop.eup %4275 }
 0x30a   : > { %v1460_v9 = vmul.f32 %v4276_v8, %v1447_v5  ;;  %vm1466_vm13 = vweird.f32 %v4276_v8 }
 0x30b   : > { %v4278_v10 = vpop.eup %4277  ;;  %vm1467_vm3 = vmor %vm1465_vm2, %vm1466_vm13  ;;  %vm1705_vm2 = vcmask 64512  }
 0x30c   : > { %v1461_v11 = vmul.f32 %v4276_v8, %v1460_v9  ;;  %v1450_v13 = vmul.f32 %v4278_v10, %v1446_v7  ;;  %vm1456_vm12 = vweird.f32 %v4278_v10 }
 0x30d   : > { %vm1457_vm15 = vmor %vm1455_vm14, %vm1456_vm12 }
 0x30e   : > { %v1462_v14 = vmul.f32 0.5, %v1461_v11  ;;  %v1451_v15 = vmul.f32 %v4278_v10, %v1450_v13  ;;  %v1442_v16 = vpop.xlane.xlu2 %1441 }
 0x30f   : > { %v1445_v17 = vmul.f32 %v1442_v16, %v4795_v12 }
 0x310   : > { %v1463_v18 = vsub.f32 1.5, %v1462_v14  ;;  %v1452_v19 = vmul.f32 0.5, %v1451_v15 }
 0x311   : > { %v1448_v20 = vadd.f32 1e-12, %v1445_v17 }
 0x312   : > { %v1453_v21 = vsub.f32 1.5, %v1452_v19  ;;  %v1464_v22 = vmul.f32 %v4276_v8, %v1463_v18 }
 0x313   : > { %4279 = vrsqrt.f32 %v1448_v20  ;;  %vm1475_vm5 = vweird.f32 %v1448_v20 }
 0x314   : > { %v1454_v24 = vmul.f32 %v4278_v10, %v1453_v21  ;;  %v1468_v27 = vsel %vm1467_vm3, %v4276_v8, %v1464_v22  ;;  %vm1747_vm3 = vcmask 138240  }
 0x315   : > { %v1480_v33 = vmul.f32 %v1468_v27, %v4825_v50 }
 0x316   : > { %v1458_v23 = vsel %vm1457_vm15, %v4278_v10, %v1454_v24 }
 0x317   : > { %v1479_v25 = vmul.f32 %v1458_v23, %v1428_v52  ;;  %v1487_v36 = vmul.f32 %v4237_v26, %v1480_v33  ;;  %v1649_v33 = vld [vmem:[%s4556_s17 + $0x18] sm:$0xff] }
 0x318   : > { %1675 = vmatpush.msrb.mxu2 %v1649_v33 }
 0x319   : > { %v4280_v28 = vpop.eup %4279  ;;  %v1486_v29 = vmul.f32 %v4237_v26, %v1479_v25  ;;  %v1494_v39 = vadd.f32 %v4238_v30, %v1487_v36  ;;  %v1646_v36 = vld [vmem:[%s4556_s17] sm:$0xff] }
 0x31a   : > { %v1470_v31 = vmul.f32 %v4280_v28, %v1448_v20  ;;  %vm1476_vm4 = vweird.f32 %v4280_v28 }
 0x31b   : > { %v1493_v32 = vadd.f32 %v4238_v30, %v1486_v29  ;;  %vm1477_vm6 = vmor %vm1475_vm5, %vm1476_vm4  ;;  %vm1754_vm4 = vcmask 131072   ;;  %vm1799_vm5 = vcmask 1040384  }
 0x31c   : > { %v1471_v34 = vmul.f32 %v4280_v28, %v1470_v31 }
 0x31d   : > { %3976 = vmatmul.msk.f32.vlgmr.msra.gmra.mxu1 %vm1257_vm0, %v1493_v32 }
 0x31e   : > { %v1472_v35 = vmul.f32 0.5, %v1471_v34  ;;  %v1648_v34 = vld [vmem:[%s4556_s17 + $0x10] sm:$0xff] }
 0x31f   : > { %1676 = vmatpush.msrb.mxu2 %v1648_v34 }
 0x320   : > { %v1473_v37 = vsub.f32 1.5, %v1472_v35  ;;  %v1647_v35 = vld [vmem:[%s4556_s17 + $0x8] sm:$0xff] }
 0x321   : > { %1677 = vmatpush.msrb.mxu2 %v1647_v35 }
 0x322   : > { %v1474_v38 = vmul.f32 %v4280_v28, %v1473_v37 }
 0x323   : > { %1678 = vmatpush.msrb.mxu2 %v1646_v36 }
 0x324   : > { %v1478_v40 = vsel %vm1477_vm6, %v4280_v28, %v1474_v38 }
 0x325   : > { %3977 = vmatmul.msk.f32.gmra.mxu1 %vm1257_vm0, %v1494_v39  ;;  %v1481_v41 = vmul.f32 %v1478_v40, %v4833_v59 }
 0x327   : > { %v1488_v42 = vmul.f32 %v4237_v26, %v1481_v41 }
 0x329   : > { %v1495_v43 = vadd.f32 %v4238_v30, %v1488_v42 }
 0x32b   : > { %3978 = vmatmul.msk.f32.vlgmr.msra.gmra.mxu3 %vm1257_vm0, %v1495_v43 }
 0x39a   : > { %v1530_v45 = vpop.f32.mrf.mxu1 }
 0x39b   : > { %v1531_v46 = vadd.f32 %v4239_v44, %v1530_v45 }
 0x39d   : > { %v1542_v47 = vmul.f32 0.044715, %v1531_v46  ;;  %v1539_v61 = vmul.f32 0.5, %v1531_v46 }
 0x39f   : > { %v1545_v48 = vmul.f32 %v1542_v47, %v1531_v46 }
 0x3a1   : > { %v1548_v49 = vmul.f32 %v1545_v48, %v1531_v46 }
 0x3a2   : > { %v1533_v50 = vpop.f32.mrf.mxu1 }
 0x3a3   : > { %v1534_v51 = vadd.f32 %v4239_v44, %v1533_v50  ;;  %v1551_v52 = vadd.f32 %v1548_v49, %v1531_v46 }
 0x3a5   : > { %v1543_v53 = vmul.f32 0.044715, %v1534_v51  ;;  %v1554_v54 = vmul.f32 0.7978846, %v1551_v52  ;;  %v1540_v6 = vmul.f32 0.5, %v1534_v51 }
 0x3a7   : > { %4281 = vtanh.f32 %v1554_v54  ;;  %v1546_v55 = vmul.f32 %v1543_v53, %v1534_v51  ;;  %v4240_v53 = vld [vmem:[%s4586_s14] ss:$0 sm:$0xff] }
 0x3a9   : > { %v1549_v56 = vmul.f32 %v1546_v55, %v1534_v51 }
 0x3ab   : > { %v1552_v57 = vadd.f32 %v1549_v56, %v1534_v51 }
 0x3ad   : > { %v4282_v58 = vpop.eup %4281  ;;  %v1555_v59 = vmul.f32 0.7978846, %v1552_v57 }
 0x3ae   : > { %v1536_v60 = vpop.f32.mrf.mxu3  ;;  %v1560_v62 = vadd.f32 1.0, %v4282_v58  ;;  %v4241_v58 = vld [vmem:[%s4581_s8] ss:$0 sm:$0xff] }
 0x3af   : > { %v1537_v63 = vadd.f32 %v4239_v44, %v1536_v60  ;;  %4283 = vtanh.f32 %v1555_v59 }
 0x3b0   : > { %v4853_v0 = vmul.f32 %v1560_v62, %v1539_v61 }
 0x3b1   : > { %v1544_v1 = vmul.f32 0.044715, %v1537_v63  ;;  %v1541_v14 = vmul.f32 0.5, %v1537_v63 }
 0x3b2   : > { %v1566_v2 = vsel %vm1257_vm0, %v4853_v0, 0.0 }
 0x3b3   : > { %1567 = vadd.xlane.f32.xlu0 %v1566_v2  ;;  %v1547_v3 = vmul.f32 %v1544_v1, %v1537_v63 }
 0x3b5   : > { %v4284_v4 = vpop.eup %4283  ;;  %v1550_v5 = vmul.f32 %v1547_v3, %v1537_v63 }
 0x3b6   : > { %v1561_v7 = vadd.f32 1.0, %v4284_v4 }
 0x3b7   : > { %v1553_v8 = vadd.f32 %v1550_v5, %v1537_v63 }
 0x3b8   : > { %v4857_v9 = vmul.f32 %v1561_v7, %v1540_v6 }
 0x3b9   : > { %v1556_v10 = vmul.f32 0.7978846, %v1553_v8 }
 0x3ba   : > { %v1569_v11 = vsel %vm1257_vm0, %v4857_v9, 0.0 }
 0x3bb   : > { %1570 = vadd.xlane.f32.xlu1 %v1569_v11  ;;  %4285 = vtanh.f32 %v1556_v10 }
 0x3c1   : > { %v4286_v13 = vpop.eup %4285 }
 0x3c2   : > { %v1562_v15 = vadd.f32 1.0, %v4286_v13 }
 0x3c4   : > { %v4861_v16 = vmul.f32 %v1562_v15, %v1541_v14 }
 0x3c6   : > { %v1572_v17 = vsel %vm1264_vm1, %v4861_v16, 0.0 }
 0x3c7   : > { %1573 = vadd.xlane.f32.xlu2 %v1572_v17 }
 0x426   : > { %v1568_v18 = vpop.xlane.xlu0 %1567 }
 0x427   : > { %v1575_v19 = vmul.f32 %v1568_v18, %v4795_v12  ;;  %v4242_v18 = vld [vmem:[%s4551_s13] ss:$0 sm:$0xff] }
 0x429   : > { %v1578_v20 = vsub.f32 %v4853_v0, %v1575_v19 }
 0x42b   : > { %v1581_v21 = vmul.f32 %v1578_v20, %v1578_v20 }
 0x42d   : > { %v1584_v22 = vsel %vm1257_vm0, %v1581_v21, 0.0 }
 0x42e   : > { %v1571_v24 = vpop.xlane.xlu1 %1570  ;;  %1585 = vadd.xlane.f32.xlu0 %v1584_v22 }
 0x42f   : > { %v1576_v23 = vmul.f32 %v1571_v24, %v4795_v12 }
 0x431   : > { %v1579_v25 = vsub.f32 %v4857_v9, %v1576_v23 }
 0x433   : > { %v1582_v26 = vmul.f32 %v1579_v25, %v1579_v25 }
 0x435   : > { %v1587_v27 = vsel %vm1257_vm0, %v1582_v26, 0.0 }
 0x436   : > { %1588 = vadd.xlane.f32.xlu1 %v1587_v27 }
 0x43a   : > { %v1574_v28 = vpop.xlane.xlu2 %1573 }
 0x43b   : > { %v1577_v29 = vmul.f32 %v1574_v28, %v4795_v12 }
 0x43d   : > { %v4873_v30 = vsub.f32 %v4861_v16, %v1577_v29 }
 0x43f   : > { %v1583_v31 = vmul.f32 %v4873_v30, %v4873_v30 }
 0x441   : > { %v1590_v32 = vsel %vm1264_vm1, %v1583_v31, 0.0 }
 0x442   : > { %1591 = vadd.xlane.f32.xlu2 %v1590_v32 }
 0x4a1   : > { %v1586_v37 = vpop.xlane.xlu0 %1585 }
 0x4a2   : > { %v1593_v38 = vmul.f32 %v1586_v37, %v4795_v12 }
 0x4a4   : > { %v1596_v39 = vadd.f32 1e-05, %v1593_v38 }
 0x4a6   : > { %4287 = vrsqrt.f32 %v1596_v39  ;;  %vm1605_vm8 = vweird.f32 %v1596_v39 }
 0x4a9   : > { %v1589_v40 = vpop.xlane.xlu1 %1588 }
 0x4aa   : > { %v1594_v41 = vmul.f32 %v1589_v40, %v4795_v12 }
 0x4ac   : > { %v4288_v42 = vpop.eup %4287  ;;  %v1597_v43 = vadd.f32 1e-05, %v1594_v41 }
 0x4ad   : > { %v1600_v44 = vmul.f32 %v4288_v42, %v1596_v39  ;;  %vm1606_vm7 = vweird.f32 %v4288_v42 }
 0x4ae   : > { %4289 = vrsqrt.f32 %v1597_v43  ;;  %vm1607_vm9 = vmor %vm1605_vm8, %vm1606_vm7  ;;  %vm1615_vm11 = vweird.f32 %v1597_v43 }
 0x4af   : > { %v1601_v45 = vmul.f32 %v4288_v42, %v1600_v44 }
 0x4b1   : > { %v1602_v46 = vmul.f32 0.5, %v1601_v45 }
 0x4b3   : > { %v1603_v47 = vsub.f32 1.5, %v1602_v46 }
 0x4b4   : > { %v4290_v48 = vpop.eup %4289 }
 0x4b5   : > { %v1604_v49 = vmul.f32 %v4288_v42, %v1603_v47  ;;  %v1610_v50 = vmul.f32 %v4290_v48, %v1597_v43  ;;  %v1592_v51 = vpop.xlane.xlu2 %1591  ;;  %vm1616_vm10 = vweird.f32 %v4290_v48 }
 0x4b6   : > { %v1595_v52 = vmul.f32 %v1592_v51, %v4795_v12  ;;  %vm1617_vm12 = vmor %vm1615_vm11, %vm1616_vm10 }
 0x4b7   : > { %v1608_v54 = vsel %vm1607_vm9, %v4288_v42, %v1604_v49  ;;  %v1611_v55 = vmul.f32 %v4290_v48, %v1610_v50 }
 0x4b8   : > { %v1629_v56 = vmul.f32 %v1608_v54, %v1578_v20  ;;  %v1598_v57 = vadd.f32 1e-05, %v1595_v52 }
 0x4b9   : > { %v1612_v59 = vmul.f32 0.5, %v1611_v55 }
 0x4ba   : > { %4291 = vrsqrt.f32 %v1598_v57  ;;  %v1636_v60 = vmul.f32 %v4240_v53, %v1629_v56  ;;  %vm1625_vm14 = vweird.f32 %v1598_v57 }
 0x4bb   : > { %v1613_v61 = vsub.f32 1.5, %v1612_v59 }
 0x4bc   : > { %v1643_v62 = vadd.f32 %v4241_v58, %v1636_v60 }
 0x4bd   : > { %v1614_v63 = vmul.f32 %v4290_v48, %v1613_v61 }
 0x4be   : > { %3979 = vmatmul.msk.f32.vlgmr.msrb.gmra.mxu2 %vm1257_vm0, %v1643_v62 }
 0x4bf   : > { %v1618_v1 = vsel %vm1617_vm12, %v4290_v48, %v1614_v63 }
 0x4c0   : > { %v4292_v2 = vpop.eup %4291  ;;  %v1630_v3 = vmul.f32 %v1618_v1, %v1579_v25 }
 0x4c1   : > { %v1620_v4 = vmul.f32 %v4292_v2, %v1598_v57  ;;  %vm1626_vm13 = vweird.f32 %v4292_v2 }
 0x4c2   : > { %v1637_v5 = vmul.f32 %v4240_v53, %v1630_v3  ;;  %vm1627_vm15 = vmor %vm1625_vm14, %vm1626_vm13 }
 0x4c3   : > { %v1621_v6 = vmul.f32 %v4292_v2, %v1620_v4 }
 0x4c4   : > { %v1644_v7 = vadd.f32 %v4241_v58, %v1637_v5 }
 0x4c5   : > { %v1622_v8 = vmul.f32 0.5, %v1621_v6 }
 0x4c6   : > { %3980 = vmatmul.msk.f32.gmra.mxu2 %vm1257_vm0, %v1644_v7 }
 0x4c7   : > { %v1623_v10 = vsub.f32 1.5, %v1622_v8 }
 0x4c9   : > { %v1624_v11 = vmul.f32 %v4292_v2, %v1623_v10 }
 0x4cb   : > { %v1628_v13 = vsel %vm1627_vm15, %v4292_v2, %v1624_v11  ;;  %v1689_v2 = vld [vmem:[%s4606_s6] sm:$0xff]  ;;  %vm2530_vm15 = vcmask 523264  }
 0x4cc   : > { %v1631_v14 = vmul.f32 %v1628_v13, %v4873_v30 }
 0x4ce   : > { %v1638_v15 = vmul.f32 %v4240_v53, %v1631_v14 }
 0x4d0   : > { %v1645_v17 = vadd.f32 %v4241_v58, %v1638_v15 }
 0x4d2   : > { %3981 = vmatmul.msk.f32.gmra.mxu2 %vm1257_vm0, %v1645_v17 }
 0x541   : > { %v1680_v19 = vpop.f32.mrf.mxu2 }
 0x542   : > { %v4892_v20 = vadd.f32 %v4242_v18, %v1680_v19 }
 0x544   : > { %1699 = vrot.lane.b32.xlu2 %v4892_v20, %s4522_s2  ;;  %v1693_v28 = vmul.f32 0.35355338, %v4892_v20 }
 0x549   : > { %v1683_v21 = vpop.f32.mrf.mxu2 }
 0x54a   : > { %v1684_v22 = vadd.f32 %v4242_v18, %v1683_v21 }
 0x54c   : > { %1701 = vrot.lane.b32.xlu1 %v1684_v22, %s4522_s2  ;;  %v1694_v29 = vmul.f32 0.35355338, %v1684_v22  ;;  %v4918_v37 = vpack.i.bf16 %v4892_v20, %v1684_v22 }
 0x555   : > { %v1686_v24 = vpop.f32.mrf.mxu2 }
 0x556   : > { %v4897_v23 = vadd.f32 %v4242_v18, %v1686_v24 }
 0x558   : > { %1703 = vrot.lane.b32.xlu0 %v4897_v23, %s4522_s2  ;;  %v4908_v30 = vmul.f32 0.35355338, %v4897_v23 }
 0x59e   : > { %v1700_v27 = vpop.permute.xlu2 %1699 }
 0x5be   : > { %v1702_v26 = vpop.permute.xlu1 %1701 }
 0x5ca   : > { %v1704_v25 = vpop.permute.xlu0 %1703 }
 0x5cb   : > { %3982 = vmatpush.xpose.msk.msrb.mxu3 %vm1705_vm2, %v1704_v25 }
 0x5cf   : > { %3983 = vmatpush.xpose.msk.msrb.mxu3 %vm1705_vm2, %v1702_v26 }
 0x5d3   : > { %3984 = vmatpush.xpose.msk.msrb.mxu3 %vm1705_vm2, %v1700_v27 }
 0x5d6   : > { %3985 = vmatmul.msk.f32.vlgmr.msrb.gmra.mxu3 %vm1705_vm2, %v1693_v28 }
 0x5de   : > { %3986 = vmatmul.msk.f32.gmra.mxu3 %vm1705_vm2, %v1694_v29 }
 0x5e6   : > { %3987 = vmatmul.msk.f32.gmra.mxu3 %vm1705_vm2, %v4908_v30 }
 0x659   : > { %v1738_v31 = vpop.f32.mrf.mxu3 }
 0x65a   : > { %v1748_v32 = vsel %vm1747_vm3, %v1738_v31, -inf }
 0x65b   : > { %1749 = vmax.xlane.f32.xlu0 %v1748_v32 }
 0x661   : > { %v1741_v33 = vpop.f32.mrf.mxu3 }
 0x662   : > { %v1751_v34 = vsel %vm1747_vm3, %v1741_v33, -inf }
 0x663   : > { %1752 = vmax.xlane.f32.xlu2 %v1751_v34 }
 0x669   : > { %v1744_v35 = vpop.f32.mrf.mxu3 }
 0x66a   : > { %v1755_v36 = vsel %vm1754_vm4, %v1744_v35, -inf }
 0x66b   : > { %1756 = vmax.xlane.f32.xlu1 %v1755_v36 }
 0x67b   : > { %1786 = vrot.lane.b32.xlu2 %v4897_v23, %s4523_s0 }
 0x683   : > { %1836 = vrot.lane.b32.xlu2 %v1684_v22, %s4524_s11 }
 0x684   : > { %4195 = vrot.lane.b32.xlu1 %v4918_v37, %s4523_s0 }
 0x68b   : > { %1828 = vrot.lane.b32.xlu2 %v1693_v28, %s4525_s15 }
 0x68c   : > { %1834 = vrot.lane.b32.xlu1 %v4892_v20, %s4524_s11 }
 0x693   : > { %2036 = vrot.lane.b32.xlu2 %v4897_v23, %s4526_s16 }
 0x694   : > { %1830 = vrot.lane.b32.xlu1 %v1694_v29, %s4525_s15 }
 0x69b   : > { %2032 = vrot.lane.b32.xlu2 %v4892_v20, %s4526_s16 }
 0x69c   : > { %2034 = vrot.lane.b32.xlu1 %v1684_v22, %s4526_s16 }
 0x6a3   : > { %2200 = vrot.lane.b32.xlu2 %v1684_v22, %s4527_s18 }
 0x6a4   : > { %2026 = vrot.lane.b32.xlu1 %v1693_v28, %s5485_s22 }
 0x6ab   : > { %2192 = vrot.lane.b32.xlu2 %v1693_v28, %s5483_s23 }
 0x6ac   : > { %2028 = vrot.lane.b32.xlu1 %v1694_v29, %s5485_s22 }
 0x6b3   : > { %2196 = vrot.lane.b32.xlu2 %v4908_v30, %s5483_s23 }
 0x6b4   : > { %2194 = vrot.lane.b32.xlu1 %v1694_v29, %s5483_s23  ;;  %s5521_s23 = sld [smem:[#allocation20_spill]] }
 0x6ce   : > { %v1750_v38 = vpop.xlane.xlu0 %1749 }
 0x6cf   : > { %v1758_v39 = vsub.f32 %v1738_v31, %v1750_v38 }
 0x6d1   : > { %v1761_v40 = vmul.f32 1.442695, %v1758_v39 }
 0x6d3   : > { %4293 = vpow2.f32 %v1761_v40 }
 0x6d6   : > { %v1753_v41 = vpop.xlane.xlu2 %1752 }
 0x6d7   : > { %v1759_v42 = vsub.f32 %v1741_v33, %v1753_v41 }
 0x6d9   : > { %v4294_v43 = vpop.eup %4293  ;;  %v1763_v44 = vmul.f32 1.442695, %v1759_v42 }
 0x6da   : > { %v1767_v45 = vsel %vm1747_vm3, %v4294_v43, 0.0 }
 0x6db   : > { %4295 = vpow2.f32 %v1763_v44  ;;  %1768 = vadd.xlane.f32.xlu0 %v1767_v45 }
 0x6de   : > { %v1787_v46 = vpop.permute.xlu2 %1786  ;;  %v1757_v47 = vpop.xlane.xlu1 %1756 }
 0x6df   : > { %v1760_v48 = vsub.f32 %v1744_v35, %v1757_v47  ;;  %3988 = vmatpush.msk.msrb.mxu0 %vm1799_vm5, %v1787_v46 }
 0x6e1   : > { %v4296_v49 = vpop.eup %4295  ;;  %v1765_v50 = vmul.f32 1.442695, %v1760_v48 }
 0x6e2   : > { %v1770_v51 = vsel %vm1747_vm3, %v4296_v49, 0.0 }
 0x6e3   : > { %4297 = vpow2.f32 %v1765_v50  ;;  %1771 = vadd.xlane.f32.xlu0 %v1770_v51 }
 0x6e6   : > { %v1837_v62 = vpop.permute.xlu2 %1836 }
 0x6e9   : > { %v4298_v52 = vpop.eup %4297 }
 0x6ea   : > { %v1773_v53 = vsel %vm1754_vm4, %v4298_v52, 0.0 }
 0x6eb   : > { %1774 = vadd.xlane.f32.xlu0 %v1773_v53 }
 0x6ee   : > { %v1829_v5 = vpop.permute.xlu2 %1828 }
 0x6f6   : > { %v4196_v54 = vpop.permute.xlu1 %4195  ;;  %v2037_v7 = vpop.permute.xlu2 %2036 }
 0x6f7   : > { %v4197_v55 = vunpack.i.l.bf16 %v4196_v54  ;;  %v4198_v56 = vunpack.i.h.bf16 %v4196_v54 }
 0x6f9   : > { %1816 = vmatpush.msrb.mxu0 %v4197_v55 }
 0x6fb   : > { %1817 = vmatpush.msrb.mxu0 %v4198_v56 }
 0x6fd   : > { %2015 = vmatpush.msra.mxu0 %v1689_v2 }
 0x6fe   : > { %v1835_v6 = vpop.permute.xlu1 %1834  ;;  %v2033_v13 = vpop.permute.xlu2 %2032 }
 0x6ff   : > { %1838 = vrot.lane.b32.xlu0 %v4897_v23, %s4524_s11 }
 0x706   : > { %v1831_v10 = vpop.permute.xlu1 %1830  ;;  %v2201_v17 = vpop.permute.xlu2 %2200 }
 0x707   : > { %1832 = vrot.lane.b32.xlu0 %v4908_v30, %s4525_s15 }
 0x70e   : > { %v2035_v14 = vpop.permute.xlu1 %2034  ;;  %v2193_v26 = vpop.permute.xlu2 %2192 }
 0x70f   : > { %2202 = vrot.lane.b32.xlu0 %v4897_v23, %s4527_s18 }
 0x716   : > { %v2027_v19 = vpop.permute.xlu1 %2026 }
 0x717   : > { %2198 = vrot.lane.b32.xlu0 %v4892_v20, %s4527_s18 }
 0x71e   : > { %v2029_v20 = vpop.permute.xlu1 %2028 }
 0x71f   : > { %2030 = vrot.lane.b32.xlu0 %v4908_v30, %s5485_s22  ;;  %v2197_v30 = vpop.permute.xlu2 %2196  ;;  %s5522_s22 = sld [smem:[#allocation19_spill]] }
 0x726   : > { %v2195_v27 = vpop.permute.xlu1 %2194 }
 0x74e   : > { %v1769_v57 = vpop.xlane.xlu0 %1768 }
 0x74f   : > { %4299 = vrcp.f32 %v1769_v57 }
 0x755   : > { %v4300_v58 = vpop.eup %4299 }
 0x756   : > { %v1772_v59 = vpop.xlane.xlu0 %1771  ;;  %v1779_v60 = vmul.f32 %v4300_v58, %v4294_v43 }
 0x757   : > { %4301 = vrcp.f32 %v1772_v59 }
 0x758   : > { %3989 = vmatmul.msk.f32.vlgmr.msrb.gmra.mxu0 %vm1747_vm3, %v1779_v60 }
 0x75d   : > { %v4302_v61 = vpop.eup %4301 }
 0x75e   : > { %v1775_v63 = vpop.xlane.xlu0 %1774  ;;  %v1780_v1 = vmul.f32 %v4302_v61, %v4296_v49 }
 0x75f   : > { %4303 = vrcp.f32 %v1775_v63 }
 0x760   : > { %3990 = vmatmul.msk.f32.gmra.mxu0 %vm1747_vm3, %v1780_v1 }
 0x765   : > { %v4304_v3 = vpop.eup %4303 }
 0x766   : > { %v1781_v4 = vmul.f32 %v4304_v3, %v4298_v52 }
 0x768   : > { %3991 = vmatmul.msk.f32.gmra.mxu0 %vm1747_vm3, %v1781_v4 }
 0x771   : > { %v1839_v8 = vpop.permute.xlu0 %1838 }
 0x772   : > { %3992 = vmatpush.xpose.msk.msrb.mxu1 %vm1705_vm2, %v1839_v8 }
 0x776   : > { %3993 = vmatpush.xpose.msk.msrb.mxu1 %vm1705_vm2, %v1837_v62 }
 0x779   : > { %v1833_v11 = vpop.permute.xlu0 %1832 }
 0x77a   : > { %3994 = vmatpush.xpose.msk.msrb.mxu1 %vm1705_vm2, %v1835_v6 }
 0x77d   : > { %3995 = vmatmul.msk.f32.vlgmr.msrb.gmra.mxu1 %vm1705_vm2, %v1829_v5 }
 0x77e   : > { %4008 = vmatpush.xpose.msk.msra.mxu1 %vm1705_vm2, %v2037_v7 }
 0x781   : > { %v2203_v15 = vpop.permute.xlu0 %2202 }
 0x782   : > { %4009 = vmatpush.xpose.msk.msra.mxu1 %vm1705_vm2, %v2035_v14  ;;  %4021 = vmatpush.xpose.msk.msrb.mxu0 %vm1705_vm2, %v2203_v15 }
 0x785   : > { %3996 = vmatmul.msk.f32.gmra.mxu1 %vm1705_vm2, %v1831_v10 }
 0x786   : > { %4010 = vmatpush.xpose.msk.msra.mxu1 %vm1705_vm2, %v2033_v13  ;;  %4022 = vmatpush.xpose.msk.msrb.mxu0 %vm1705_vm2, %v2201_v17 }
 0x789   : > { %v2199_v18 = vpop.permute.xlu0 %2198 }
 0x78a   : > { %4023 = vmatpush.xpose.msk.msrb.mxu0 %vm1705_vm2, %v2199_v18 }
 0x78d   : > { %3997 = vmatmul.msk.f32.gmra.mxu1 %vm1705_vm2, %v1833_v11 }
 0x791   : > { %v2031_v21 = vpop.permute.xlu0 %2030 }
 0x795   : > { %4011 = vmatmul.msk.f32.vlgmr.msra.gmra.mxu1 %vm1705_vm2, %v2027_v19 }
 0x79d   : > { %4012 = vmatmul.msk.f32.gmra.mxu1 %vm1705_vm2, %v2029_v20 }
 0x7a5   : > { %4013 = vmatmul.msk.f32.gmra.mxu1 %vm1705_vm2, %v2031_v21 }
 0x7d5   : > { %v1819_v22 = vpop.f32.mrf.mxu0 }
 0x7d6   : > { %4005 = vmatmul.msk.f32.vlgmr.msra.gmra.mxu0 %vm1705_vm2, %v1819_v22 }
 0x7dd   : > { %v1822_v24 = vpop.f32.mrf.mxu0 }
 0x7de   : > { %4006 = vmatmul.msk.f32.gmra.mxu0 %vm1705_vm2, %v1822_v24 }
 0x7e5   : > { %v1825_v25 = vpop.f32.mrf.mxu0 }
 0x7e6   : > { %4007 = vmatmul.msk.f32.gmra.mxu0 %vm1705_vm2, %v1825_v25 }
 0x7ee   : > { %4024 = vmatmul.msk.f32.vlgmr.msrb.gmra.mxu0 %vm1705_vm2, %v2193_v26 }
 0x7f6   : > { %4025 = vmatmul.msk.f32.gmra.mxu0 %vm1705_vm2, %v2195_v27 }
 0x7fa   : > { %v1869_v28 = vpop.f32.mrf.mxu1 }
 0x7fb   : > { %v1878_v29 = vsel %vm1747_vm3, %v1869_v28, -inf }
 0x7fc   : > { %1879 = vmax.xlane.f32.xlu0 %v1878_v29 }
 0x7fe   : > { %4026 = vmatmul.msk.f32.gmra.mxu0 %vm1705_vm2, %v2197_v30 }
 0x802   : > { %v1872_v31 = vpop.f32.mrf.mxu1 }
 0x803   : > { %v1881_v32 = vsel %vm1747_vm3, %v1872_v31, -inf }
 0x804   : > { %1882 = vmax.xlane.f32.xlu1 %v1881_v32 }
 0x80a   : > { %v1875_v33 = vpop.f32.mrf.mxu1 }
 0x80b   : > { %v1884_v34 = vsel %vm1754_vm4, %v1875_v33, -inf }
 0x80c   : > { %1885 = vmax.xlane.f32.xlu2 %v1884_v34 }
 0x812   : > { %v2067_v35 = vpop.f32.mrf.mxu1 }
 0x813   : > { %v2076_v36 = vsel %vm1747_vm3, %v2067_v35, -inf }
 0x814   : > { %2077 = vmax.xlane.f32.xlu0 %v2076_v36 }
 0x81a   : > { %v2070_v38 = vpop.f32.mrf.mxu1 }
 0x81b   : > { %v2079_v39 = vsel %vm1747_vm3, %v2070_v38, -inf }
 0x81c   : > { %2080 = vmax.xlane.f32.xlu1 %v2079_v39 }
 0x822   : > { %v4983_v40 = vpop.f32.mrf.mxu1 }
 0x823   : > { %v2082_v41 = vsel %vm1754_vm4, %v4983_v40, -inf }
 0x824   : > { %4200 = vrot.lane.b32.xlu2 %v4918_v37, %s5481_s26  ;;  %2083 = vmax.xlane.f32.xlu0 %v2082_v41 }
 0x835   : > { %1915 = vrot.lane.b32.xlu1 %v4897_v23, %s5481_s26  ;;  %s5516_s26 = sld [smem:[#allocation10_spill]] }
 0x853   : > { %v4991_v42 = vpop.f32.mrf.mxu0 }
 0x85b   : > { %v4993_v43 = vpop.f32.mrf.mxu0 }
 0x863   : > { %v4995_v44 = vpop.f32.mrf.mxu0 }
 0x86b   : > { %v2233_v45 = vpop.f32.mrf.mxu0 }
 0x86c   : > { %v2242_v46 = vsel %vm1747_vm3, %v2233_v45, -inf }
 0x86d   : > { %2243 = vmax.xlane.f32.xlu2 %v2242_v46 }
 0x86f   : > { %v1880_v47 = vpop.xlane.xlu0 %1879 }
 0x870   : > { %v1887_v48 = vsub.f32 %v1869_v28, %v1880_v47 }
 0x872   : > { %v1890_v49 = vmul.f32 1.442695, %v1887_v48 }
 0x873   : > { %v4998_v50 = vpop.f32.mrf.mxu0 }
 0x874   : > { %4305 = vpow2.f32 %v1890_v49  ;;  %v2245_v51 = vsel %vm1747_vm3, %v4998_v50, -inf }
 0x875   : > { %2246 = vmax.xlane.f32.xlu1 %v2245_v51 }
 0x877   : > { %v1883_v52 = vpop.xlane.xlu1 %1882 }
 0x878   : > { %v1888_v53 = vsub.f32 %v1872_v31, %v1883_v52 }
 0x87a   : > { %v5002_v54 = vpop.eup %4305  ;;  %v1892_v55 = vmul.f32 1.442695, %v1888_v53 }
 0x87b   : > { %v1896_v56 = vsel %vm1747_vm3, %v5002_v54, 0.0  ;;  %v5027_v17 = vpop.f32.mrf.mxu0 }
 0x87c   : > { %4307 = vpow2.f32 %v1892_v55  ;;  %1897 = vadd.xlane.f32.xlu0 %v1896_v56  ;;  %v2248_v19 = vsel %vm1754_vm4, %v5027_v17, -inf }
 0x87f   : > { %v1886_v57 = vpop.xlane.xlu2 %1885 }
 0x880   : > { %v1889_v58 = vsub.f32 %v1875_v33, %v1886_v57 }
 0x882   : > { %v5006_v59 = vpop.eup %4307  ;;  %v1894_v60 = vmul.f32 1.442695, %v1889_v58 }
 0x883   : > { %v1899_v61 = vsel %vm1747_vm3, %v5006_v59, 0.0 }
 0x884   : > { %4309 = vpow2.f32 %v1894_v60  ;;  %1900 = vadd.xlane.f32.xlu0 %v1899_v61 }
 0x885   : > { %4205 = vrot.lane.b32.xlu2 %v4918_v37, %s5479_s1 }
 0x887   : > { %v2078_v62 = vpop.xlane.xlu0 %2077  ;;  %v4201_v13 = vpop.permute.xlu2 %4200 }
 0x888   : > { %v2085_v63 = vsub.f32 %v2067_v35, %v2078_v62  ;;  %v4202_v15 = vunpack.i.l.bf16 %v4201_v13  ;;  %v4203_v18 = vunpack.i.h.bf16 %v4201_v13 }
 0x88a   : > { %v5012_v1 = vpop.eup %4309  ;;  %v2088_v2 = vmul.f32 1.442695, %v2085_v63 }
 0x88b   : > { %v1902_v3 = vsel %vm1754_vm4, %v5012_v1, 0.0 }
 0x88c   : > { %4311 = vpow2.f32 %v2088_v2  ;;  %1903 = vadd.xlane.f32.xlu0 %v1902_v3  ;;  %v1690_v3 = vld [vmem:[%s4606_s6 + $0x8] sm:$0xff] }
 0x88d   : > { %1980 = vmatpush.msra.mxu3 %v1690_v3 }
 0x88e   : > { %2113 = vrot.lane.b32.xlu1 %v4897_v23, %s5479_s1  ;;  %s5515_s1 = sld [smem:[#allocation11_spill]] }
 0x88f   : > { %v2081_v4 = vpop.xlane.xlu1 %2080 }
 0x890   : > { %v2086_v5 = vsub.f32 %v2070_v38, %v2081_v4 }
 0x892   : > { %v5018_v6 = vpop.eup %4311  ;;  %v2090_v7 = vmul.f32 1.442695, %v2086_v5 }
 0x893   : > { %v2094_v8 = vsel %vm1747_vm3, %v5018_v6, 0.0 }
 0x894   : > { %4313 = vpow2.f32 %v2090_v7  ;;  %2095 = vadd.xlane.f32.xlu0 %v2094_v8 }
 0x897   : > { %v2084_v20 = vpop.xlane.xlu0 %2083 }
 0x898   : > { %v2087_v21 = vsub.f32 %v4983_v40, %v2084_v20 }
 0x89a   : > { %v5022_v10 = vpop.eup %4313  ;;  %v2092_v22 = vmul.f32 1.442695, %v2087_v21 }
 0x89b   : > { %v2097_v11 = vsel %vm1747_vm3, %v5022_v10, 0.0 }
 0x89c   : > { %2098 = vadd.xlane.f32.xlu0 %v2097_v11  ;;  %4315 = vpow2.f32 %v2092_v22 }
 0x8a2   : > { %v5037_v29 = vpop.eup %4315 }
 0x8a3   : > { %v2100_v31 = vsel %vm1754_vm4, %v5037_v29, 0.0 }
 0x8a7   : > { %v1916_v14 = vpop.permute.xlu1 %1915 }
 0x8a8   : > { %3998 = vmatpush.msk.msra.mxu2 %vm1799_vm5, %v1916_v14 }
 0x8aa   : > { %1944 = vmatpush.msra.mxu2 %v4202_v15  ;;  %v1691_v15 = vld [vmem:[%s4606_s6 + $0x10] sm:$0xff] }
 0x8ab   : > { %2178 = vmatpush.msrb.mxu3 %v1691_v15 }
 0x8ac   : > { %1945 = vmatpush.msra.mxu2 %v4203_v18 }
 0x8ae   : > { %2249 = vmax.xlane.f32.xlu2 %v2248_v19 }
 0x8b0   : > { %4210 = vrot.lane.b32.xlu0 %v4918_v37, %s5477_s28 }
 0x8c6   : > { %2279 = vrot.lane.b32.xlu2 %v4897_v23, %s5477_s28  ;;  %s5513_s28 = sld [smem:[#allocation12_spill]] }
 0x8e0   : > { %v2244_v24 = vpop.xlane.xlu2 %2243 }
 0x8e1   : > { %v2251_v25 = vsub.f32 %v2233_v45, %v2244_v24 }
 0x8e3   : > { %v2254_v26 = vmul.f32 1.442695, %v2251_v25 }
 0x8e5   : > { %4317 = vpow2.f32 %v2254_v26  ;;  %v1692_v26 = vld [vmem:[%s4606_s6 + $0x18] sm:$0xff] }
 0x8e8   : > { %v2247_v27 = vpop.xlane.xlu1 %2246  ;;  %v4206_v40 = vpop.permute.xlu2 %4205 }
 0x8e9   : > { %v2252_v28 = vsub.f32 %v4998_v50, %v2247_v27  ;;  %v4207_v47 = vunpack.i.l.bf16 %v4206_v40  ;;  %v4208_v48 = vunpack.i.h.bf16 %v4206_v40 }
 0x8eb   : > { %v5039_v30 = vpop.eup %4317  ;;  %v2256_v37 = vmul.f32 1.442695, %v2252_v28 }
 0x8ec   : > { %v2260_v23 = vsel %vm1747_vm3, %v5039_v30, 0.0 }
 0x8ed   : > { %4319 = vpow2.f32 %v2256_v37  ;;  %2261 = vadd.xlane.f32.xlu1 %v2260_v23 }
 0x8ef   : > { %v1898_v32 = vpop.xlane.xlu0 %1897  ;;  %2101 = vadd.xlane.f32.xlu2 %v2100_v31 }
 0x8f0   : > { %4321 = vrcp.f32 %v1898_v32 }
 0x8f3   : > { %v4320_v33 = vpop.eup %4319 }
 0x8f4   : > { %v2263_v34 = vsel %vm1747_vm3, %v4320_v33, 0.0 }
 0x8f5   : > { %2264 = vadd.xlane.f32.xlu0 %v2263_v34 }
 0x8f6   : > { %v4322_v35 = vpop.eup %4321 }
 0x8f7   : > { %v1908_v36 = vmul.f32 %v4322_v35, %v5002_v54  ;;  %v1901_v38 = vpop.xlane.xlu0 %1900 }
 0x8f8   : > { %4323 = vrcp.f32 %v1901_v38  ;;  %v4243_v38 = vld [vmem:[%s5513_s28] ss:$0 sm:$0xff]  ;;  %s5514_s28 = sld [smem:[#allocation7_spill]] }
 0x8f9   : > { %3999 = vmatmul.msk.f32.vlgmr.msra.gmra.mxu2 %vm1747_vm3, %v1908_v36 }
 0x8fe   : > { %v4324_v39 = vpop.eup %4323 }
 0x8ff   : > { %v1904_v41 = vpop.xlane.xlu0 %1903  ;;  %v1909_v45 = vmul.f32 %v4324_v39, %v5006_v59 }
 0x900   : > { %4325 = vrcp.f32 %v1904_v41  ;;  %v2114_v46 = vpop.permute.xlu1 %2113 }
 0x901   : > { %4000 = vmatmul.msk.f32.gmra.mxu2 %vm1747_vm3, %v1909_v45 }
 0x902   : > { %4014 = vmatpush.msk.msrb.mxu2 %vm1799_vm5, %v2114_v46 }
 0x904   : > { %2142 = vmatpush.msrb.mxu2 %v4207_v47 }
 0x906   : > { %v4326_v49 = vpop.eup %4325  ;;  %2143 = vmatpush.msrb.mxu2 %v4208_v48 }
 0x907   : > { %v2096_v50 = vpop.xlane.xlu0 %2095  ;;  %v1910_v51 = vmul.f32 %v4326_v49, %v5012_v1 }
 0x908   : > { %4327 = vrcp.f32 %v2096_v50  ;;  %2344 = vmatpush.msra.mxu2 %v1692_v26 }
 0x909   : > { %4001 = vmatmul.msk.f32.gmra.mxu2 %vm1747_vm3, %v1910_v51 }
 0x90e   : > { %v4328_v52 = vpop.eup %4327 }
 0x90f   : > { %v2106_v53 = vmul.f32 %v4328_v52, %v5018_v6  ;;  %v2099_v54 = vpop.xlane.xlu0 %2098 }
 0x910   : > { %4329 = vrcp.f32 %v2099_v54 }
 0x911   : > { %4015 = vmatmul.msk.f32.vlgmr.msrb.gmra.mxu2 %vm1747_vm3, %v2106_v53 }
 0x916   : > { %v4330_v55 = vpop.eup %4329 }
 0x917   : > { %v2107_v56 = vmul.f32 %v4330_v55, %v5022_v10 }
 0x919   : > { %4016 = vmatmul.msk.f32.gmra.mxu2 %vm1747_vm3, %v2107_v56 }
 0x921   : > { %v2250_v57 = vpop.xlane.xlu2 %2249 }
 0x922   : > { %v2253_v58 = vsub.f32 %v5027_v17, %v2250_v57  ;;  %v4211_v60 = vpop.permute.xlu0 %4210 }
 0x923   : > { %v4212_v62 = vunpack.i.l.bf16 %v4211_v60  ;;  %v4213_v1 = vunpack.i.h.bf16 %v4211_v60 }
 0x924   : > { %v2258_v59 = vmul.f32 1.442695, %v2253_v58 }
 0x926   : > { %4331 = vpow2.f32 %v2258_v59 }
 0x929   : > { %v2280_v61 = vpop.permute.xlu2 %2279 }
 0x92a   : > { %4027 = vmatpush.msk.msrb.mxu1 %vm1799_vm5, %v2280_v61 }
 0x92c   : > { %v4332_v63 = vpop.eup %4331  ;;  %2308 = vmatpush.msrb.mxu1 %v4212_v62 }
 0x92d   : > { %v2266_v2 = vsel %vm1754_vm4, %v4332_v63, 0.0 }
 0x92e   : > { %2267 = vadd.xlane.f32.xlu1 %v2266_v2  ;;  %2309 = vmatpush.msrb.mxu1 %v4213_v1 }
 0x960   : > { %v2262_v4 = vpop.xlane.xlu1 %2261 }
 0x961   : > { %4333 = vrcp.f32 %v2262_v4 }
 0x962   : > { %v2102_v5 = vpop.xlane.xlu2 %2101 }
 0x963   : > { %4335 = vrcp.f32 %v2102_v5 }
 0x967   : > { %v4334_v6 = vpop.eup %4333 }
 0x968   : > { %v2272_v7 = vmul.f32 %v4334_v6, %v5039_v30  ;;  %v2265_v8 = vpop.xlane.xlu0 %2264 }
 0x969   : > { %v4336_v10 = vpop.eup %4335  ;;  %4337 = vrcp.f32 %v2265_v8  ;;  %v2450_v8 = vld [vmem:[%s5514_s28 + $0x10] sm:$0xff] }
 0x96a   : > { %4028 = vmatmul.msk.f32.vlgmr.msrb.gmra.mxu1 %vm1747_vm3, %v2272_v7  ;;  %v2108_v11 = vmul.f32 %v4336_v10, %v5037_v29  ;;  %v2451_v7 = vld [vmem:[%s5514_s28 + $0x18] sm:$0xff]  ;;  %v2449_v10 = vld [vmem:[%s5514_s28 + $0x8] sm:$0xff] }
 0x96c   : > { %4017 = vmatmul.msk.f32.gmra.mxu2 %vm1747_vm3, %v2108_v11  ;;  %v2448_v11 = vld [vmem:[%s5514_s28] sm:$0xff] }
 0x96f   : > { %v4338_v13 = vpop.eup %4337 }
 0x970   : > { %v2273_v14 = vmul.f32 %v4338_v13, %v4320_v33 }
 0x972   : > { %4029 = vmatmul.msk.f32.gmra.mxu1 %vm1747_vm3, %v2273_v14 }
 0x97c   : > { %v1947_v17 = vpop.f32.mrf.mxu2 }
 0x97d   : > { %4002 = vmatmul.msk.f32.vlgmr.msra.gmra.mxu3 %vm1705_vm2, %v1947_v17 }
 0x97e   : > { %2477 = vmatpush.msra.mxu3 %v2451_v7 }
 0x980   : > { %2478 = vmatpush.msra.mxu3 %v2450_v8 }
 0x982   : > { %2479 = vmatpush.msra.mxu3 %v2449_v10 }
 0x984   : > { %v1950_v18 = vpop.f32.mrf.mxu2  ;;  %2480 = vmatpush.msra.mxu3 %v2448_v11 }
 0x985   : > { %4003 = vmatmul.msk.f32.gmra.mxu3 %vm1705_vm2, %v1950_v18 }
 0x98c   : > { %v1953_v19 = vpop.f32.mrf.mxu2 }
 0x98d   : > { %4004 = vmatmul.msk.f32.gmra.mxu3 %vm1705_vm2, %v1953_v19 }
 0x994   : > { %v2145_v20 = vpop.f32.mrf.mxu2 }
 0x995   : > { %4018 = vmatmul.msk.f32.vlgmr.msrb.gmra.mxu3 %vm1705_vm2, %v2145_v20 }
 0x99c   : > { %v2148_v21 = vpop.f32.mrf.mxu2 }
 0x99d   : > { %4019 = vmatmul.msk.f32.gmra.mxu3 %vm1705_vm2, %v2148_v21 }
 0x9a1   : > { %v2268_v22 = vpop.xlane.xlu1 %2267 }
 0x9a2   : > { %4339 = vrcp.f32 %v2268_v22 }
 0x9a8   : > { %v4340_v24 = vpop.eup %4339 }
 0x9a9   : > { %v2274_v25 = vmul.f32 %v4340_v24, %v4332_v63 }
 0x9ab   : > { %4030 = vmatmul.msk.f32.gmra.mxu1 %vm1747_vm3, %v2274_v25 }
 0x9e7   : > { %v2311_v27 = vpop.f32.mrf.mxu1 }
 0x9e8   : > { %4031 = vmatmul.msk.f32.vlgmr.msra.gmra.mxu2 %vm1705_vm2, %v2311_v27 }
 0x9ef   : > { %v2151_v28 = vpop.f32.mrf.mxu2  ;;  %v2314_v29 = vpop.f32.mrf.mxu1 }
 0x9f0   : > { %4020 = vmatmul.msk.f32.gmra.mxu3 %vm1705_vm2, %v2151_v28  ;;  %4032 = vmatmul.msk.f32.gmra.mxu2 %vm1705_vm2, %v2314_v29  ;;  %v4244_v29 = vld [vmem:[%s5515_s1] ss:$0 sm:$0xff]  ;;  %s5518_s1 = sld [smem:[#allocation6_spill]] }
 0xa00   : > { %v1982_v37 = vpop.f32.mrf.mxu3 }
 0xa01   : > { %v2018_v33 = vadd.f32 %v4991_v42, %v1982_v37 }
 0xa08   : > { %v1985_v23 = vpop.f32.mrf.mxu3 }
 0xa09   : > { %v2021_v41 = vadd.f32 %v4993_v43, %v1985_v23 }
 0xa10   : > { %v1988_v31 = vpop.f32.mrf.mxu3 }
 0xa11   : > { %v2024_v43 = vadd.f32 %v4995_v44, %v1988_v31  ;;  %v4245_v31 = vld [vmem:[%s5516_s26] ss:$0 sm:$0xff]  ;;  %s5517_s26 = sld [smem:[#allocation9_spill]] }
 0xa18   : > { %v2180_v32 = vpop.f32.mrf.mxu3 }
 0xa19   : > { %v2189_v34 = vadd.f32 %v2180_v32, %v2018_v33 }
 0xa20   : > { %v2183_v40 = vpop.f32.mrf.mxu3 }
 0xa21   : > { %v2190_v46 = vadd.f32 %v2183_v40, %v2021_v41 }
 0xa28   : > { %v2317_v30 = vpop.f32.mrf.mxu1 }
 0xa29   : > { %4033 = vmatmul.msk.f32.gmra.mxu2 %vm1705_vm2, %v2317_v30 }
 0xa6b   : > { %v2346_v35 = vpop.f32.mrf.mxu2 }
 0xa6c   : > { %v2355_v36 = vadd.f32 %v2346_v35, %v2189_v34 }
 0xa6e   : > { %v2358_v39 = vadd.f32 %v2355_v36, %v4853_v0 }
 0xa70   : > { %v5082_v45 = vadd.f32 %v4243_v38, %v2358_v39 }
 0xa72   : > { %v2368_v47 = vsel %vm1257_vm0, %v5082_v45, 0.0 }
 0xa73   : > { %v2349_v48 = vpop.f32.mrf.mxu2  ;;  %2369 = vadd.xlane.f32.xlu1 %v2368_v47  ;;  %v2186_v0 = vpop.f32.mrf.mxu3 }
 0xa74   : > { %v2356_v49 = vadd.f32 %v2349_v48, %v2190_v46  ;;  %v2191_v52 = vadd.f32 %v2186_v0, %v2024_v43 }
 0xa76   : > { %v2359_v42 = vadd.f32 %v2356_v49, %v4857_v9 }
 0xa78   : > { %v5087_v50 = vadd.f32 %v4243_v38, %v2359_v42 }
 0xa7a   : > { %v2371_v51 = vsel %vm1257_vm0, %v5087_v50, 0.0 }
 0xa7b   : > { %2372 = vadd.xlane.f32.xlu2 %v2371_v51 }
 0xaac   : > { %v2352_v53 = vpop.f32.mrf.mxu2 }
 0xaad   : > { %v2357_v54 = vadd.f32 %v2352_v53, %v2191_v52 }
 0xaaf   : > { %v2360_v55 = vadd.f32 %v2357_v54, %v4861_v16 }
 0xab1   : > { %v5093_v56 = vadd.f32 %v4243_v38, %v2360_v55 }
 0xab3   : > { %v2374_v57 = vsel %vm1264_vm1, %v5093_v56, 0.0 }
 0xab4   : > { %2375 = vadd.xlane.f32.xlu1 %v2374_v57 }
 0xae6   : > { %v2370_v9 = vpop.xlane.xlu1 %2369 }
 0xae7   : > { %v2377_v58 = vmul.f32 %v2370_v9, %v4795_v12  ;;  %v2525_v9 = vld [vmem:[%s5517_s26 + $0x38] sm:$0xff] }
 0xae8   : > { %2548 = vmatpush.msra.mxu0 %v2525_v9 }
 0xae9   : > { %v2380_v59 = vsub.f32 %v5082_v45, %v2377_v58  ;;  %v2524_v58 = vld [vmem:[%s5517_s26 + $0x30] sm:$0xff] }
 0xaea   : > { %2549 = vmatpush.msra.mxu0 %v2524_v58 }
 0xaeb   : > { %v2383_v60 = vmul.f32 %v2380_v59, %v2380_v59 }
 0xaed   : > { %v2386_v44 = vsel %vm1257_vm0, %v2383_v60, 0.0  ;;  %v2522_v60 = vld [vmem:[%s5517_s26 + $0x20] sm:$0xff] }
 0xaee   : > { %v2373_v61 = vpop.xlane.xlu2 %2372  ;;  %2387 = vadd.xlane.f32.xlu2 %v2386_v44  ;;  %v2521_v44 = vld [vmem:[%s5517_s26 + $0x18] sm:$0xff] }
 0xaef   : > { %v2378_v16 = vmul.f32 %v2373_v61, %v4795_v12  ;;  %v2520_v61 = vld [vmem:[%s5517_s26 + $0x10] sm:$0xff] }
 0xaf1   : > { %v2381_v62 = vsub.f32 %v5087_v50, %v2378_v16  ;;  %v2519_v16 = vld [vmem:[%s5517_s26 + $0x8] sm:$0xff] }
 0xaf3   : > { %v2384_v63 = vmul.f32 %v2381_v62, %v2381_v62 }
 0xaf5   : > { %v2389_v1 = vsel %vm1257_vm0, %v2384_v63, 0.0  ;;  %v4246_v63 = vld [vmem:[%s5518_s1] ss:$0 sm:$0xff]  ;;  %s5519_s1 = sld [smem:[#allocation8_spill]] }
 0xaf6   : > { %2390 = vadd.xlane.f32.xlu1 %v2389_v1 }
 0xb27   : > { %v2376_v2 = vpop.xlane.xlu1 %2375 }
 0xb28   : > { %v2379_v3 = vmul.f32 %v2376_v2, %v4795_v12 }
 0xb2a   : > { %v5105_v4 = vsub.f32 %v5093_v56, %v2379_v3 }
 0xb2c   : > { %v2385_v5 = vmul.f32 %v5105_v4, %v5105_v4 }
 0xb2e   : > { %v2392_v6 = vsel %vm1264_vm1, %v2385_v5, 0.0 }
 0xb2f   : > { %2393 = vadd.xlane.f32.xlu0 %v2392_v6 }
 0xb61   : > { %v2388_v13 = vpop.xlane.xlu2 %2387 }
 0xb62   : > { %v2395_v14 = vmul.f32 %v2388_v13, %v4795_v12 }
 0xb64   : > { %v2398_v15 = vadd.f32 1e-05, %v2395_v14 }
 0xb66   : > { %4341 = vrsqrt.f32 %v2398_v15  ;;  %vm2407_vm7 = vweird.f32 %v2398_v15 }
 0xb69   : > { %v2391_v17 = vpop.xlane.xlu1 %2390 }
 0xb6a   : > { %v2396_v18 = vmul.f32 %v2391_v17, %v4795_v12 }
 0xb6c   : > { %v4342_v19 = vpop.eup %4341  ;;  %v2399_v20 = vadd.f32 1e-05, %v2396_v18 }
 0xb6d   : > { %v2402_v21 = vmul.f32 %v4342_v19, %v2398_v15  ;;  %vm2408_vm6 = vweird.f32 %v4342_v19 }
 0xb6e   : > { %4343 = vrsqrt.f32 %v2399_v20  ;;  %vm2409_vm8 = vmor %vm2407_vm7, %vm2408_vm6  ;;  %vm2417_vm10 = vweird.f32 %v2399_v20 }
 0xb6f   : > { %v2403_v22 = vmul.f32 %v4342_v19, %v2402_v21 }
 0xb71   : > { %v2404_v24 = vmul.f32 0.5, %v2403_v22 }
 0xb73   : > { %v2405_v25 = vsub.f32 1.5, %v2404_v24 }
 0xb74   : > { %v4344_v26 = vpop.eup %4343 }
 0xb75   : > { %v2406_v27 = vmul.f32 %v4342_v19, %v2405_v25  ;;  %v2412_v28 = vmul.f32 %v4344_v26, %v2399_v20  ;;  %vm2418_vm9 = vweird.f32 %v4344_v26 }
 0xb76   : > { %vm2419_vm11 = vmor %vm2417_vm10, %vm2418_vm9 }
 0xb77   : > { %v2410_v30 = vsel %vm2409_vm8, %v4342_v19, %v2406_v27  ;;  %v2413_v37 = vmul.f32 %v4344_v26, %v2412_v28 }
 0xb78   : > { %v2431_v23 = vmul.f32 %v2410_v30, %v2380_v59  ;;  %v2523_v59 = vld [vmem:[%s5517_s26 + $0x28] sm:$0xff] }
 0xb79   : > { %v2414_v32 = vmul.f32 0.5, %v2413_v37  ;;  %2550 = vmatpush.msra.mxu0 %v2523_v59 }
 0xb7a   : > { %v2438_v33 = vmul.f32 %v4244_v29, %v2431_v23 }
 0xb7b   : > { %v2415_v34 = vsub.f32 1.5, %v2414_v32  ;;  %2551 = vmatpush.msra.mxu0 %v2522_v60 }
 0xb7c   : > { %v2445_v35 = vadd.f32 %v4245_v31, %v2438_v33 }
 0xb7d   : > { %v2416_v36 = vmul.f32 %v4344_v26, %v2415_v34  ;;  %2552 = vmatpush.msra.mxu0 %v2521_v44 }
 0xb7e   : > { %4034 = vmatmul.msk.f32.vlgmr.msra.gmra.mxu3 %vm1257_vm0, %v2445_v35 }
 0xb7f   : > { %v2420_v38 = vsel %vm2419_vm11, %v4344_v26, %v2416_v36  ;;  %2553 = vmatpush.msra.mxu0 %v2520_v61  ;;  %v4247_v36 = vld [vmem:[%s5519_s1] ss:$0 sm:$0xff]  ;;  %s5520_s1 = sld [smem:[#allocation14_spill]] }
 0xb80   : > { %v2432_v39 = vmul.f32 %v2420_v38, %v2381_v62  ;;  %v2518_v62 = vld [vmem:[%s5517_s26] sm:$0xff] }
 0xb81   : > { %2554 = vmatpush.msra.mxu0 %v2519_v16 }
 0xb82   : > { %v2439_v40 = vmul.f32 %v4244_v29, %v2432_v39 }
 0xb83   : > { %2555 = vmatpush.msra.mxu0 %v2518_v62 }
 0xb84   : > { %v2446_v41 = vadd.f32 %v4245_v31, %v2439_v40 }
 0xb85   : > { %v2652_v62 = vld [vmem:[%s5520_s1 + $0x18] sm:$0xff] }
 0xb86   : > { %4035 = vmatmul.msk.f32.gmra.mxu3 %vm1257_vm0, %v2446_v41  ;;  %2678 = vmatpush.msra.mxu1 %v2652_v62 }
 0xba2   : > { %v2394_v46 = vpop.xlane.xlu0 %2393 }
 0xba3   : > { %v2397_v47 = vmul.f32 %v2394_v46, %v4795_v12 }
 0xba5   : > { %v2400_v48 = vadd.f32 1e-05, %v2397_v47 }
 0xba7   : > { %4345 = vrsqrt.f32 %v2400_v48  ;;  %vm2427_vm13 = vweird.f32 %v2400_v48 }
 0xbad   : > { %v4346_v49 = vpop.eup %4345 }
 0xbae   : > { %v2422_v42 = vmul.f32 %v4346_v49, %v2400_v48  ;;  %vm2428_vm12 = vweird.f32 %v4346_v49 }
 0xbaf   : > { %vm2429_vm14 = vmor %vm2427_vm13, %vm2428_vm12 }
 0xbb0   : > { %v2423_v51 = vmul.f32 %v4346_v49, %v2422_v42 }
 0xbb2   : > { %v2424_v0 = vmul.f32 0.5, %v2423_v51 }
 0xbb4   : > { %v2425_v43 = vsub.f32 1.5, %v2424_v0 }
 0xbb6   : > { %v2426_v52 = vmul.f32 %v4346_v49, %v2425_v43 }
 0xbb8   : > { %v2430_v53 = vsel %vm2429_vm14, %v4346_v49, %v2426_v52 }
 0xbb9   : > { %v2433_v54 = vmul.f32 %v2430_v53, %v5105_v4 }
 0xbbb   : > { %v2440_v55 = vmul.f32 %v4244_v29, %v2433_v54 }
 0xbbd   : > { %v2447_v57 = vadd.f32 %v4245_v31, %v2440_v55 }
 0xbbf   : > { %4036 = vmatmul.msk.f32.gmra.mxu3 %vm1257_vm0, %v2447_v57 }
 0xc01   : > { %v2482_v1 = vpop.f32.mrf.mxu3 }
 0xc02   : > { %v2483_v2 = vadd.f32 %v4246_v63, %v2482_v1  ;;  %v2650_v1 = vld [vmem:[%s5520_s1 + $0x8] sm:$0xff] }
 0xc04   : > { %v2494_v3 = vmul.f32 0.044715, %v2483_v2  ;;  %v2491_v19 = vmul.f32 0.5, %v2483_v2 }
 0xc06   : > { %v2497_v4 = vmul.f32 %v2494_v3, %v2483_v2 }
 0xc08   : > { %v2500_v5 = vmul.f32 %v2497_v4, %v2483_v2 }
 0xc09   : > { %v2485_v6 = vpop.f32.mrf.mxu3 }
 0xc0a   : > { %v2503_v7 = vadd.f32 %v2500_v5, %v2483_v2  ;;  %v2486_v8 = vadd.f32 %v4246_v63, %v2485_v6  ;;  %v2649_v2 = vld [vmem:[%s5520_s1] sm:$0xff] }
 0xc0c   : > { %v2506_v10 = vmul.f32 0.7978846, %v2503_v7  ;;  %v2495_v11 = vmul.f32 0.044715, %v2486_v8  ;;  %v2492_v24 = vmul.f32 0.5, %v2486_v8 }
 0xc0e   : > { %4347 = vtanh.f32 %v2506_v10  ;;  %v2498_v13 = vmul.f32 %v2495_v11, %v2486_v8 }
 0xc10   : > { %v2501_v14 = vmul.f32 %v2498_v13, %v2486_v8 }
 0xc12   : > { %v2504_v15 = vadd.f32 %v2501_v14, %v2486_v8 }
 0xc14   : > { %v4348_v17 = vpop.eup %4347  ;;  %v2507_v18 = vmul.f32 0.7978846, %v2504_v15 }
 0xc15   : > { %v2512_v20 = vadd.f32 1.0, %v4348_v17 }
 0xc16   : > { %4349 = vtanh.f32 %v2507_v18 }
 0xc17   : > { %v2515_v21 = vmul.f32 %v2512_v20, %v2491_v19  ;;  %v4248_v20 = vld [vmem:[%s5521_s23] ss:$0 sm:$0xff]  ;;  %s5530_s23 = sld [smem:[#allocation23_spill]] }
 0xc19   : > { %4037 = vmatmul.msk.f32.vlgmr.msra.gmra.mxu0 %vm2530_vm15, %v2515_v21 }
 0xc1c   : > { %v4350_v22 = vpop.eup %4349 }
 0xc1d   : > { %v2513_v25 = vadd.f32 1.0, %v4350_v22 }
 0xc1f   : > { %v2516_v26 = vmul.f32 %v2513_v25, %v2492_v24  ;;  %v4249_v25 = vld [vmem:[%s5522_s22] ss:$0 sm:$0xff]  ;;  %s5523_s22 = sld [smem:[#allocation13_spill]] }
 0xc21   : > { %4038 = vmatmul.msk.f32.gmra.mxu0 %vm2530_vm15, %v2516_v26 }
 0xc42   : > { %v2488_v27 = vpop.f32.mrf.mxu3 }
 0xc43   : > { %v2489_v28 = vadd.f32 %v4246_v63, %v2488_v27  ;;  %v2651_v63 = vld [vmem:[%s5520_s1 + $0x10] sm:$0xff] }
 0xc44   : > { %2679 = vmatpush.msra.mxu1 %v2651_v63 }
 0xc45   : > { %v2496_v29 = vmul.f32 0.044715, %v2489_v28  ;;  %v2493_v33 = vmul.f32 0.5, %v2489_v28 }
 0xc46   : > { %2680 = vmatpush.msra.mxu1 %v2650_v1 }
 0xc47   : > { %v2499_v30 = vmul.f32 %v2496_v29, %v2489_v28 }
 0xc48   : > { %2681 = vmatpush.msra.mxu1 %v2649_v2 }
 0xc49   : > { %v2502_v37 = vmul.f32 %v2499_v30, %v2489_v28 }
 0xc4b   : > { %v2505_v23 = vadd.f32 %v2502_v37, %v2489_v28 }
 0xc4d   : > { %v2508_v31 = vmul.f32 0.7978846, %v2505_v23 }
 0xc4f   : > { %4351 = vtanh.f32 %v2508_v31 }
 0xc55   : > { %v4352_v32 = vpop.eup %4351 }
 0xc56   : > { %v2514_v34 = vadd.f32 1.0, %v4352_v32 }
 0xc58   : > { %v2517_v35 = vmul.f32 %v2514_v34, %v2493_v33 }
 0xc5a   : > { %4039 = vmatmul.msk.f32.gmra.mxu0 %vm2530_vm15, %v2517_v35 }
 0xc96   : > { %v2557_v38 = vpop.f32.mrf.mxu0 }
 0xc97   : > { %v2558_v39 = vadd.f32 %v4247_v36, %v2557_v38 }
 0xc99   : > { %v5137_v40 = vadd.f32 %v2558_v39, %v5082_v45 }
 0xc9b   : > { %v2569_v41 = vsel %vm1257_vm0, %v5137_v40, 0.0 }
 0xc9c   : > { %2570 = vadd.xlane.f32.xlu2 %v2569_v41 }
 0xc9e   : > { %v2560_v46 = vpop.f32.mrf.mxu0 }
 0xc9f   : > { %v2561_v47 = vadd.f32 %v4247_v36, %v2560_v46 }
 0xca1   : > { %v5142_v48 = vadd.f32 %v2561_v47, %v5087_v50 }
 0xca3   : > { %v2572_v49 = vsel %vm1257_vm0, %v5142_v48, 0.0 }
 0xca4   : > { %2573 = vadd.xlane.f32.xlu1 %v2572_v49 }
 0xcd7   : > { %v2563_v42 = vpop.f32.mrf.mxu0 }
 0xcd8   : > { %v2564_v51 = vadd.f32 %v4247_v36, %v2563_v42 }
 0xcda   : > { %v5147_v0 = vadd.f32 %v2564_v51, %v5093_v56 }
 0xcdc   : > { %v2575_v45 = vsel %vm1264_vm1, %v5147_v0, 0.0 }
 0xcdd   : > { %2576 = vadd.xlane.f32.xlu0 %v2575_v45 }
 0xd0f   : > { %v2571_v43 = vpop.xlane.xlu2 %2570 }
 0xd10   : > { %v2578_v52 = vmul.f32 %v2571_v43, %v4795_v12  ;;  %v4250_v43 = vld [vmem:[%s5523_s22] ss:$0 sm:$0xff]  ;;  %s5531_s22 = sld [smem:[#allocation16_spill]] }
 0xd12   : > { %v2581_v53 = vsub.f32 %v5137_v40, %v2578_v52 }
 0xd14   : > { %v2584_v50 = vmul.f32 %v2581_v53, %v2581_v53 }
 0xd16   : > { %v2587_v54 = vsel %vm1257_vm0, %v2584_v50, 0.0 }
 0xd17   : > { %2588 = vadd.xlane.f32.xlu2 %v2587_v54  ;;  %v2574_v55 = vpop.xlane.xlu1 %2573 }
 0xd18   : > { %v2579_v56 = vmul.f32 %v2574_v55, %v4795_v12 }
 0xd1a   : > { %v2582_v57 = vsub.f32 %v5142_v48, %v2579_v56 }
 0xd1c   : > { %v2585_v9 = vmul.f32 %v2582_v57, %v2582_v57 }
 0xd1e   : > { %v2590_v58 = vsel %vm1257_vm0, %v2585_v9, 0.0 }
 0xd1f   : > { %2591 = vadd.xlane.f32.xlu1 %v2590_v58 }
 0xd50   : > { %v2577_v59 = vpop.xlane.xlu0 %2576 }
 0xd51   : > { %v2580_v60 = vmul.f32 %v2577_v59, %v4795_v12 }
 0xd53   : > { %v5159_v44 = vsub.f32 %v5147_v0, %v2580_v60 }
 0xd55   : > { %v2586_v61 = vmul.f32 %v5159_v44, %v5159_v44 }
 0xd57   : > { %v2593_v16 = vsel %vm1264_vm1, %v2586_v61, 0.0 }
 0xd58   : > { %2594 = vadd.xlane.f32.xlu0 %v2593_v16 }
 0xd8a   : > { %v2589_v3 = vpop.xlane.xlu2 %2588 }
 0xd8b   : > { %v2596_v4 = vmul.f32 %v2589_v3, %v4795_v12 }
 0xd8d   : > { %v2599_v5 = vadd.f32 1e-05, %v2596_v4 }
 0xd8f   : > { %4353 = vrsqrt.f32 %v2599_v5  ;;  %vm2608_vm7 = vweird.f32 %v2599_v5 }
 0xd92   : > { %v2592_v6 = vpop.xlane.xlu1 %2591 }
 0xd93   : > { %v2597_v7 = vmul.f32 %v2592_v6, %v4795_v12 }
 0xd95   : > { %v4354_v8 = vpop.eup %4353  ;;  %v2600_v10 = vadd.f32 1e-05, %v2597_v7 }
 0xd96   : > { %v2603_v11 = vmul.f32 %v4354_v8, %v2599_v5  ;;  %vm2609_vm6 = vweird.f32 %v4354_v8 }
 0xd97   : > { %4355 = vrsqrt.f32 %v2600_v10  ;;  %vm2610_vm8 = vmor %vm2608_vm7, %vm2609_vm6  ;;  %vm2618_vm10 = vweird.f32 %v2600_v10 }
 0xd98   : > { %v2604_v13 = vmul.f32 %v4354_v8, %v2603_v11 }
 0xd9a   : > { %v2605_v14 = vmul.f32 0.5, %v2604_v13 }
 0xd9c   : > { %v2606_v15 = vsub.f32 1.5, %v2605_v14 }
 0xd9d   : > { %v4356_v17 = vpop.eup %4355 }
 0xd9e   : > { %v2607_v18 = vmul.f32 %v4354_v8, %v2606_v15  ;;  %v2613_v19 = vmul.f32 %v4356_v17, %v2600_v10  ;;  %vm2619_vm9 = vweird.f32 %v4356_v17 }
 0xd9f   : > { %vm2620_vm11 = vmor %vm2618_vm10, %vm2619_vm9 }
 0xda0   : > { %v2611_v21 = vsel %vm2610_vm8, %v4354_v8, %v2607_v18  ;;  %v2614_v22 = vmul.f32 %v4356_v17, %v2613_v19 }
 0xda1   : > { %v2632_v24 = vmul.f32 %v2611_v21, %v2581_v53 }
 0xda2   : > { %v2615_v26 = vmul.f32 0.5, %v2614_v22 }
 0xda3   : > { %v2639_v27 = vmul.f32 %v4248_v20, %v2632_v24 }
 0xda4   : > { %v2616_v28 = vsub.f32 1.5, %v2615_v26 }
 0xda5   : > { %v2646_v29 = vadd.f32 %v4249_v25, %v2639_v27 }
 0xda6   : > { %v2617_v30 = vmul.f32 %v4356_v17, %v2616_v28 }
 0xda7   : > { %4040 = vmatmul.msk.f32.vlgmr.msra.gmra.mxu1 %vm1257_vm0, %v2646_v29 }
 0xda8   : > { %v2621_v37 = vsel %vm2620_vm11, %v4356_v17, %v2617_v30 }
 0xda9   : > { %v2633_v23 = vmul.f32 %v2621_v37, %v2582_v57 }
 0xdab   : > { %v2640_v31 = vmul.f32 %v4248_v20, %v2633_v23 }
 0xdad   : > { %v2647_v32 = vadd.f32 %v4249_v25, %v2640_v31 }
 0xdaf   : > { %4041 = vmatmul.msk.f32.gmra.mxu1 %vm1257_vm0, %v2647_v32 }
 0xdcb   : > { %v2595_v33 = vpop.xlane.xlu0 %2594 }
 0xdcc   : > { %v2598_v34 = vmul.f32 %v2595_v33, %v4795_v12 }
 0xdce   : > { %v2601_v35 = vadd.f32 1e-05, %v2598_v34 }
 0xdd0   : > { %4357 = vrsqrt.f32 %v2601_v35  ;;  %vm2628_vm13 = vweird.f32 %v2601_v35 }
 0xdd6   : > { %v4358_v36 = vpop.eup %4357 }
 0xdd7   : > { %v2623_v38 = vmul.f32 %v4358_v36, %v2601_v35  ;;  %vm2629_vm12 = vweird.f32 %v4358_v36 }
 0xdd8   : > { %vm2630_vm14 = vmor %vm2628_vm13, %vm2629_vm12 }
 0xdd9   : > { %v2624_v39 = vmul.f32 %v4358_v36, %v2623_v38 }
 0xddb   : > { %v2625_v41 = vmul.f32 0.5, %v2624_v39 }
 0xddd   : > { %v2626_v46 = vsub.f32 1.5, %v2625_v41 }
 0xddf   : > { %v2627_v47 = vmul.f32 %v4358_v36, %v2626_v46 }
 0xde1   : > { %v2631_v49 = vsel %vm2630_vm14, %v4358_v36, %v2627_v47 }
 0xde2   : > { %v2634_v42 = vmul.f32 %v2631_v49, %v5159_v44 }
 0xde4   : > { %v2641_v51 = vmul.f32 %v4248_v20, %v2634_v42 }
 0xde6   : > { %v2648_v45 = vadd.f32 %v4249_v25, %v2641_v51 }
 0xde8   : > { %4042 = vmatmul.msk.f32.gmra.mxu1 %vm1257_vm0, %v2648_v45 }
 0xe24   : > { %v2683_v52 = vpop.f32.mrf.mxu1 }
 0xe25   : > { %v5178_v53 = vadd.f32 %v4250_v43, %v2683_v52 }
 0xe27   : > { %2702 = vrot.lane.b32.xlu0 %v5178_v53, %s4522_s2  ;;  %v5194_v59 = vmul.f32 0.35355338, %v5178_v53 }
 0xe2c   : > { %v2686_v50 = vpop.f32.mrf.mxu1 }
 0xe2d   : > { %v5182_v54 = vadd.f32 %v4250_v43, %v2686_v50 }
 0xe2f   : > { %2704 = vrot.lane.b32.xlu1 %v5182_v54, %s4522_s2  ;;  %v2697_v60 = vmul.f32 0.35355338, %v5182_v54  ;;  %v5211_v3 = vpack.i.bf16 %v5178_v53, %v5182_v54 }
 0xe65   : > { %v2689_v55 = vpop.f32.mrf.mxu1 }
 0xe66   : > { %v5186_v56 = vadd.f32 %v4250_v43, %v2689_v55 }
 0xe68   : > { %2706 = vrot.lane.b32.xlu2 %v5186_v56, %s4522_s2  ;;  %v2698_v44 = vmul.f32 0.35355338, %v5186_v56  ;;  %s5524_s2 = smov 112  }
 0xe99   : > { %v2703_v58 = vpop.permute.xlu0 %2702 }
 0xea1   : > { %v2705_v9 = vpop.permute.xlu1 %2704 }
 0xec2   : > { %v2707_v57 = vpop.permute.xlu2 %2706 }
 0xec3   : > { %4043 = vmatpush.xpose.msk.msrb.mxu2 %vm1705_vm2, %v2707_v57 }
 0xec7   : > { %4044 = vmatpush.xpose.msk.msrb.mxu2 %vm1705_vm2, %v2705_v9 }
 0xecb   : > { %4045 = vmatpush.xpose.msk.msrb.mxu2 %vm1705_vm2, %v2703_v58 }
 0xece   : > { %4046 = vmatmul.msk.f32.vlgmr.msrb.gmra.mxu2 %vm1705_vm2, %v5194_v59 }
 0xed6   : > { %4047 = vmatmul.msk.f32.gmra.mxu2 %vm1705_vm2, %v2697_v60 }
 0xede   : > { %4048 = vmatmul.msk.f32.gmra.mxu2 %vm1705_vm2, %v2698_v44 }
 0xf51   : > { %v2740_v61 = vpop.f32.mrf.mxu2 }
 0xf52   : > { %v2749_v16 = vsel %vm1747_vm3, %v2740_v61, -inf }
 0xf53   : > { %2750 = vmax.xlane.f32.xlu2 %v2749_v16 }
 0xf59   : > { %v2743_v62 = vpop.f32.mrf.mxu2 }
 0xf5a   : > { %v2752_v63 = vsel %vm1747_vm3, %v2743_v62, -inf }
 0xf5b   : > { %2753 = vmax.xlane.f32.xlu0 %v2752_v63 }
 0xf61   : > { %v2746_v1 = vpop.f32.mrf.mxu2 }
 0xf62   : > { %v2755_v2 = vsel %vm1754_vm4, %v2746_v1, -inf }
 0xf63   : > { %2756 = vmax.xlane.f32.xlu1 %v2755_v2 }
 0xf6f   : > { %2786 = vrot.lane.b32.xlu0 %v5186_v56, %s4523_s0 }
 0xf77   : > { %2837 = vrot.lane.b32.xlu0 %v5186_v56, %s4524_s11 }
 0xf7c   : > { %4215 = vrot.lane.b32.xlu1 %v5211_v3, %s4523_s0  ;;  %s5525_s0 = smov 104  }
 0xf7f   : > { %2833 = vrot.lane.b32.xlu0 %v5178_v53, %s4524_s11 }
 0xf84   : > { %2827 = vrot.lane.b32.xlu1 %v5194_v59, %s4525_s15 }
 0xf87   : > { %2829 = vrot.lane.b32.xlu0 %v2697_v60, %s4525_s15 }
 0xf8c   : > { %3035 = vrot.lane.b32.xlu1 %v5186_v56, %s4526_s16 }
 0xf8f   : > { %3201 = vrot.lane.b32.xlu0 %v5186_v56, %s4527_s18 }
 0xf94   : > { %3033 = vrot.lane.b32.xlu1 %v5182_v54, %s4526_s16 }
 0xf97   : > { %3199 = vrot.lane.b32.xlu0 %v5182_v54, %s4527_s18 }
 0xf9c   : > { %3197 = vrot.lane.b32.xlu1 %v5178_v53, %s4527_s18  ;;  %s5526_s18 = sld [smem:[#allocation24_spill]] }
 0xf9f   : > { %3025 = vrot.lane.b32.xlu0 %v5194_v59, %s5524_s2 }
 0xfa2   : > { %v2692_v28 = vld [vmem:[%s5526_s18] sm:$0xff] }
 0xfa4   : > { %3027 = vrot.lane.b32.xlu1 %v2697_v60, %s5524_s2 }
 0xfa7   : > { %3193 = vrot.lane.b32.xlu0 %v2697_v60, %s5525_s0 }
 0xfac   : > { %3195 = vrot.lane.b32.xlu1 %v2698_v44, %s5525_s0 }
 0xfc6   : > { %v2751_v4 = vpop.xlane.xlu2 %2750 }
 0xfc7   : > { %v2758_v5 = vsub.f32 %v2740_v61, %v2751_v4 }
 0xfc9   : > { %v2761_v6 = vmul.f32 1.442695, %v2758_v5 }
 0xfcb   : > { %4359 = vpow2.f32 %v2761_v6 }
 0xfce   : > { %v2754_v7 = vpop.xlane.xlu0 %2753 }
 0xfcf   : > { %v2759_v8 = vsub.f32 %v2743_v62, %v2754_v7 }
 0xfd1   : > { %v4360_v10 = vpop.eup %4359  ;;  %v2763_v11 = vmul.f32 1.442695, %v2759_v8 }
 0xfd2   : > { %v2767_v13 = vsel %vm1747_vm3, %v4360_v10, 0.0 }
 0xfd3   : > { %4361 = vpow2.f32 %v2763_v11  ;;  %2768 = vadd.xlane.f32.xlu2 %v2767_v13 }
 0xfd6   : > { %v2757_v14 = vpop.xlane.xlu1 %2756 }
 0xfd7   : > { %v2760_v15 = vsub.f32 %v2746_v1, %v2757_v14 }
 0xfd9   : > { %v4362_v17 = vpop.eup %4361  ;;  %v2765_v18 = vmul.f32 1.442695, %v2760_v15 }
 0xfda   : > { %v2770_v19 = vsel %vm1747_vm3, %v4362_v17, 0.0 }
 0xfdb   : > { %4363 = vpow2.f32 %v2765_v18  ;;  %2771 = vadd.xlane.f32.xlu2 %v2770_v19 }
 0xfe1   : > { %v4364_v20 = vpop.eup %4363  ;;  %v2787_v21 = vpop.permute.xlu0 %2786 }
 0xfe2   : > { %4049 = vmatpush.msk.msrb.mxu3 %vm1799_vm5, %v2787_v21  ;;  %v2773_v22 = vsel %vm1754_vm4, %v4364_v20, 0.0 }
 0xfe3   : > { %2774 = vadd.xlane.f32.xlu2 %v2773_v22 }
 0xfe9   : > { %v2838_v24 = vpop.permute.xlu0 %2837 }
 0xfea   : > { %4053 = vmatpush.xpose.msk.msrb.mxu0 %vm1705_vm2, %v2838_v24 }
 0xfee   : > { %v4216_v25 = vpop.permute.xlu1 %4215 }
 0xfef   : > { %v4217_v26 = vunpack.i.l.bf16 %v4216_v25  ;;  %v4218_v27 = vunpack.i.h.bf16 %v4216_v25 }
 0xff1   : > { %2815 = vmatpush.msrb.mxu3 %v4217_v26  ;;  %v2834_v29 = vpop.permute.xlu0 %2833 }
 0xff3   : > { %2816 = vmatpush.msrb.mxu3 %v4218_v27 }
 0xff5   : > { %3014 = vmatpush.msra.mxu3 %v2692_v28 }
 0xff6   : > { %v2828_v30 = vpop.permute.xlu1 %2827 }
 0xff9   : > { %v2830_v37 = vpop.permute.xlu0 %2829 }
 0xffb   : > { %2835 = vrot.lane.b32.xlu2 %v5182_v54, %s4524_s11  ;;  %s5527_s11 = smov 56  }
 0xffe   : > { %v3036_v23 = vpop.permute.xlu1 %3035 }
0x1001   : > { %v3202_v32 = vpop.permute.xlu0 %3201 }
0x1003   : > { %2831 = vrot.lane.b32.xlu2 %v2698_v44, %s4525_s15  ;;  %s5528_s15 = smov 48  }
0x1006   : > { %v3034_v34 = vpop.permute.xlu1 %3033 }
0x1009   : > { %v3200_v38 = vpop.permute.xlu0 %3199 }
0x100b   : > { %3031 = vrot.lane.b32.xlu2 %v5178_v53, %s4526_s16  ;;  %s5529_s16 = smov 40  }
0x100e   : > { %v3198_v47 = vpop.permute.xlu1 %3197 }
0x1011   : > { %v3026_v52 = vpop.permute.xlu0 %3025 }
0x1013   : > { %3191 = vrot.lane.b32.xlu2 %v5194_v59, %s5525_s0  ;;  %s5533_s0 = sld [smem:[#allocation21_spill]] }
0x1016   : > { %v3028_v50 = vpop.permute.xlu1 %3027 }
0x1019   : > { %v3194_v61 = vpop.permute.xlu0 %3193 }
0x101b   : > { %3029 = vrot.lane.b32.xlu2 %v2698_v44, %s5524_s2  ;;  %s5532_s2 = sld [smem:[#allocation22_spill]] }
0x101e   : > { %v3196_v63 = vpop.permute.xlu1 %3195 }
0x1046   : > { %v2769_v31 = vpop.xlane.xlu2 %2768 }
0x1047   : > { %4365 = vrcp.f32 %v2769_v31 }
0x104d   : > { %v4366_v33 = vpop.eup %4365 }
0x104e   : > { %v2779_v35 = vmul.f32 %v4366_v33, %v4360_v10  ;;  %v2772_v36 = vpop.xlane.xlu2 %2771 }
0x104f   : > { %4367 = vrcp.f32 %v2772_v36 }
0x1050   : > { %4050 = vmatmul.msk.f32.vlgmr.msrb.gmra.mxu3 %vm1747_vm3, %v2779_v35 }
0x1051   : > { %4082 = vmatpush.xpose.msk.msrb.mxu3 %vm1705_vm2, %v3202_v32 }
0x1055   : > { %v4368_v39 = vpop.eup %4367  ;;  %4083 = vmatpush.xpose.msk.msrb.mxu3 %vm1705_vm2, %v3200_v38 }
0x1056   : > { %v2775_v41 = vpop.xlane.xlu2 %2774  ;;  %v2780_v46 = vmul.f32 %v4368_v39, %v4362_v17 }
0x1057   : > { %4369 = vrcp.f32 %v2775_v41 }
0x1058   : > { %4051 = vmatmul.msk.f32.gmra.mxu3 %vm1747_vm3, %v2780_v46 }
0x1059   : > { %4084 = vmatpush.xpose.msk.msrb.mxu3 %vm1705_vm2, %v3198_v47 }
0x105d   : > { %v4370_v49 = vpop.eup %4369 }
0x105e   : > { %v2836_v42 = vpop.permute.xlu2 %2835  ;;  %v2781_v51 = vmul.f32 %v4370_v49, %v4364_v20 }
0x105f   : > { %4054 = vmatpush.xpose.msk.msrb.mxu0 %vm1705_vm2, %v2836_v42 }
0x1060   : > { %4052 = vmatmul.msk.f32.gmra.mxu3 %vm1747_vm3, %v2781_v51 }
0x1063   : > { %4055 = vmatpush.xpose.msk.msrb.mxu0 %vm1705_vm2, %v2834_v29 }
0x1066   : > { %v2832_v45 = vpop.permute.xlu2 %2831  ;;  %4056 = vmatmul.msk.f32.vlgmr.msrb.gmra.mxu0 %vm1705_vm2, %v2828_v30 }
0x1067   : > { %4069 = vmatpush.xpose.msk.msra.mxu0 %vm1705_vm2, %v3036_v23 }
0x106b   : > { %4070 = vmatpush.xpose.msk.msra.mxu0 %vm1705_vm2, %v3034_v34 }
0x106e   : > { %v3032_v43 = vpop.permute.xlu2 %3031  ;;  %4057 = vmatmul.msk.f32.gmra.mxu0 %vm1705_vm2, %v2830_v37 }
0x106f   : > { %4071 = vmatpush.xpose.msk.msra.mxu0 %vm1705_vm2, %v3032_v43 }
0x1076   : > { %4058 = vmatmul.msk.f32.gmra.mxu0 %vm1705_vm2, %v2832_v45  ;;  %v3192_v53 = vpop.permute.xlu2 %3191 }
0x107e   : > { %4072 = vmatmul.msk.f32.vlgmr.msra.gmra.mxu0 %vm1705_vm2, %v3026_v52  ;;  %v3030_v54 = vpop.permute.xlu2 %3029 }
0x1086   : > { %4073 = vmatmul.msk.f32.gmra.mxu0 %vm1705_vm2, %v3028_v50 }
0x108e   : > { %4074 = vmatmul.msk.f32.gmra.mxu0 %vm1705_vm2, %v3030_v54 }
0x10d3   : > { %v2818_v55 = vpop.f32.mrf.mxu3 }
0x10d4   : > { %4066 = vmatmul.msk.f32.vlgmr.msra.gmra.mxu3 %vm1705_vm2, %v2818_v55 }
0x10db   : > { %v2821_v57 = vpop.f32.mrf.mxu3 }
0x10dc   : > { %4067 = vmatmul.msk.f32.gmra.mxu3 %vm1705_vm2, %v2821_v57 }
0x10e3   : > { %v2824_v9 = vpop.f32.mrf.mxu3  ;;  %v2868_v58 = vpop.f32.mrf.mxu0 }
0x10e4   : > { %4068 = vmatmul.msk.f32.gmra.mxu3 %vm1705_vm2, %v2824_v9  ;;  %v2877_v59 = vsel %vm1747_vm3, %v2868_v58, -inf }
0x10e5   : > { %2878 = vmax.xlane.f32.xlu0 %v2877_v59 }
0x10eb   : > { %v2871_v60 = vpop.f32.mrf.mxu0 }
0x10ec   : > { %4085 = vmatmul.msk.f32.vlgmr.msrb.gmra.mxu3 %vm1705_vm2, %v3192_v53  ;;  %v2880_v44 = vsel %vm1747_vm3, %v2871_v60, -inf }
0x10ed   : > { %2881 = vmax.xlane.f32.xlu2 %v2880_v44 }
0x10f3   : > { %v2874_v16 = vpop.f32.mrf.mxu0 }
0x10f4   : > { %4086 = vmatmul.msk.f32.gmra.mxu3 %vm1705_vm2, %v3194_v61  ;;  %v2883_v62 = vsel %vm1754_vm4, %v2874_v16, -inf }
0x10f5   : > { %2884 = vmax.xlane.f32.xlu1 %v2883_v62 }
0x10fb   : > { %v3066_v1 = vpop.f32.mrf.mxu0 }
0x10fc   : > { %4087 = vmatmul.msk.f32.gmra.mxu3 %vm1705_vm2, %v3196_v63  ;;  %v3075_v2 = vsel %vm1747_vm3, %v3066_v1, -inf }
0x10fd   : > { %3076 = vmax.xlane.f32.xlu2 %v3075_v2 }
0x1103   : > { %v3069_v4 = vpop.f32.mrf.mxu0 }
0x1104   : > { %v3078_v5 = vsel %vm1747_vm3, %v3069_v4, -inf }
0x1105   : > { %3079 = vmax.xlane.f32.xlu0 %v3078_v5 }
0x110b   : > { %v3072_v6 = vpop.f32.mrf.mxu0 }
0x110c   : > { %v3081_v7 = vsel %vm1754_vm4, %v3072_v6, -inf }
0x110d   : > { %3082 = vmax.xlane.f32.xlu2 %v3081_v7 }
0x110e   : > { %4220 = vrot.lane.b32.xlu1 %v5211_v3, %s5527_s11 }
0x1119   : > { %2914 = vrot.lane.b32.xlu0 %v5186_v56, %s5527_s11  ;;  %s5534_s11 = sld [smem:[#allocation18_spill]] }
0x1157   : > { %v5282_v8 = vpop.f32.mrf.mxu3 }
0x1158   : > { %v2879_v10 = vpop.xlane.xlu0 %2878 }
0x1159   : > { %v2886_v11 = vsub.f32 %v2868_v58, %v2879_v10 }
0x115b   : > { %v2889_v13 = vmul.f32 1.442695, %v2886_v11 }
0x115d   : > { %4371 = vpow2.f32 %v2889_v13 }
0x115f   : > { %v5284_v14 = vpop.f32.mrf.mxu3 }
0x1160   : > { %v2882_v15 = vpop.xlane.xlu2 %2881 }
0x1161   : > { %v2887_v17 = vsub.f32 %v2871_v60, %v2882_v15 }
0x1163   : > { %v4372_v18 = vpop.eup %4371  ;;  %v2891_v19 = vmul.f32 1.442695, %v2887_v17 }
0x1164   : > { %v2895_v20 = vsel %vm1747_vm3, %v4372_v18, 0.0 }
0x1165   : > { %4373 = vpow2.f32 %v2891_v19  ;;  %2896 = vadd.xlane.f32.xlu2 %v2895_v20 }
0x1167   : > { %v5287_v21 = vpop.f32.mrf.mxu3 }
0x1168   : > { %v2885_v22 = vpop.xlane.xlu1 %2884 }
0x1169   : > { %v2888_v24 = vsub.f32 %v2874_v16, %v2885_v22 }
0x116b   : > { %v4374_v25 = vpop.eup %4373  ;;  %v2893_v26 = vmul.f32 1.442695, %v2888_v24 }
0x116c   : > { %v2898_v27 = vsel %vm1747_vm3, %v4374_v25, 0.0 }
0x116d   : > { %4375 = vpow2.f32 %v2893_v26  ;;  %2899 = vadd.xlane.f32.xlu2 %v2898_v27 }
0x116f   : > { %v3232_v28 = vpop.f32.mrf.mxu3 }
0x1170   : > { %v3077_v29 = vpop.xlane.xlu2 %3076  ;;  %v3241_v30 = vsel %vm1747_vm3, %v3232_v28, -inf }
0x1171   : > { %v3084_v37 = vsub.f32 %v3066_v1, %v3077_v29  ;;  %3242 = vmax.xlane.f32.xlu1 %v3241_v30 }
0x1173   : > { %v4376_v23 = vpop.eup %4375  ;;  %v3087_v31 = vmul.f32 1.442695, %v3084_v37 }
0x1174   : > { %v2901_v32 = vsel %vm1754_vm4, %v4376_v23, 0.0 }
0x1175   : > { %4377 = vpow2.f32 %v3087_v31  ;;  %2902 = vadd.xlane.f32.xlu2 %v2901_v32 }
0x1177   : > { %v3235_v35 = vpop.f32.mrf.mxu3 }
0x1178   : > { %v3080_v36 = vpop.xlane.xlu0 %3079  ;;  %v3244_v38 = vsel %vm1747_vm3, %v3235_v35, -inf }
0x1179   : > { %v3085_v49 = vsub.f32 %v3069_v4, %v3080_v36 }
0x117b   : > { %v5292_v33 = vpop.eup %4377  ;;  %v3089_v42 = vmul.f32 1.442695, %v3085_v49 }
0x117c   : > { %v3093_v34 = vsel %vm1747_vm3, %v5292_v33, 0.0 }
0x117d   : > { %3094 = vadd.xlane.f32.xlu0 %v3093_v34  ;;  %4379 = vpow2.f32 %v3089_v42  ;;  %v2693_v34 = vld [vmem:[%s5526_s18 + $0x8] sm:$0xff] }
0x117e   : > { %2979 = vmatpush.msra.mxu2 %v2693_v34 }
0x117f   : > { %v3238_v45 = vpop.f32.mrf.mxu3 }
0x1180   : > { %v4221_v39 = vpop.permute.xlu1 %4220  ;;  %v3083_v51 = vpop.xlane.xlu2 %3082  ;;  %v3247_v52 = vsel %vm1754_vm4, %v3238_v45, -inf }
0x1181   : > { %v4222_v46 = vunpack.i.l.bf16 %v4221_v39  ;;  %v4223_v47 = vunpack.i.h.bf16 %v4221_v39  ;;  %v3086_v43 = vsub.f32 %v3072_v6, %v3083_v51 }
0x1183   : > { %v3091_v53 = vmul.f32 1.442695, %v3086_v43  ;;  %v5305_v50 = vpop.eup %4379 }
0x1184   : > { %v3096_v54 = vsel %vm1747_vm3, %v5305_v50, 0.0 }
0x1185   : > { %3245 = vmax.xlane.f32.xlu0 %v3244_v38  ;;  %4381 = vpow2.f32 %v3091_v53 }
0x118a   : > { %4225 = vrot.lane.b32.xlu1 %v5211_v3, %s5528_s15 }
0x118b   : > { %v2915_v41 = vpop.permute.xlu0 %2914  ;;  %v4382_v55 = vpop.eup %4381 }
0x118c   : > { %4059 = vmatpush.msk.msrb.mxu1 %vm1799_vm5, %v2915_v41  ;;  %v2694_v41 = vld [vmem:[%s5526_s18 + $0x10] sm:$0xff] }
0x118d   : > { %3112 = vrot.lane.b32.xlu2 %v5186_v56, %s5528_s15  ;;  %3177 = vmatpush.msrb.mxu2 %v2694_v41  ;;  %v3449_v41 = vld [vmem:[%s5531_s22 + $0x10] sm:$0xff]  ;;  %s5535_s15 = sld [smem:[#allocation15_spill]] }
0x118e   : > { %2943 = vmatpush.msrb.mxu1 %v4222_v46 }
0x1190   : > { %2944 = vmatpush.msrb.mxu1 %v4223_v47 }
0x1199   : > { %3278 = vrot.lane.b32.xlu0 %v5186_v56, %s5529_s16  ;;  %v3099_v56 = vsel %vm1754_vm4, %v4382_v55, 0.0 }
0x11b4   : > { %3248 = vmax.xlane.f32.xlu1 %v3247_v52 }
0x11bc   : > { %3097 = vadd.xlane.f32.xlu1 %v3096_v54 }
0x11c3   : > { %3100 = vadd.xlane.f32.xlu0 %v3099_v56 }
0x11d5   : > { %4230 = vrot.lane.b32.xlu1 %v5211_v3, %s5529_s16  ;;  %s5536_s16 = sld [smem:[#allocation17_spill]] }
0x11d8   : > { %v2897_v57 = vpop.xlane.xlu2 %2896 }
0x11d9   : > { %4383 = vrcp.f32 %v2897_v57 }
0x11df   : > { %v4384_v9 = vpop.eup %4383 }
0x11e0   : > { %v2907_v58 = vmul.f32 %v4384_v9, %v4372_v18  ;;  %v2900_v59 = vpop.xlane.xlu2 %2899  ;;  %v2695_v9 = vld [vmem:[%s5526_s18 + $0x18] sm:$0xff] }
0x11e1   : > { %4385 = vrcp.f32 %v2900_v59 }
0x11e2   : > { %4060 = vmatmul.msk.f32.vlgmr.msrb.gmra.mxu1 %vm1747_vm3, %v2907_v58 }
0x11e4   : > { %v3243_v60 = vpop.xlane.xlu1 %3242 }
0x11e5   : > { %v3250_v44 = vsub.f32 %v3232_v28, %v3243_v60 }
0x11e7   : > { %v4386_v61 = vpop.eup %4385  ;;  %v3253_v16 = vmul.f32 1.442695, %v3250_v44 }
0x11e8   : > { %v2903_v62 = vpop.xlane.xlu2 %2902  ;;  %v2908_v63 = vmul.f32 %v4386_v61, %v4374_v25 }
0x11e9   : > { %4387 = vpow2.f32 %v3253_v16 }
0x11ea   : > { %4389 = vrcp.f32 %v2903_v62  ;;  %4061 = vmatmul.msk.f32.gmra.mxu1 %vm1747_vm3, %v2908_v63 }
0x11ef   : > { %v4388_v1 = vpop.eup %4387 }
0x11f0   : > { %v4390_v3 = vpop.eup %4389  ;;  %v3095_v2 = vpop.xlane.xlu0 %3094  ;;  %v3259_v5 = vsel %vm1747_vm3, %v4388_v1, 0.0 }
0x11f1   : > { %v3113_v4 = vpop.permute.xlu2 %3112  ;;  %3260 = vadd.xlane.f32.xlu2 %v3259_v5  ;;  %v2909_v6 = vmul.f32 %v4390_v3, %v4376_v23  ;;  %4391 = vrcp.f32 %v3095_v2 }
0x11f2   : > { %4075 = vmatpush.msk.msra.mxu1 %vm1799_vm5, %v3113_v4  ;;  %v4251_v4 = vld [vmem:[%s5530_s23] ss:$0 sm:$0xff]  ;;  %s5537_s23 = sld [smem:[#allocation27_spill]] }
0x11f3   : > { %4062 = vmatmul.msk.f32.gmra.mxu1 %vm1747_vm3, %v2909_v6 }
0x11f7   : > { %v4392_v15 = vpop.eup %4391 }
0x11f8   : > { %v3246_v7 = vpop.xlane.xlu0 %3245  ;;  %v3105_v19 = vmul.f32 %v4392_v15, %v5292_v33 }
0x11f9   : > { %v3251_v10 = vsub.f32 %v3235_v35, %v3246_v7 }
0x11fb   : > { %v3255_v11 = vmul.f32 1.442695, %v3251_v10 }
0x11fc   : > { %v4226_v13 = vpop.permute.xlu1 %4225 }
0x11fd   : > { %4393 = vpow2.f32 %v3255_v11  ;;  %v4227_v17 = vunpack.i.l.bf16 %v4226_v13  ;;  %v4228_v18 = vunpack.i.h.bf16 %v4226_v13 }
0x11ff   : > { %3141 = vmatpush.msra.mxu1 %v4227_v17 }
0x1201   : > { %3142 = vmatpush.msra.mxu1 %v4228_v18 }
0x1202   : > { %4076 = vmatmul.msk.f32.vlgmr.msra.gmra.mxu1 %vm1747_vm3, %v3105_v19 }
0x1203   : > { %v4394_v20 = vpop.eup %4393  ;;  %3343 = vmatpush.msrb.mxu1 %v2695_v9 }
0x1204   : > { %v3262_v22 = vsel %vm1747_vm3, %v4394_v20, 0.0 }
0x1205   : > { %3263 = vadd.xlane.f32.xlu2 %v3262_v22 }
0x120b   : > { %v3279_v24 = vpop.permute.xlu0 %3278 }
0x120c   : > { %4088 = vmatpush.msk.msrb.mxu0 %vm1799_vm5, %v3279_v24 }
0x1227   : > { %v3249_v25 = vpop.xlane.xlu1 %3248 }
0x1228   : > { %v3252_v26 = vsub.f32 %v3238_v45, %v3249_v25 }
0x122a   : > { %v3257_v27 = vmul.f32 1.442695, %v3252_v26 }
0x122c   : > { %4395 = vpow2.f32 %v3257_v27 }
0x122f   : > { %v3098_v28 = vpop.xlane.xlu1 %3097 }
0x1230   : > { %4397 = vrcp.f32 %v3098_v28 }
0x1232   : > { %v4396_v29 = vpop.eup %4395 }
0x1233   : > { %v3265_v30 = vsel %vm1754_vm4, %v4396_v29, 0.0 }
0x1234   : > { %3266 = vadd.xlane.f32.xlu2 %v3265_v30 }
0x1236   : > { %v4398_v37 = vpop.eup %4397  ;;  %v3101_v23 = vpop.xlane.xlu0 %3100 }
0x1237   : > { %4399 = vrcp.f32 %v3101_v23  ;;  %v3106_v31 = vmul.f32 %v4398_v37, %v5305_v50 }
0x1239   : > { %4077 = vmatmul.msk.f32.gmra.mxu1 %vm1747_vm3, %v3106_v31 }
0x123d   : > { %v4400_v32 = vpop.eup %4399 }
0x123e   : > { %v3107_v33 = vmul.f32 %v4400_v32, %v4382_v55 }
0x1241   : > { %4078 = vmatmul.msk.f32.gmra.mxu1 %vm1747_vm3, %v3107_v33 }
0x1247   : > { %v4231_v35 = vpop.permute.xlu1 %4230 }
0x1248   : > { %v4232_v36 = vunpack.i.l.bf16 %v4231_v35  ;;  %v4233_v38 = vunpack.i.h.bf16 %v4231_v35 }
0x124a   : > { %3307 = vmatpush.msrb.mxu0 %v4232_v36 }
0x124c   : > { %3308 = vmatpush.msrb.mxu0 %v4233_v38 }
0x125f   : > { %v2946_v39 = vpop.f32.mrf.mxu1 }
0x1260   : > { %4063 = vmatmul.msk.f32.vlgmr.msra.gmra.mxu2 %vm1705_vm2, %v2946_v39  ;;  %v3450_v39 = vld [vmem:[%s5531_s22 + $0x18] sm:$0xff] }
0x1261   : > { %3476 = vmatpush.msra.mxu2 %v3450_v39 }
0x1263   : > { %3477 = vmatpush.msra.mxu2 %v3449_v41 }
0x1264   : > { %v3261_v46 = vpop.xlane.xlu2 %3260 }
0x1265   : > { %4401 = vrcp.f32 %v3261_v46  ;;  %v3448_v46 = vld [vmem:[%s5531_s22 + $0x8] sm:$0xff] }
0x1266   : > { %3478 = vmatpush.msra.mxu2 %v3448_v46 }
0x1267   : > { %v2949_v47 = vpop.f32.mrf.mxu1 }
0x1268   : > { %4064 = vmatmul.msk.f32.gmra.mxu2 %vm1705_vm2, %v2949_v47  ;;  %v3447_v47 = vld [vmem:[%s5531_s22] sm:$0xff] }
0x1269   : > { %3479 = vmatpush.msra.mxu2 %v3447_v47 }
0x126b   : > { %v4402_v49 = vpop.eup %4401 }
0x126c   : > { %v3271_v42 = vmul.f32 %v4402_v49, %v4388_v1 }
0x126e   : > { %4089 = vmatmul.msk.f32.vlgmr.msrb.gmra.mxu0 %vm1747_vm3, %v3271_v42 }
0x1270   : > { %v2952_v51 = vpop.f32.mrf.mxu1 }
0x1271   : > { %4065 = vmatmul.msk.f32.gmra.mxu2 %vm1705_vm2, %v2952_v51 }
0x1278   : > { %v3264_v45 = vpop.xlane.xlu2 %3263 }
0x1279   : > { %4403 = vrcp.f32 %v3264_v45 }
0x127f   : > { %v4404_v43 = vpop.eup %4403  ;;  %v3144_v52 = vpop.f32.mrf.mxu1 }
0x1280   : > { %4079 = vmatmul.msk.f32.vlgmr.msrb.gmra.mxu2 %vm1705_vm2, %v3144_v52  ;;  %v3272_v53 = vmul.f32 %v4404_v43, %v4394_v20 }
0x1282   : > { %4090 = vmatmul.msk.f32.gmra.mxu0 %vm1747_vm3, %v3272_v53 }
0x12a7   : > { %v3267_v50 = vpop.xlane.xlu2 %3266 }
0x12a8   : > { %4405 = vrcp.f32 %v3267_v50 }
0x12ae   : > { %v4406_v54 = vpop.eup %4405 }
0x12af   : > { %v3273_v55 = vmul.f32 %v4406_v54, %v4396_v29 }
0x12b1   : > { %4091 = vmatmul.msk.f32.gmra.mxu0 %vm1747_vm3, %v3273_v55 }
0x12b6   : > { %v3147_v56 = vpop.f32.mrf.mxu1 }
0x12b7   : > { %4080 = vmatmul.msk.f32.gmra.mxu2 %vm1705_vm2, %v3147_v56  ;;  %v4252_v56 = vld [vmem:[%s5532_s2] ss:$0 sm:$0xff]  ;;  %s5538_s2 = sld [smem:[#allocation28_spill]] }
0x12be   : > { %v3150_v57 = vpop.f32.mrf.mxu1 }
0x12bf   : > { %4081 = vmatmul.msk.f32.gmra.mxu2 %vm1705_vm2, %v3150_v57 }
0x12e3   : > { %v2981_v44 = vpop.f32.mrf.mxu2 }
0x12e4   : > { %v3017_v63 = vadd.f32 %v5282_v8, %v2981_v44 }
0x12eb   : > { %v3310_v58 = vpop.f32.mrf.mxu0  ;;  %v2984_v61 = vpop.f32.mrf.mxu2 }
0x12ec   : > { %4092 = vmatmul.msk.f32.vlgmr.msrb.gmra.mxu1 %vm1705_vm2, %v3310_v58  ;;  %v3020_v11 = vadd.f32 %v5284_v14, %v2984_v61 }
0x12f4   : > { %v2987_v16 = vpop.f32.mrf.mxu2 }
0x12f5   : > { %v3023_v20 = vadd.f32 %v5287_v21, %v2987_v16 }
0x12ff   : > { %v3313_v59 = vpop.f32.mrf.mxu0 }
0x1300   : > { %4093 = vmatmul.msk.f32.gmra.mxu1 %vm1705_vm2, %v3313_v59 }
0x1303   : > { %v3179_v62 = vpop.f32.mrf.mxu2 }
0x1304   : > { %v3188_v1 = vadd.f32 %v3179_v62, %v3017_v63 }
0x132e   : > { %v3316_v60 = vpop.f32.mrf.mxu0 }
0x132f   : > { %4094 = vmatmul.msk.f32.gmra.mxu1 %vm1705_vm2, %v3316_v60  ;;  %v4253_v60 = vld [vmem:[%s5533_s0] ss:$0 sm:$0xff]  ;;  %s5539_s0 = sld [smem:[#allocation26_spill]] }
0x133a   : > { %v3182_v10 = vpop.f32.mrf.mxu2 }
0x133b   : > { %v3189_v13 = vadd.f32 %v3182_v10, %v3020_v11 }
0x1369   : > { %v3345_v3 = vpop.f32.mrf.mxu1 }
0x136a   : > { %v3354_v2 = vadd.f32 %v3345_v3, %v3188_v1 }
0x136c   : > { %v3357_v5 = vadd.f32 %v3354_v2, %v5137_v40  ;;  %v3185_v40 = vpop.f32.mrf.mxu2 }
0x136d   : > { %v3190_v22 = vadd.f32 %v3185_v40, %v3023_v20 }
0x136e   : > { %v5343_v6 = vadd.f32 %v4251_v4, %v3357_v5 }
0x1370   : > { %v3367_v7 = vsel %vm1257_vm0, %v5343_v6, 0.0 }
0x1371   : > { %3368 = vadd.xlane.f32.xlu1 %v3367_v7 }
0x137d   : > { %v3348_v15 = vpop.f32.mrf.mxu1 }
0x137e   : > { %v3355_v17 = vadd.f32 %v3348_v15, %v3189_v13 }
0x1380   : > { %v3358_v8 = vadd.f32 %v3355_v17, %v5142_v48 }
0x1382   : > { %v5349_v18 = vadd.f32 %v4251_v4, %v3358_v8 }
0x1384   : > { %v3370_v19 = vsel %vm1257_vm0, %v5349_v18, 0.0 }
0x1385   : > { %3371 = vadd.xlane.f32.xlu2 %v3370_v19 }
0x13ac   : > { %v3351_v24 = vpop.f32.mrf.mxu1 }
0x13ad   : > { %v3356_v25 = vadd.f32 %v3351_v24, %v3190_v22 }
0x13af   : > { %v3359_v26 = vadd.f32 %v3356_v25, %v5147_v0 }
0x13b1   : > { %v5355_v14 = vadd.f32 %v4251_v4, %v3359_v26 }
0x13b3   : > { %v3373_v27 = vsel %vm1264_vm1, %v5355_v14, 0.0 }
0x13b4   : > { %3374 = vadd.xlane.f32.xlu2 %v3373_v27 }
0x13e4   : > { %v3369_v48 = vpop.xlane.xlu1 %3368 }
0x13e5   : > { %v3376_v28 = vmul.f32 %v3369_v48, %v4795_v12  ;;  %v3524_v48 = vld [vmem:[%s5534_s11 + $0x38] sm:$0xff] }
0x13e6   : > { %3546 = vmatpush.msra.mxu3 %v3524_v48 }
0x13e7   : > { %v3379_v29 = vsub.f32 %v5343_v6, %v3376_v28  ;;  %v3523_v28 = vld [vmem:[%s5534_s11 + $0x30] sm:$0xff] }
0x13e8   : > { %3547 = vmatpush.msra.mxu3 %v3523_v28 }
0x13e9   : > { %v3382_v30 = vmul.f32 %v3379_v29, %v3379_v29 }
0x13eb   : > { %v3385_v21 = vsel %vm1257_vm0, %v3382_v30, 0.0  ;;  %v3521_v30 = vld [vmem:[%s5534_s11 + $0x20] sm:$0xff] }
0x13ec   : > { %3386 = vadd.xlane.f32.xlu2 %v3385_v21  ;;  %v3520_v21 = vld [vmem:[%s5534_s11 + $0x18] sm:$0xff] }
0x13f8   : > { %v3372_v37 = vpop.xlane.xlu2 %3371 }
0x13f9   : > { %v3377_v0 = vmul.f32 %v3372_v37, %v4795_v12  ;;  %v3519_v37 = vld [vmem:[%s5534_s11 + $0x10] sm:$0xff] }
0x13fb   : > { %v3380_v23 = vsub.f32 %v5349_v18, %v3377_v0  ;;  %v3518_v0 = vld [vmem:[%s5534_s11 + $0x8] sm:$0xff] }
0x13fd   : > { %v3383_v31 = vmul.f32 %v3380_v23, %v3380_v23 }
0x13ff   : > { %v3388_v32 = vsel %vm1257_vm0, %v3383_v31, 0.0  ;;  %v4254_v31 = vld [vmem:[%s5535_s15] ss:$0 sm:$0xff]  ;;  %s5540_s15 = sld [smem:[#allocation5_spill]] }
0x1400   : > { %3389 = vadd.xlane.f32.xlu0 %v3388_v32 }
0x1427   : > { %v3375_v33 = vpop.xlane.xlu2 %3374 }
0x1428   : > { %v3378_v34 = vmul.f32 %v3375_v33, %v4795_v12 }
0x142a   : > { %v5367_v35 = vsub.f32 %v5355_v14, %v3378_v34 }
0x142c   : > { %v3384_v36 = vmul.f32 %v5367_v35, %v5367_v35 }
0x142e   : > { %v3391_v38 = vsel %vm1264_vm1, %v3384_v36, 0.0 }
0x142f   : > { %3392 = vadd.xlane.f32.xlu2 %v3391_v38 }
0x145f   : > { %v3387_v49 = vpop.xlane.xlu2 %3386 }
0x1460   : > { %v3394_v42 = vmul.f32 %v3387_v49, %v4795_v12 }
0x1462   : > { %v3397_v51 = vadd.f32 1e-05, %v3394_v42 }
0x1464   : > { %4407 = vrsqrt.f32 %v3397_v51  ;;  %vm3406_vm3 = vweird.f32 %v3397_v51 }
0x146a   : > { %v4408_v45 = vpop.eup %4407 }
0x146b   : > { %v3401_v43 = vmul.f32 %v4408_v45, %v3397_v51  ;;  %vm3407_vm2 = vweird.f32 %v4408_v45 }
0x146c   : > { %vm3408_vm4 = vmor %vm3406_vm3, %vm3407_vm2 }
0x146d   : > { %v3402_v52 = vmul.f32 %v4408_v45, %v3401_v43 }
0x146f   : > { %v3403_v53 = vmul.f32 0.5, %v3402_v52 }
0x1471   : > { %v3404_v50 = vsub.f32 1.5, %v3403_v53 }
0x1473   : > { %v3405_v54 = vmul.f32 %v4408_v45, %v3404_v50  ;;  %v3390_v55 = vpop.xlane.xlu0 %3389 }
0x1474   : > { %v3395_v57 = vmul.f32 %v3390_v55, %v4795_v12 }
0x1475   : > { %v3409_v9 = vsel %vm3408_vm4, %v4408_v45, %v3405_v54 }
0x1476   : > { %v3430_v58 = vmul.f32 %v3409_v9, %v3379_v29  ;;  %v3398_v59 = vadd.f32 1e-05, %v3395_v57  ;;  %v3522_v29 = vld [vmem:[%s5534_s11 + $0x28] sm:$0xff] }
0x1477   : > { %3548 = vmatpush.msra.mxu3 %v3522_v29 }
0x1478   : > { %v3437_v44 = vmul.f32 %v4252_v56, %v3430_v58  ;;  %4409 = vrsqrt.f32 %v3398_v59  ;;  %vm3416_vm6 = vweird.f32 %v3398_v59 }
0x1479   : > { %3549 = vmatpush.msra.mxu3 %v3521_v30 }
0x147a   : > { %v3444_v61 = vadd.f32 %v4253_v60, %v3437_v44 }
0x147b   : > { %3550 = vmatpush.msra.mxu3 %v3520_v21 }
0x147c   : > { %4095 = vmatmul.msk.f32.vlgmr.msra.gmra.mxu2 %vm1257_vm0, %v3444_v61 }
0x147d   : > { %3551 = vmatpush.msra.mxu3 %v3519_v37 }
0x147e   : > { %v4410_v16 = vpop.eup %4409 }
0x147f   : > { %v3411_v62 = vmul.f32 %v4410_v16, %v3398_v59  ;;  %vm3417_vm5 = vweird.f32 %v4410_v16  ;;  %3552 = vmatpush.msra.mxu3 %v3518_v0 }
0x1480   : > { %vm3418_vm7 = vmor %vm3416_vm6, %vm3417_vm5 }
0x1481   : > { %v3412_v63 = vmul.f32 %v4410_v16, %v3411_v62 }
0x1483   : > { %v3413_v1 = vmul.f32 0.5, %v3412_v63 }
0x1485   : > { %v3414_v3 = vsub.f32 1.5, %v3413_v1 }
0x1487   : > { %v3415_v2 = vmul.f32 %v4410_v16, %v3414_v3 }
0x1489   : > { %v3419_v4 = vsel %vm3418_vm7, %v4410_v16, %v3415_v2  ;;  %v4255_v2 = vld [vmem:[%s5536_s16] ss:$0 sm:$0xff]  ;;  %s5541_s16 = sld [smem:[#allocation25_spill]] }
0x148a   : > { %v3431_v5 = vmul.f32 %v3419_v4, %v3380_v23  ;;  %v3517_v23 = vld [vmem:[%s5534_s11] sm:$0xff] }
0x148b   : > { %3553 = vmatpush.msra.mxu3 %v3517_v23  ;;  %v3650_v23 = vld [vmem:[%s5537_s23 + $0x18] sm:$0xff] }
0x148c   : > { %v3438_v7 = vmul.f32 %v4252_v56, %v3431_v5  ;;  %3676 = vmatpush.msra.mxu0 %v3650_v23 }
0x148e   : > { %v3445_v10 = vadd.f32 %v4253_v60, %v3438_v7 }
0x1490   : > { %4096 = vmatmul.msk.f32.gmra.mxu2 %vm1257_vm0, %v3445_v10 }
0x14a2   : > { %v3393_v11 = vpop.xlane.xlu2 %3392 }
0x14a3   : > { %v3396_v13 = vmul.f32 %v3393_v11, %v4795_v12 }
0x14a5   : > { %v3399_v15 = vadd.f32 1e-05, %v3396_v13 }
0x14a7   : > { %4411 = vrsqrt.f32 %v3399_v15  ;;  %vm3426_vm9 = vweird.f32 %v3399_v15 }
0x14ad   : > { %v4412_v17 = vpop.eup %4411 }
0x14ae   : > { %v3421_v8 = vmul.f32 %v4412_v17, %v3399_v15  ;;  %vm3427_vm8 = vweird.f32 %v4412_v17 }
0x14af   : > { %vm3428_vm10 = vmor %vm3426_vm9, %vm3427_vm8 }
0x14b0   : > { %v3422_v19 = vmul.f32 %v4412_v17, %v3421_v8 }
0x14b2   : > { %v3423_v40 = vmul.f32 0.5, %v3422_v19 }
0x14b4   : > { %v3424_v20 = vsub.f32 1.5, %v3423_v40 }
0x14b6   : > { %v3425_v22 = vmul.f32 %v4412_v17, %v3424_v20 }
0x14b8   : > { %v3429_v24 = vsel %vm3428_vm10, %v4412_v17, %v3425_v22 }
0x14b9   : > { %v3432_v25 = vmul.f32 %v3429_v24, %v5367_v35 }
0x14bb   : > { %v3439_v26 = vmul.f32 %v4252_v56, %v3432_v25 }
0x14bd   : > { %v3446_v27 = vadd.f32 %v4253_v60, %v3439_v26 }
0x14bf   : > { %4097 = vmatmul.msk.f32.gmra.mxu2 %vm1257_vm0, %v3446_v27 }
0x14ff   : > { %v3481_v32 = vpop.f32.mrf.mxu2 }
0x1500   : > { %v3482_v33 = vadd.f32 %v4254_v31, %v3481_v32  ;;  %v3648_v32 = vld [vmem:[%s5537_s23 + $0x8] sm:$0xff] }
0x1502   : > { %v3493_v34 = vmul.f32 0.044715, %v3482_v33  ;;  %v3490_v46 = vmul.f32 0.5, %v3482_v33 }
0x1504   : > { %v3496_v35 = vmul.f32 %v3493_v34, %v3482_v33 }
0x1506   : > { %v3499_v36 = vmul.f32 %v3496_v35, %v3482_v33 }
0x1508   : > { %v3502_v38 = vadd.f32 %v3499_v36, %v3482_v33  ;;  %v3647_v33 = vld [vmem:[%s5537_s23] sm:$0xff] }
0x150a   : > { %v3505_v39 = vmul.f32 0.7978846, %v3502_v38 }
0x150c   : > { %4413 = vtanh.f32 %v3505_v39 }
0x1512   : > { %v4414_v41 = vpop.eup %4413 }
0x1513   : > { %v3484_v47 = vpop.f32.mrf.mxu2  ;;  %v3511_v49 = vadd.f32 1.0, %v4414_v41 }
0x1514   : > { %v3485_v42 = vadd.f32 %v4254_v31, %v3484_v47 }
0x1515   : > { %v3514_v51 = vmul.f32 %v3511_v49, %v3490_v46 }
0x1516   : > { %v3494_v45 = vmul.f32 0.044715, %v3485_v42  ;;  %v3491_v55 = vmul.f32 0.5, %v3485_v42 }
0x1517   : > { %4098 = vmatmul.msk.f32.vlgmr.msra.gmra.mxu3 %vm2530_vm15, %v3514_v51  ;;  %v4256_v51 = vld [vmem:[%s4731_s30] ss:$0 sm:$0xff] }
0x1518   : > { %v3497_v43 = vmul.f32 %v3494_v45, %v3485_v42 }
0x151a   : > { %v3500_v52 = vmul.f32 %v3497_v43, %v3485_v42 }
0x151c   : > { %v3503_v53 = vadd.f32 %v3500_v52, %v3485_v42 }
0x151e   : > { %v3506_v50 = vmul.f32 0.7978846, %v3503_v53 }
0x1520   : > { %4415 = vtanh.f32 %v3506_v50  ;;  %v4257_v50 = vld [vmem:[%s5538_s2] ss:$0 sm:$0xff]  ;;  %s5542_s2 = smul.u32 24, %s5544_s10 }
0x1526   : > { %v4416_v54 = vpop.eup %4415 }
0x1527   : > { %v3512_v56 = vadd.f32 1.0, %v4416_v54 }
0x1529   : > { %v3515_v57 = vmul.f32 %v3512_v56, %v3491_v55 }
0x152b   : > { %4099 = vmatmul.msk.f32.gmra.mxu3 %vm2530_vm15, %v3515_v57 }
0x1542   : > { %v3487_v9 = vpop.f32.mrf.mxu2 }
0x1543   : > { %v3488_v58 = vadd.f32 %v4254_v31, %v3487_v9  ;;  %v3649_v31 = vld [vmem:[%s5537_s23 + $0x10] sm:$0xff] }
0x1544   : > { %3677 = vmatpush.msra.mxu0 %v3649_v31 }
0x1545   : > { %v3495_v59 = vmul.f32 0.044715, %v3488_v58  ;;  %v3492_v63 = vmul.f32 0.5, %v3488_v58 }
0x1546   : > { %3678 = vmatpush.msra.mxu0 %v3648_v32 }
0x1547   : > { %v3498_v60 = vmul.f32 %v3495_v59, %v3488_v58 }
0x1548   : > { %3679 = vmatpush.msra.mxu0 %v3647_v33 }
0x1549   : > { %v3501_v44 = vmul.f32 %v3498_v60, %v3488_v58 }
0x154b   : > { %v3504_v61 = vadd.f32 %v3501_v44, %v3488_v58 }
0x154d   : > { %v3507_v16 = vmul.f32 0.7978846, %v3504_v61 }
0x154f   : > { %4417 = vtanh.f32 %v3507_v16 }
0x1555   : > { %v4418_v62 = vpop.eup %4417 }
0x1556   : > { %v3513_v1 = vadd.f32 1.0, %v4418_v62 }
0x1558   : > { %v3516_v3 = vmul.f32 %v3513_v1, %v3492_v63 }
0x155a   : > { %4100 = vmatmul.msk.f32.gmra.mxu3 %vm2530_vm15, %v3516_v3 }
0x159a   : > { %v3555_v4 = vpop.f32.mrf.mxu3 }
0x159b   : > { %v3556_v5 = vadd.f32 %v4255_v2, %v3555_v4 }
0x159d   : > { %v3564_v7 = vadd.f32 %v3556_v5, %v5343_v6 }
0x159f   : > { %v3567_v10 = vsel %vm1257_vm0, %v3564_v7, 0.0 }
0x15a0   : > { %3568 = vadd.xlane.f32.xlu0 %v3567_v10 }
0x15ae   : > { %v3558_v11 = vpop.f32.mrf.mxu3 }
0x15af   : > { %v3559_v13 = vadd.f32 %v4255_v2, %v3558_v11 }
0x15b1   : > { %v3565_v15 = vadd.f32 %v3559_v13, %v5349_v18 }
0x15b3   : > { %v3570_v17 = vsel %vm1257_vm0, %v3565_v15, 0.0 }
0x15b4   : > { %3571 = vadd.xlane.f32.xlu2 %v3570_v17 }
0x15dd   : > { %v3561_v8 = vpop.f32.mrf.mxu3 }
0x15de   : > { %v3562_v19 = vadd.f32 %v4255_v2, %v3561_v8 }
0x15e0   : > { %v3566_v40 = vadd.f32 %v3562_v19, %v5355_v14  ;;  %v4258_v19 = vld [vmem:[%s5539_s0] ss:$0 sm:$0xff]  ;;  %s1253_s0 = scalar_lea.vmem %s4746_s25, %s5542_s2 }
0x15e2   : > { %v3573_v20 = vsel %vm1264_vm1, %v3566_v40, 0.0 }
0x15e3   : > { %3574 = vadd.xlane.f32.xlu0 %v3573_v20 }
0x1613   : > { %v3569_v22 = vpop.xlane.xlu0 %3568 }
0x1614   : > { %v3576_v6 = vmul.f32 %v3569_v22, %v4795_v12 }
0x1616   : > { %v3579_v24 = vsub.f32 %v3564_v7, %v3576_v6 }
0x1618   : > { %v3582_v25 = vmul.f32 %v3579_v24, %v3579_v24 }
0x161a   : > { %v3585_v26 = vsel %vm1257_vm0, %v3582_v25, 0.0 }
0x161b   : > { %3586 = vadd.xlane.f32.xlu1 %v3585_v26 }
0x1627   : > { %v3572_v18 = vpop.xlane.xlu2 %3571 }
0x1628   : > { %v3577_v27 = vmul.f32 %v3572_v18, %v4795_v12 }
0x162a   : > { %v3580_v48 = vsub.f32 %v3565_v15, %v3577_v27 }
0x162c   : > { %v3583_v14 = vmul.f32 %v3580_v48, %v3580_v48 }
0x162e   : > { %v3588_v28 = vsel %vm1257_vm0, %v3583_v14, 0.0 }
0x162f   : > { %3589 = vadd.xlane.f32.xlu2 %v3588_v28 }
0x1656   : > { %v3575_v29 = vpop.xlane.xlu0 %3574 }
0x1657   : > { %v3578_v30 = vmul.f32 %v3575_v29, %v4795_v12 }
0x1659   : > { %v5409_v21 = vsub.f32 %v3566_v40, %v3578_v30 }
0x165b   : > { %v3584_v37 = vmul.f32 %v5409_v21, %v5409_v21 }
0x165d   : > { %v3591_v0 = vsel %vm1264_vm1, %v3584_v37, 0.0 }
0x165e   : > { %3592 = vadd.xlane.f32.xlu0 %v3591_v0 }
0x168e   : > { %v3587_v34 = vpop.xlane.xlu1 %3586 }
0x168f   : > { %v3594_v35 = vmul.f32 %v3587_v34, %v4795_v12 }
0x1691   : > { %v3597_v36 = vadd.f32 1e-12, %v3594_v35 }
0x1693   : > { %4419 = vrsqrt.f32 %v3597_v36  ;;  %vm3606_vm11 = vweird.f32 %v3597_v36 }
0x1699   : > { %v4420_v38 = vpop.eup %4419 }
0x169a   : > { %v3601_v39 = vmul.f32 %v4420_v38, %v3597_v36  ;;  %vm3607_vm15 = vweird.f32 %v4420_v38 }
0x169b   : > { %vm3608_vm12 = vmor %vm3606_vm11, %vm3607_vm15 }
0x169c   : > { %v3602_v41 = vmul.f32 %v4420_v38, %v3601_v39 }
0x169e   : > { %v3603_v46 = vmul.f32 0.5, %v3602_v41 }
0x16a0   : > { %v3604_v47 = vsub.f32 1.5, %v3603_v46 }
0x16a2   : > { %v3605_v49 = vmul.f32 %v4420_v38, %v3604_v47  ;;  %v3590_v42 = vpop.xlane.xlu2 %3589 }
0x16a3   : > { %v3595_v45 = vmul.f32 %v3590_v42, %v4795_v12 }
0x16a4   : > { %v3609_v43 = vsel %vm3608_vm12, %v4420_v38, %v3605_v49 }
0x16a5   : > { %v3630_v52 = vmul.f32 %v3609_v43, %v3579_v24  ;;  %v3598_v53 = vadd.f32 1e-12, %v3595_v45 }
0x16a7   : > { %v3637_v54 = vmul.f32 %v4256_v51, %v3630_v52  ;;  %4421 = vrsqrt.f32 %v3598_v53  ;;  %vm3616_vm14 = vweird.f32 %v3598_v53 }
0x16a9   : > { %v3644_v55 = vadd.f32 %v4257_v50, %v3637_v54 }
0x16ab   : > { %4101 = vmatmul.msk.f32.vlgmr.msra.gmra.mxu0 %vm1257_vm0, %v3644_v55 }
0x16ad   : > { %v4422_v56 = vpop.eup %4421 }
0x16ae   : > { %v3611_v57 = vmul.f32 %v4422_v56, %v3598_v53  ;;  %vm3617_vm13 = vweird.f32 %v4422_v56 }
0x16af   : > { %vm3618_vm2 = vmor %vm3616_vm14, %vm3617_vm13  ;;  %vm3851_vm13 = vcmask 228352   ;;  %vm3854_vm14 = vcmask 221184  }
0x16b0   : > { %v3612_v9 = vmul.f32 %v4422_v56, %v3611_v57 }
0x16b2   : > { %v3613_v58 = vmul.f32 0.5, %v3612_v9 }
0x16b4   : > { %v3614_v59 = vsub.f32 1.5, %v3613_v58 }
0x16b6   : > { %v3615_v60 = vmul.f32 %v4422_v56, %v3614_v59 }
0x16b8   : > { %v3619_v44 = vsel %vm3618_vm2, %v4422_v56, %v3615_v60 }
0x16b9   : > { %v3631_v61 = vmul.f32 %v3619_v44, %v3580_v48 }
0x16bb   : > { %v3638_v16 = vmul.f32 %v4256_v51, %v3631_v61 }
0x16bd   : > { %v3645_v62 = vadd.f32 %v4257_v50, %v3638_v16 }
0x16bf   : > { %4102 = vmatmul.msk.f32.gmra.mxu0 %vm1257_vm0, %v3645_v62 }
0x16d1   : > { %v3593_v63 = vpop.xlane.xlu0 %3592 }
0x16d2   : > { %v3596_v1 = vmul.f32 %v3593_v63, %v4795_v12 }
0x16d4   : > { %v3599_v3 = vadd.f32 1e-12, %v3596_v1 }
0x16d6   : > { %4423 = vrsqrt.f32 %v3599_v3  ;;  %vm3626_vm4 = vweird.f32 %v3599_v3 }
0x16dc   : > { %v4424_v2 = vpop.eup %4423 }
0x16dd   : > { %v3621_v4 = vmul.f32 %v4424_v2, %v3599_v3  ;;  %vm3627_vm3 = vweird.f32 %v4424_v2  ;;  %v3800_v3 = vld [vmem:[%s5540_s15 + $0x18] sm:$0xf] }
0x16de   : > { %vm3628_vm5 = vmor %vm3626_vm4, %vm3627_vm3  ;;  %4104 = vmatpush.xpose.msk.msra.mxu1 %vm1257_vm0, %v3800_v3 }
0x16df   : > { %v3622_v5 = vmul.f32 %v4424_v2, %v3621_v4  ;;  %v3798_v4 = vld [vmem:[%s5540_s15 + $0x8] sm:$0xff] }
0x16e1   : > { %v3623_v7 = vmul.f32 0.5, %v3622_v5  ;;  %v3797_v5 = vld [vmem:[%s5540_s15] sm:$0xff] }
0x16e3   : > { %v3624_v10 = vsub.f32 1.5, %v3623_v7 }
0x16e5   : > { %v3625_v11 = vmul.f32 %v4424_v2, %v3624_v10 }
0x16e7   : > { %v3629_v13 = vsel %vm3628_vm5, %v4424_v2, %v3625_v11  ;;  %v3799_v2 = vld [vmem:[%s5540_s15 + $0x10] sm:$0xff] }
0x16e8   : > { %v3632_v15 = vmul.f32 %v3629_v13, %v5409_v21  ;;  %4105 = vmatpush.xpose.msk.msra.mxu1 %vm1257_vm0, %v3799_v2 }
0x16ea   : > { %v3639_v17 = vmul.f32 %v4256_v51, %v3632_v15 }
0x16ec   : > { %v3646_v8 = vadd.f32 %v4257_v50, %v3639_v17  ;;  %4106 = vmatpush.xpose.msk.msra.mxu1 %vm1257_vm0, %v3798_v4 }
0x16ee   : > { %4103 = vmatmul.msk.f32.gmra.mxu0 %vm1257_vm0, %v3646_v8 }
0x16f0   : > { %4107 = vmatpush.xpose.msk.msra.mxu1 %vm1257_vm0, %v3797_v5 }
0x1728   : > { %v3681_v40 = vpop.f32.mrf.mxu0 }
0x1729   : > { %v3682_v20 = vadd.f32 %v4258_v19, %v3681_v40 }
0x172b   : > { %v3693_v22 = vmul.f32 0.044715, %v3682_v20  ;;  %v3690_v48 = vmul.f32 0.5, %v3682_v20 }
0x172d   : > { %v3696_v6 = vmul.f32 %v3693_v22, %v3682_v20  ;;  %v4259_v22 = vld [vmem:[#allocation2] ss:$0 sm:$0xff] }
0x172f   : > { %v3699_v24 = vmul.f32 %v3696_v6, %v3682_v20 }
0x1731   : > { %v3702_v25 = vadd.f32 %v3699_v24, %v3682_v20 }
0x1733   : > { %v3705_v26 = vmul.f32 0.7978846, %v3702_v25 }
0x1735   : > { %4425 = vtanh.f32 %v3705_v26 }
0x173b   : > { %v4426_v18 = vpop.eup %4425 }
0x173c   : > { %v3684_v27 = vpop.f32.mrf.mxu0  ;;  %v3711_v14 = vadd.f32 1.0, %v4426_v18  ;;  %v4260_v18 = vld [vmem:[%s4736_s19] ss:$0 sm:$0xff] }
0x173d   : > { %v3685_v28 = vadd.f32 %v4258_v19, %v3684_v27 }
0x173e   : > { %v3714_v29 = vmul.f32 %v3711_v14, %v3690_v48 }
0x173f   : > { %v3694_v30 = vmul.f32 0.044715, %v3685_v28  ;;  %v3691_v33 = vmul.f32 0.5, %v3685_v28 }
0x1740   : > { %v3717_v21 = vsel %vm1257_vm0, %v3714_v29, 0.0 }
0x1741   : > { %3718 = vadd.xlane.f32.xlu1 %v3717_v21  ;;  %v3697_v37 = vmul.f32 %v3694_v30, %v3685_v28 }
0x1743   : > { %v3700_v0 = vmul.f32 %v3697_v37, %v3685_v28 }
0x1745   : > { %v3703_v23 = vadd.f32 %v3700_v0, %v3685_v28 }
0x1747   : > { %v3706_v31 = vmul.f32 0.7978846, %v3703_v23 }
0x1749   : > { %4427 = vtanh.f32 %v3706_v31 }
0x174f   : > { %v4428_v32 = vpop.eup %4427 }
0x1750   : > { %v3712_v34 = vadd.f32 1.0, %v4428_v32 }
0x1752   : > { %v3715_v35 = vmul.f32 %v3712_v34, %v3691_v33 }
0x1754   : > { %v3720_v36 = vsel %vm1257_vm0, %v3715_v35, 0.0 }
0x1755   : > { %3721 = vadd.xlane.f32.xlu2 %v3720_v36 }
0x176b   : > { %v3687_v38 = vpop.f32.mrf.mxu0 }
0x176c   : > { %v3688_v39 = vadd.f32 %v4258_v19, %v3687_v38 }
0x176e   : > { %v3695_v41 = vmul.f32 0.044715, %v3688_v39  ;;  %v3692_v45 = vmul.f32 0.5, %v3688_v39 }
0x1770   : > { %v3698_v46 = vmul.f32 %v3695_v41, %v3688_v39 }
0x1772   : > { %v3701_v47 = vmul.f32 %v3698_v46, %v3688_v39 }
0x1774   : > { %v3704_v49 = vadd.f32 %v3701_v47, %v3688_v39 }
0x1776   : > { %v3707_v42 = vmul.f32 0.7978846, %v3704_v49 }
0x1778   : > { %4429 = vtanh.f32 %v3707_v42 }
0x177e   : > { %v4430_v51 = vpop.eup %4429 }
0x177f   : > { %v3713_v43 = vadd.f32 1.0, %v4430_v51 }
0x1781   : > { %v3716_v52 = vmul.f32 %v3713_v43, %v3692_v45  ;;  %v3801_v45 = vld [vmem:[%s5541_s16] sm:$0xff] }
0x1783   : > { %v3723_v53 = vsel %vm1264_vm1, %v3716_v52, 0.0 }
0x1784   : > { %3724 = vadd.xlane.f32.xlu0 %v3723_v53  ;;  %v3802_v53 = vld [vmem:[%s5541_s16 + $0x8] sm:$0xff] }
0x17b4   : > { %v3719_v50 = vpop.xlane.xlu1 %3718 }
0x17b5   : > { %v3726_v54 = vmul.f32 %v3719_v50, %v4795_v12 }
0x17b7   : > { %v3729_v55 = vsub.f32 %v3714_v29, %v3726_v54 }
0x17b9   : > { %v3732_v56 = vmul.f32 %v3729_v55, %v3729_v55 }
0x17bb   : > { %v3735_v57 = vsel %vm1257_vm0, %v3732_v56, 0.0 }
0x17bc   : > { %3736 = vadd.xlane.f32.xlu1 %v3735_v57 }
0x17c8   : > { %v3722_v9 = vpop.xlane.xlu2 %3721 }
0x17c9   : > { %v3727_v58 = vmul.f32 %v3722_v9, %v4795_v12 }
0x17cb   : > { %v3730_v59 = vsub.f32 %v3715_v35, %v3727_v58 }
0x17cd   : > { %v3733_v60 = vmul.f32 %v3730_v59, %v3730_v59 }
0x17cf   : > { %v3738_v44 = vsel %vm1257_vm0, %v3733_v60, 0.0 }
0x17d0   : > { %3739 = vadd.xlane.f32.xlu2 %v3738_v44 }
0x17f7   : > { %v3725_v61 = vpop.xlane.xlu0 %3724 }
0x17f8   : > { %v3728_v16 = vmul.f32 %v3725_v61, %v4795_v12 }
0x17fa   : > { %v5436_v62 = vsub.f32 %v3716_v52, %v3728_v16 }
0x17fc   : > { %v3734_v63 = vmul.f32 %v5436_v62, %v5436_v62 }
0x17fe   : > { %v3741_v1 = vsel %vm1264_vm1, %v3734_v63, 0.0 }
0x17ff   : > { %3742 = vadd.xlane.f32.xlu0 %v3741_v1 }
0x182f   : > { %v3737_v7 = vpop.xlane.xlu1 %3736 }
0x1830   : > { %v3744_v10 = vmul.f32 %v3737_v7, %v4795_v12 }
0x1832   : > { %v3747_v11 = vadd.f32 1e-12, %v3744_v10 }
0x1834   : > { %4431 = vrsqrt.f32 %v3747_v11  ;;  %vm3756_vm6 = vweird.f32 %v3747_v11 }
0x183a   : > { %v4432_v13 = vpop.eup %4431 }
0x183b   : > { %v3751_v15 = vmul.f32 %v4432_v13, %v3747_v11  ;;  %vm3757_vm1 = vweird.f32 %v4432_v13 }
0x183c   : > { %vm3758_vm7 = vmor %vm3756_vm6, %vm3757_vm1 }
0x183d   : > { %v3752_v17 = vmul.f32 %v4432_v13, %v3751_v15 }
0x183f   : > { %v3753_v8 = vmul.f32 0.5, %v3752_v17 }
0x1841   : > { %v3754_v19 = vsub.f32 1.5, %v3753_v8 }
0x1843   : > { %v3755_v40 = vmul.f32 %v4432_v13, %v3754_v19  ;;  %v3740_v20 = vpop.xlane.xlu2 %3739 }
0x1844   : > { %v3745_v6 = vmul.f32 %v3740_v20, %v4795_v12 }
0x1845   : > { %v3759_v24 = vsel %vm3758_vm7, %v4432_v13, %v3755_v40 }
0x1846   : > { %v3780_v25 = vmul.f32 %v3759_v24, %v3729_v55  ;;  %v3748_v26 = vadd.f32 1e-12, %v3745_v6  ;;  %v3803_v55 = vld [vmem:[%s5541_s16 + $0x10] sm:$0x1] }
0x1848   : > { %v3787_v27 = vmul.f32 %v4259_v22, %v3780_v25  ;;  %4433 = vrsqrt.f32 %v3748_v26  ;;  %vm3766_vm9 = vweird.f32 %v3748_v26 }
0x184a   : > { %v3794_v48 = vadd.f32 %v4260_v18, %v3787_v27 }
0x184c   : > { %4108 = vmatmul.msk.f32.vlgmr.msra.gmra.mxu1 %vm1257_vm0, %v3794_v48 }
0x184e   : > { %v4434_v14 = vpop.eup %4433 }
0x184f   : > { %v3761_v28 = vmul.f32 %v4434_v14, %v3748_v26  ;;  %vm3767_vm8 = vweird.f32 %v4434_v14 }
0x1850   : > { %vm3768_vm10 = vmor %vm3766_vm9, %vm3767_vm8 }
0x1851   : > { %v3762_v29 = vmul.f32 %v4434_v14, %v3761_v28 }
0x1853   : > { %v3763_v30 = vmul.f32 0.5, %v3762_v29 }
0x1855   : > { %v3764_v21 = vsub.f32 1.5, %v3763_v30 }
0x1857   : > { %v3765_v37 = vmul.f32 %v4434_v14, %v3764_v21 }
0x1859   : > { %v3769_v0 = vsel %vm3768_vm10, %v4434_v14, %v3765_v37 }
0x185a   : > { %v3781_v23 = vmul.f32 %v3769_v0, %v3730_v59 }
0x185c   : > { %v3788_v31 = vmul.f32 %v4259_v22, %v3781_v23 }
0x185e   : > { %v3795_v32 = vadd.f32 %v4260_v18, %v3788_v31 }
0x1860   : > { %4109 = vmatmul.msk.f32.gmra.mxu1 %vm1257_vm0, %v3795_v32 }
0x1872   : > { %v3743_v33 = vpop.xlane.xlu0 %3742 }
0x1873   : > { %v3746_v34 = vmul.f32 %v3743_v33, %v4795_v12 }
0x1875   : > { %v3749_v35 = vadd.f32 1e-12, %v3746_v34 }
0x1877   : > { %4435 = vrsqrt.f32 %v3749_v35  ;;  %vm3776_vm11 = vweird.f32 %v3749_v35 }
0x187d   : > { %v4436_v36 = vpop.eup %4435 }
0x187e   : > { %v3771_v38 = vmul.f32 %v4436_v36, %v3749_v35  ;;  %vm3777_vm15 = vweird.f32 %v4436_v36 }
0x187f   : > { %vm3778_vm12 = vmor %vm3776_vm11, %vm3777_vm15 }
0x1880   : > { %v3772_v39 = vmul.f32 %v4436_v36, %v3771_v38 }
0x1882   : > { %v3773_v41 = vmul.f32 0.5, %v3772_v39 }
0x1884   : > { %v3774_v46 = vsub.f32 1.5, %v3773_v41 }
0x1886   : > { %v3775_v47 = vmul.f32 %v4436_v36, %v3774_v46 }
0x1888   : > { %v3779_v49 = vsel %vm3778_vm12, %v4436_v36, %v3775_v47 }
0x1889   : > { %v3782_v42 = vmul.f32 %v3779_v49, %v5436_v62 }
0x188b   : > { %v3789_v12 = vmul.f32 %v4259_v22, %v3782_v42 }
0x188d   : > { %v3796_v51 = vadd.f32 %v4260_v18, %v3789_v12 }
0x188f   : > { %4110 = vmatmul.msk.f32.gmra.mxu1 %vm1257_vm0, %v3796_v51 }
0x18c9   : > { %v3842_v43 = vpop.f32.mrf.mxu1 }
0x18ca   : > { %v3843_v52 = vadd.f32 %v3842_v43, %v3801_v45 }
0x18cc   : > { %3852 = vst.msk [vmem:[%s1253_s0] sm:$0xff] %vm3851_vm13, %v3843_v52 }
0x18dd   : > { %v3845_v50 = vpop.f32.mrf.mxu1 }
0x18de   : > { %v3846_v54 = vadd.f32 %v3845_v50, %v3802_v53 }
0x18e0   : > { %3853 = vst.msk [vmem:[%s1253_s0 + $0x8] sm:$0xff] %vm3851_vm13, %v3846_v54 }
0x190c   : > { %v3848_v56 = vpop.f32.mrf.mxu1 }
0x190d   : > { %v3849_v57 = vadd.f32 %v3848_v56, %v3803_v55 }
0x190f   : > { %3855 = vst.msk [vmem:[%s1253_s0 + $0x10] sm:$0x1] %vm3854_vm14, %v3849_v57 }
0x1910 PF: > { %s94_s7 = sadd.s32 1, %s4477_s7  }
0x1911   : > { %p91_p1 = scmp.ge.s32.totalorder %s94_s7, 4  }
0x1913   :  { %93 = sbr.rel (!%p91_p1) target bundleno = 72 (0x48), region = 260 }
0x1918   :  { %3877 = vsyncpa [#allocation3], 1 }
0x1919   :  { %3879 = vsyncpa [#allocation3 + $0x1], 1 }

</bundles_post_ra>
